<compile_context>
chip_gen: v6e
topology: v6e:2x2x1
jax: 0.10.0
libtpu: 0.0.40
codegen_flags: <defaults>
</compile_context>

<pallas_src>
import jax
import jax.numpy as jnp
from jax.experimental import pallas as pl
from jax.experimental.pallas import tpu as pltpu

BN_EPS = 1e-5
KSIZE = 5
PAD = 1
MAX_TILE_M = 512     # lane tile for M; can be raised to 1024-2048 on v5e/v6e

_PARALLEL = pltpu.CompilerParams(dimension_semantics=("parallel",))


# ----------------------------- Pallas kernels ------------------------------

def conv_mm_stats_kernel(w_ref, x_ref, acc_ref, sum_ref, ssq_ref):
    # w_ref: (C, K) bf16, x_ref: (K, TM) bf16 -> acc (C, TM) f32, lane-dense M.
    acc = jnp.dot(w_ref[...], x_ref[...], preferred_element_type=jnp.float32)
    acc_ref[...] = acc
    # per-tile partial moments for the (global) batch-norm statistics;
    # zero-padded lanes contribute exactly 0 to both.
    sum_ref[...] = jnp.sum(acc, axis=1, keepdims=True)[None]        # (1, C, 1)
    ssq_ref[...] = jnp.sum(acc * acc, axis=1, keepdims=True)[None]  # (1, C, 1)


def bn_relu_kernel(a_ref, scale_ref, shift_ref, o_ref):
    # folded BatchNorm (scale/shift from global stats) + ReLU, f32 math.
    o_ref[...] = jnp.maximum(a_ref[...] * scale_ref[...] + shift_ref[...], 0.0)


def bn_relu_pool_kernel(a_ref, b_ref, c_ref, d_ref, scale_ref, shift_ref, o_ref):
    # folded BN + ReLU applied to the 4 elements of each 2x2 window, then max
    # (correct for any BN scale sign; lane-dense throughout).
    s = scale_ref[...]
    t = shift_ref[...]
    ya = jnp.maximum(a_ref[...] * s + t, 0.0)
    yb = jnp.maximum(b_ref[...] * s + t, 0.0)
    yc = jnp.maximum(c_ref[...] * s + t, 0.0)
    yd = jnp.maximum(d_ref[...] * s + t, 0.0)
    o_ref[...] = jnp.maximum(jnp.maximum(ya, yb), jnp.maximum(yc, yd))


def linear_kernel(w_ref, x_ref, b_ref, o_ref):
    o_ref[...] = (jnp.dot(w_ref[...], x_ref[...],
                          preferred_element_type=jnp.float32) + b_ref[...])


# ------------------------------ helpers ------------------------------------

def _round_up(x, m):
    return ((x + m - 1) // m) * m


def _tiling(m, max_tile=MAX_TILE_M):
    """Return (lane_tile, padded_M) with lane_tile a multiple of 128."""
    mp = _round_up(m, 128)
    if mp <= max_tile:
        return mp, mp
    return max_tile, _round_up(m, max_tile)


def _pad_lanes(x, target):
    pad = target - x.shape[-1]
    if pad == 0:
        return x
    return jnp.pad(x, [(0, 0)] * (x.ndim - 1) + [(0, pad)])


# ----------------------------- Pallas wrappers -----------------------------

def pallas_conv_mm_stats(w, x, tile_m):
    c, k = w.shape
    mp = x.shape[1]
    nt = mp // tile_m
    return pl.pallas_call(
        conv_mm_stats_kernel,
        out_shape=(jax.ShapeDtypeStruct((c, mp), jnp.float32),
                   jax.ShapeDtypeStruct((nt, c, 1), jnp.float32),
                   jax.ShapeDtypeStruct((nt, c, 1), jnp.float32)),
        grid=(nt,),
        in_specs=[pl.BlockSpec((c, k), lambda i: (0, 0)),
                  pl.BlockSpec((k, tile_m), lambda i: (0, i))],
        out_specs=(pl.BlockSpec((c, tile_m), lambda i: (0, i)),
                   pl.BlockSpec((1, c, 1), lambda i: (i, 0, 0)),
                   pl.BlockSpec((1, c, 1), lambda i: (i, 0, 0))),
        compiler_params=_PARALLEL,
    )(w, x)


def pallas_bn_relu(acc, scale, shift, tile_m):
    c, mp = acc.shape
    nt = mp // tile_m
    return pl.pallas_call(
        bn_relu_kernel,
        out_shape=jax.ShapeDtypeStruct((c, mp), jnp.float32),
        grid=(nt,),
        in_specs=[pl.BlockSpec((c, tile_m), lambda i: (0, i)),
                  pl.BlockSpec((c, 1), lambda i: (0, 0)),
                  pl.BlockSpec((c, 1), lambda i: (0, 0))],
        out_specs=pl.BlockSpec((c, tile_m), lambda i: (0, i)),
        compiler_params=_PARALLEL,
    )(acc, scale, shift)


def pallas_bn_relu_pool(a, b, c_, d, scale, shift, tile_m):
    c, mp = a.shape
    nt = mp // tile_m
    data_spec = pl.BlockSpec((c, tile_m), lambda i: (0, i))
    vec_spec = pl.BlockSpec((c, 1), lambda i: (0, 0))
    return pl.pallas_call(
        bn_relu_pool_kernel,
        out_shape=jax.ShapeDtypeStruct((c, mp), jnp.float32),
        grid=(nt,),
        in_specs=[data_spec] * 4 + [vec_spec] * 2,
        out_specs=pl.BlockSpec((c, tile_m), lambda i: (0, i)),
        compiler_params=_PARALLEL,
    )(a, b, c_, d, scale, shift)


def pallas_linear(w, x, b, tile_n):
    c, k = w.shape
    np_ = x.shape[1]
    nt = np_ // tile_n
    return pl.pallas_call(
        linear_kernel,
        out_shape=jax.ShapeDtypeStruct((c, np_), jnp.float32),
        grid=(nt,),
        in_specs=[pl.BlockSpec((c, k), lambda i: (0, 0)),
                  pl.BlockSpec((k, tile_n), lambda i: (0, i)),
                  pl.BlockSpec((c, 1), lambda i: (0, 0))],
        out_specs=pl.BlockSpec((c, tile_n), lambda i: (0, i)),
        compiler_params=_PARALLEL,
    )(w, x, b)


# ------------------------------ glue (JAX) ---------------------------------

def _im2col_cnhw(x, ksize, pad):
    """x: (Cin, N, H, W) -> patches^T (K, M); K order (kh, kw, cin), M order (n, h, w)."""
    cin, n, h, w = x.shape
    xp = jnp.pad(x, ((0, 0), (0, 0), (pad, pad), (pad, pad)))
    ho = h + 2 * pad - ksize + 1
    wo = w + 2 * pad - ksize + 1
    rows = []
    for kh in range(ksize):
        for kw in range(ksize):
            rows.append(xp[:, :, kh:kh + ho, kw:kw + wo].reshape(cin, n * ho * wo))
    # TODO(synk): fuse im2col into the matmul kernel (overlapping-window DMA)
    # so the 25x-inflated patches matrix is never materialized in HBM.
    return jnp.concatenate(rows, axis=0), ho, wo


def conv_bn_relu(x, w_kc, gamma, beta, *, pool=False):
    """x: (Cin, N, H, W) f32; w_kc: (Cout, K) bf16 -> (Cout, N, Ho', Wo') f32."""
    cin, n, h, w = x.shape
    cout = w_kc.shape[0]
    patches, ho, wo = _im2col_cnhw(x, KSIZE, PAD)
    m = n * ho * wo
    tile_m, mp = _tiling(m)
    patches = _pad_lanes(patches.astype(jnp.bfloat16), mp)

    acc, psum, pssq = pallas_conv_mm_stats(w_kc, patches, tile_m)

    # global batch statistics (training-mode BN): biased variance, f32.
    s = jnp.sum(psum[:, :, 0], axis=0)
    q = jnp.sum(pssq[:, :, 0], axis=0)
    mean = s / m
    var = jnp.maximum(q / m - mean * mean, 0.0)
    inv = jax.lax.rsqrt(var + BN_EPS)
    scale = (gamma * inv).reshape(cout, 1)
    shift = (beta - mean * gamma * inv).reshape(cout, 1)
    # NOTE: conv bias omitted — it is exactly cancelled by batch-stat BatchNorm.

    if not pool:
        y = pallas_bn_relu(acc, scale, shift, tile_m)
        return y[:, :m].reshape(cout, n, ho, wo)

    # fused BN + ReLU + 2x2 maxpool: the four window elements are presented as
    # four lane-dense (Cout, N*Ho/2*Wo/2) slabs of the raw conv accumulator.
    a4 = acc[:, :m].reshape(cout, n, ho, wo)
    wins = [a4[:, :, 0::2, 0::2], a4[:, :, 0::2, 1::2],
            a4[:, :, 1::2, 0::2], a4[:, :, 1::2, 1::2]]
    mq = n * (ho // 2) * (wo // 2)
    tile_q, mqp = _tiling(mq)
    wins = [_pad_lanes(wv.reshape(cout, mq), mqp) for wv in wins]
    y = pallas_bn_relu_pool(wins[0], wins[1], wins[2], wins[3],
                            scale, shift, tile_q)
    return y[:, :mq].reshape(cout, n, ho // 2, wo // 2)


def linear_layer(x, wf, bf):
    """x: (C, N, H, W) f32; wf: (10, C*H*W) bf16 (PyTorch fc layout); bf: (10, 1)."""
    c, n, h, w = x.shape
    # match PyTorch .view(-1, C*H*W) on NCHW: per-sample feature order (c, h, w)
    feat = jnp.transpose(x, (0, 2, 3, 1)).reshape(c * h * w, n).astype(jnp.bfloat16)
    tile_n, np_ = _tiling(n)
    feat = _pad_lanes(feat, np_)
    out = pallas_linear(wf, feat, bf, tile_n)            # (10, Np), lane-dense N
    return out[:, :n].T                                   # (N, 10) f32


# ------------------------------ parameters ---------------------------------

def init_params(key):
    ks = jax.random.split(key, 10)
    p = {}
    # conv1: 3 -> 12, conv2: 12 -> 12, conv4: 12 -> 24, conv5: 24 -> 24
    p['w1'] = 0.05 * jax.random.normal(ks[0], (12, 3, 5, 5), jnp.float32)
    p['b1'] = 0.01 * jax.random.normal(ks[1], (12,), jnp.float32)
    p['w2'] = 0.05 * jax.random.normal(ks[2], (12, 12, 5, 5), jnp.float32)
    p['b2'] = 0.01 * jax.random.normal(ks[3], (12,), jnp.float32)
    p['w4'] = 0.05 * jax.random.normal(ks[4], (24, 12, 5, 5), jnp.float32)
    p['b4'] = 0.01 * jax.random.normal(ks[5], (24,), jnp.float32)
    p['w5'] = 0.05 * jax.random.normal(ks[6], (24, 24, 5, 5), jnp.float32)
    p['b5'] = 0.01 * jax.random.normal(ks[7], (24,), jnp.float32)
    # BatchNorm affine params (fresh module: gamma=1, beta=0)
    for name, c in (('1', 12), ('2', 12), ('4', 24), ('5', 24)):
        p['g' + name] = jnp.ones((c,), jnp.float32)
        p['be' + name] = jnp.zeros((c,), jnp.float32)
    # fc1: 2400 -> 10 (PyTorch weight shape (10, 2400))
    p['wf'] = 0.02 * jax.random.normal(ks[8], (10, 24 * 10 * 10), jnp.float32)
    p['bf'] = 0.01 * jax.random.normal(ks[9], (10,), jnp.float32)
    return p


def prepare_params(p):
    """One-time hoisted layout work: PyTorch layouts -> kernel layouts (bf16 weights).

    Conv biases are intentionally not carried over: with batch-statistics
    BatchNorm immediately after each conv, the bias cancels exactly.
    """
    fp = {}
    for name in ('1', '2', '4', '5'):
        w = p['w' + name]                                    # (Cout, Cin, 5, 5)
        cout = w.shape[0]
        fp['w' + name] = (jnp.transpose(w, (0, 2, 3, 1))      # (Cout, kh, kw, Cin)
                          .reshape(cout, -1).astype(jnp.bfloat16))
        fp['g' + name] = p['g' + name]
        fp['be' + name] = p['be' + name]
    fp['wf'] = p['wf'].astype(jnp.bfloat16)                  # (10, 2400)
    fp['bf'] = p['bf'].reshape(-1, 1).astype(jnp.float32)    # (10, 1)
    return fp


@jax.jit
def network_forward(x_nchw, fp):
    # activations kept in (C, N, H, W) layout so each conv's lane-dense (C, M)
    # output feeds the next layer's im2col without extra transposes.
    x = jnp.transpose(x_nchw, (1, 0, 2, 3)).astype(jnp.float32)
    x = conv_bn_relu(x, fp['w1'], fp['g1'], fp['be1'])               # (12, N, 30, 30)
    x = conv_bn_relu(x, fp['w2'], fp['g2'], fp['be2'], pool=True)    # (12, N, 14, 14)
    x = conv_bn_relu(x, fp['w4'], fp['g4'], fp['be4'])               # (24, N, 12, 12)
    x = conv_bn_relu(x, fp['w5'], fp['g5'], fp['be5'])               # (24, N, 10, 10)
    return linear_layer(x, fp['wf'], fp['bf'])                       # (N, 10)


if __name__ == "__main__":
    key = jax.random.PRNGKey(0)
    pkey, xkey = jax.random.split(key)
    params = init_params(pkey)
    fwd_params = prepare_params(params)
    # fc1 (24*10*10) fixes the input spatial size to 32x32; batch=2, channels=3.
    x = jax.random.normal(xkey, (2, 3, 32, 32), jnp.float32)
    out = network_forward(x, fwd_params)
    out = jax.block_until_ready(out)
    assert out.shape == (2, 10), out.shape
    assert bool(jnp.all(jnp.isfinite(out)))
    print("KERNEL_OK")
</pallas_src>

<mosaic_0001>
module attributes {stable_mosaic.version = 11 : i64} {
  func.func @conv_mm_stats_kernel(%arg0: i32, %arg1: memref<12x75xbf16, #tpu.memory_space<vmem>>, %arg2: memref<75x512xbf16, #tpu.memory_space<vmem>>, %arg3: memref<12x512xf32, #tpu.memory_space<vmem>>, %arg4: memref<1x12x1xf32, #tpu.memory_space<vmem>>, %arg5: memref<1x12x1xf32, #tpu.memory_space<vmem>>) attributes {dimension_semantics = [#tpu.dimension_semantics<parallel>], iteration_bounds = array<i64: 4>, scalar_prefetch = 0 : i64, scratch_operands = 0 : i64, tpu.core_type = #tpu.core_type<tc>, window_params = [{pipeline_mode = #tpu.pipeline_mode<synchronous>, transform_indices = @transform_0, window_bounds = array<i64: 12, 75>}, {transform_indices = @transform_1, window_bounds = array<i64: 75, 512>}, {transform_indices = @transform_2, window_bounds = array<i64: 12, 512>}, {transform_indices = @transform_3, window_bounds = array<i64: 1, 12, 1>}, {transform_indices = @transform_4, window_bounds = array<i64: 1, 12, 1>}]} {
    %c0 = arith.constant 0 : index
    %c0_0 = arith.constant 0 : index
    %0 = vector.load %arg1[%c0, %c0_0] : memref<12x75xbf16, #tpu.memory_space<vmem>>, vector<12x75xbf16>
    %c0_1 = arith.constant 0 : index
    %c0_2 = arith.constant 0 : index
    %1 = vector.load %arg2[%c0_1, %c0_2] : memref<75x512xbf16, #tpu.memory_space<vmem>>, vector<75x512xbf16>
    %cst = arith.constant dense<0.000000e+00> : vector<12x512xf32>
    %2 = tpu.matmul %0, %1, %cst {dimension_numbers = #tpu.dot_dimension_numbers<[1], [0], [0], [1], [0, 0, 1, 1], [], []>} : vector<12x75xbf16>, vector<75x512xbf16>, vector<12x512xf32> -> vector<12x512xf32>
    %c0_3 = arith.constant 0 : index
    %c0_4 = arith.constant 0 : index
    %3 = vector.load %arg3[%c0_3, %c0_4] : memref<12x512xf32, #tpu.memory_space<vmem>>, vector<12x512xf32>
    tpu.vector_store %arg3[%c0_3, %c0_4], %2 {strides = array<i32>} : memref<12x512xf32, #tpu.memory_space<vmem>>, vector<12x512xf32>,
    %cst_5 = arith.constant dense<0.000000e+00> : vector<12xf32>
    %4 = vector.multi_reduction <add>, %2, %cst_5 [1] : vector<12x512xf32> to vector<12xf32>
    %5 = vector.shape_cast %4 : vector<12xf32> to vector<12x1xf32>
    %6 = vector.shape_cast %5 : vector<12x1xf32> to vector<1x12x1xf32>
    %c0_6 = arith.constant 0 : index
    %c0_7 = arith.constant 0 : index
    %c0_8 = arith.constant 0 : index
    %7 = vector.load %arg4[%c0_6, %c0_7, %c0_8] : memref<1x12x1xf32, #tpu.memory_space<vmem>>, vector<1x12x1xf32>
    tpu.vector_store %arg4[%c0_6, %c0_7, %c0_8], %6 {strides = array<i32>} : memref<1x12x1xf32, #tpu.memory_space<vmem>>, vector<1x12x1xf32>,
    %8 = arith.mulf %2, %2 : vector<12x512xf32>
    %cst_9 = arith.constant dense<0.000000e+00> : vector<12xf32>
    %9 = vector.multi_reduction <add>, %8, %cst_9 [1] : vector<12x512xf32> to vector<12xf32>
    %10 = vector.shape_cast %9 : vector<12xf32> to vector<12x1xf32>
    %11 = vector.shape_cast %10 : vector<12x1xf32> to vector<1x12x1xf32>
    %c0_10 = arith.constant 0 : index
    %c0_11 = arith.constant 0 : index
    %c0_12 = arith.constant 0 : index
    %12 = vector.load %arg5[%c0_10, %c0_11, %c0_12] : memref<1x12x1xf32, #tpu.memory_space<vmem>>, vector<1x12x1xf32>
    tpu.vector_store %arg5[%c0_10, %c0_11, %c0_12], %11 {strides = array<i32>} : memref<1x12x1xf32, #tpu.memory_space<vmem>>, vector<1x12x1xf32>,
    return
  }
  func.func @transform_0(%arg0: i32) -> (i32, i32) {
    %c0_i32 = arith.constant 0 : i32
    %c0_i32_0 = arith.constant 0 : i32
    %c0_i32_1 = arith.constant 0 : i32
    return %c0_i32, %c0_i32_0 : i32, i32
  }
  func.func @transform_1(%arg0: i32) -> (i32, i32) {
    %c0_i32 = arith.constant 0 : i32
    %c0_i32_0 = arith.constant 0 : i32
    return %c0_i32, %arg0 : i32, i32
  }
  func.func @transform_2(%arg0: i32) -> (i32, i32) {
    %c0_i32 = arith.constant 0 : i32
    %c0_i32_0 = arith.constant 0 : i32
    return %c0_i32, %arg0 : i32, i32
  }
  func.func @transform_3(%arg0: i32) -> (i32, i32, i32) {
    %c0_i32 = arith.constant 0 : i32
    %c0_i32_0 = arith.constant 0 : i32
    %c0_i32_1 = arith.constant 0 : i32
    return %arg0, %c0_i32, %c0_i32_0 : i32, i32, i32
  }
  func.func @transform_4(%arg0: i32) -> (i32, i32, i32) {
    %c0_i32 = arith.constant 0 : i32
    %c0_i32_0 = arith.constant 0 : i32
    %c0_i32_1 = arith.constant 0 : i32
    return %arg0, %c0_i32, %c0_i32_0 : i32, i32, i32
  }
}

module attributes {stable_mosaic.version = 11 : i64} {
  func.func @bn_relu_kernel(%arg0: i32, %arg1: memref<12x512xf32, #tpu.memory_space<vmem>>, %arg2: memref<12x1xf32, #tpu.memory_space<vmem>>, %arg3: memref<12x1xf32, #tpu.memory_space<vmem>>, %arg4: memref<12x512xf32, #tpu.memory_space<vmem>>) attributes {dimension_semantics = [#tpu.dimension_semantics<parallel>], iteration_bounds = array<i64: 4>, scalar_prefetch = 0 : i64, scratch_operands = 0 : i64, tpu.core_type = #tpu.core_type<tc>, window_params = [{transform_indices = @transform_0, window_bounds = array<i64: 12, 512>}, {pipeline_mode = #tpu.pipeline_mode<synchronous>, transform_indices = @transform_1, window_bounds = array<i64: 12, 1>}, {pipeline_mode = #tpu.pipeline_mode<synchronous>, transform_indices = @transform_2, window_bounds = array<i64: 12, 1>}, {transform_indices = @transform_3, window_bounds = array<i64: 12, 512>}]} {
    %c0 = arith.constant 0 : index
    %c0_0 = arith.constant 0 : index
    %0 = vector.load %arg1[%c0, %c0_0] : memref<12x512xf32, #tpu.memory_space<vmem>>, vector<12x512xf32>
    %c0_1 = arith.constant 0 : index
    %c0_2 = arith.constant 0 : index
    %1 = vector.load %arg2[%c0_1, %c0_2] : memref<12x1xf32, #tpu.memory_space<vmem>>, vector<12x1xf32>
    %2 = vector.broadcast %1 : vector<12x1xf32> to vector<12x512xf32>
    %3 = arith.mulf %0, %2 : vector<12x512xf32>
    %c0_3 = arith.constant 0 : index
    %c0_4 = arith.constant 0 : index
    %4 = vector.load %arg3[%c0_3, %c0_4] : memref<12x1xf32, #tpu.memory_space<vmem>>, vector<12x1xf32>
    %5 = vector.broadcast %4 : vector<12x1xf32> to vector<12x512xf32>
    %6 = arith.addf %3, %5 : vector<12x512xf32>
    %cst = arith.constant 0.000000e+00 : f32
    %7 = vector.broadcast %cst : f32 to vector<12x512xf32>
    %8 = arith.maximumf %6, %7 : vector<12x512xf32>
    %c0_5 = arith.constant 0 : index
    %c0_6 = arith.constant 0 : index
    %9 = vector.load %arg4[%c0_5, %c0_6] : memref<12x512xf32, #tpu.memory_space<vmem>>, vector<12x512xf32>
    tpu.vector_store %arg4[%c0_5, %c0_6], %8 {strides = array<i32>} : memref<12x512xf32, #tpu.memory_space<vmem>>, vector<12x512xf32>,
    return
  }
  func.func @transform_0(%arg0: i32) -> (i32, i32) {
    %c0_i32 = arith.constant 0 : i32
    %c0_i32_0 = arith.constant 0 : i32
    return %c0_i32, %arg0 : i32, i32
  }
  func.func @transform_1(%arg0: i32) -> (i32, i32) {
    %c0_i32 = arith.constant 0 : i32
    %c0_i32_0 = arith.constant 0 : i32
    %c0_i32_1 = arith.constant 0 : i32
    return %c0_i32, %c0_i32_0 : i32, i32
  }
  func.func @transform_2(%arg0: i32) -> (i32, i32) {
    %c0_i32 = arith.constant 0 : i32
    %c0_i32_0 = arith.constant 0 : i32
    %c0_i32_1 = arith.constant 0 : i32
    return %c0_i32, %c0_i32_0 : i32, i32
  }
  func.func @transform_3(%arg0: i32) -> (i32, i32) {
    %c0_i32 = arith.constant 0 : i32
    %c0_i32_0 = arith.constant 0 : i32
    return %c0_i32, %arg0 : i32, i32
  }
}

module attributes {stable_mosaic.version = 11 : i64} {
  func.func @conv_mm_stats_kernel(%arg0: i32, %arg1: memref<12x300xbf16, #tpu.memory_space<vmem>>, %arg2: memref<300x512xbf16, #tpu.memory_space<vmem>>, %arg3: memref<12x512xf32, #tpu.memory_space<vmem>>, %arg4: memref<1x12x1xf32, #tpu.memory_space<vmem>>, %arg5: memref<1x12x1xf32, #tpu.memory_space<vmem>>) attributes {dimension_semantics = [#tpu.dimension_semantics<parallel>], iteration_bounds = array<i64: 4>, scalar_prefetch = 0 : i64, scratch_operands = 0 : i64, tpu.core_type = #tpu.core_type<tc>, window_params = [{pipeline_mode = #tpu.pipeline_mode<synchronous>, transform_indices = @transform_0, window_bounds = array<i64: 12, 300>}, {transform_indices = @transform_1, window_bounds = array<i64: 300, 512>}, {transform_indices = @transform_2, window_bounds = array<i64: 12, 512>}, {transform_indices = @transform_3, window_bounds = array<i64: 1, 12, 1>}, {transform_indices = @transform_4, window_bounds = array<i64: 1, 12, 1>}]} {
    %c0 = arith.constant 0 : index
    %c0_0 = arith.constant 0 : index
    %0 = vector.load %arg1[%c0, %c0_0] : memref<12x300xbf16, #tpu.memory_space<vmem>>, vector<12x300xbf16>
    %c0_1 = arith.constant 0 : index
    %c0_2 = arith.constant 0 : index
    %1 = vector.load %arg2[%c0_1, %c0_2] : memref<300x512xbf16, #tpu.memory_space<vmem>>, vector<300x512xbf16>
    %cst = arith.constant dense<0.000000e+00> : vector<12x512xf32>
    %2 = tpu.matmul %0, %1, %cst {dimension_numbers = #tpu.dot_dimension_numbers<[1], [0], [0], [1], [0, 0, 1, 1], [], []>} : vector<12x300xbf16>, vector<300x512xbf16>, vector<12x512xf32> -> vector<12x512xf32>
    %c0_3 = arith.constant 0 : index
    %c0_4 = arith.constant 0 : index
    %3 = vector.load %arg3[%c0_3, %c0_4] : memref<12x512xf32, #tpu.memory_space<vmem>>, vector<12x512xf32>
    tpu.vector_store %arg3[%c0_3, %c0_4], %2 {strides = array<i32>} : memref<12x512xf32, #tpu.memory_space<vmem>>, vector<12x512xf32>,
    %cst_5 = arith.constant dense<0.000000e+00> : vector<12xf32>
    %4 = vector.multi_reduction <add>, %2, %cst_5 [1] : vector<12x512xf32> to vector<12xf32>
    %5 = vector.shape_cast %4 : vector<12xf32> to vector<12x1xf32>
    %6 = vector.shape_cast %5 : vector<12x1xf32> to vector<1x12x1xf32>
    %c0_6 = arith.constant 0 : index
    %c0_7 = arith.constant 0 : index
    %c0_8 = arith.constant 0 : index
    %7 = vector.load %arg4[%c0_6, %c0_7, %c0_8] : memref<1x12x1xf32, #tpu.memory_space<vmem>>, vector<1x12x1xf32>
    tpu.vector_store %arg4[%c0_6, %c0_7, %c0_8], %6 {strides = array<i32>} : memref<1x12x1xf32, #tpu.memory_space<vmem>>, vector<1x12x1xf32>,
    %8 = arith.mulf %2, %2 : vector<12x512xf32>
    %cst_9 = arith.constant dense<0.000000e+00> : vector<12xf32>
    %9 = vector.multi_reduction <add>, %8, %cst_9 [1] : vector<12x512xf32> to vector<12xf32>
    %10 = vector.shape_cast %9 : vector<12xf32> to vector<12x1xf32>
    %11 = vector.shape_cast %10 : vector<12x1xf32> to vector<1x12x1xf32>
    %c0_10 = arith.constant 0 : index
    %c0_11 = arith.constant 0 : index
    %c0_12 = arith.constant 0 : index
    %12 = vector.load %arg5[%c0_10, %c0_11, %c0_12] : memref<1x12x1xf32, #tpu.memory_space<vmem>>, vector<1x12x1xf32>
    tpu.vector_store %arg5[%c0_10, %c0_11, %c0_12], %11 {strides = array<i32>} : memref<1x12x1xf32, #tpu.memory_space<vmem>>, vector<1x12x1xf32>,
    return
  }
  func.func @transform_0(%arg0: i32) -> (i32, i32) {
    %c0_i32 = arith.constant 0 : i32
    %c0_i32_0 = arith.constant 0 : i32
    %c0_i32_1 = arith.constant 0 : i32
    return %c0_i32, %c0_i32_0 : i32, i32
  }
  func.func @transform_1(%arg0: i32) -> (i32, i32) {
    %c0_i32 = arith.constant 0 : i32
    %c0_i32_0 = arith.constant 0 : i32
    return %c0_i32, %arg0 : i32, i32
  }
  func.func @transform_2(%arg0: i32) -> (i32, i32) {
    %c0_i32 = arith.constant 0 : i32
    %c0_i32_0 = arith.constant 0 : i32
    return %c0_i32, %arg0 : i32, i32
  }
  func.func @transform_3(%arg0: i32) -> (i32, i32, i32) {
    %c0_i32 = arith.constant 0 : i32
    %c0_i32_0 = arith.constant 0 : i32
    %c0_i32_1 = arith.constant 0 : i32
    return %arg0, %c0_i32, %c0_i32_0 : i32, i32, i32
  }
  func.func @transform_4(%arg0: i32) -> (i32, i32, i32) {
    %c0_i32 = arith.constant 0 : i32
    %c0_i32_0 = arith.constant 0 : i32
    %c0_i32_1 = arith.constant 0 : i32
    return %arg0, %c0_i32, %c0_i32_0 : i32, i32, i32
  }
}

module attributes {stable_mosaic.version = 11 : i64} {
  func.func @bn_relu_pool_kernel(%arg0: i32, %arg1: memref<12x512xf32, #tpu.memory_space<vmem>>, %arg2: memref<12x512xf32, #tpu.memory_space<vmem>>, %arg3: memref<12x512xf32, #tpu.memory_space<vmem>>, %arg4: memref<12x512xf32, #tpu.memory_space<vmem>>, %arg5: memref<12x1xf32, #tpu.memory_space<vmem>>, %arg6: memref<12x1xf32, #tpu.memory_space<vmem>>, %arg7: memref<12x512xf32, #tpu.memory_space<vmem>>) attributes {dimension_semantics = [#tpu.dimension_semantics<parallel>], iteration_bounds = array<i64: 1>, scalar_prefetch = 0 : i64, scratch_operands = 0 : i64, tpu.core_type = #tpu.core_type<tc>, window_params = [{transform_indices = @transform_0, window_bounds = array<i64: 12, 512>}, {transform_indices = @transform_1, window_bounds = array<i64: 12, 512>}, {transform_indices = @transform_2, window_bounds = array<i64: 12, 512>}, {transform_indices = @transform_3, window_bounds = array<i64: 12, 512>}, {pipeline_mode = #tpu.pipeline_mode<synchronous>, transform_indices = @transform_4, window_bounds = array<i64: 12, 1>}, {pipeline_mode = #tpu.pipeline_mode<synchronous>, transform_indices = @transform_5, window_bounds = array<i64: 12, 1>}, {transform_indices = @transform_6, window_bounds = array<i64: 12, 512>}]} {
    %c0 = arith.constant 0 : index
    %c0_0 = arith.constant 0 : index
    %0 = vector.load %arg5[%c0, %c0_0] : memref<12x1xf32, #tpu.memory_space<vmem>>, vector<12x1xf32>
    %c0_1 = arith.constant 0 : index
    %c0_2 = arith.constant 0 : index
    %1 = vector.load %arg6[%c0_1, %c0_2] : memref<12x1xf32, #tpu.memory_space<vmem>>, vector<12x1xf32>
    %c0_3 = arith.constant 0 : index
    %c0_4 = arith.constant 0 : index
    %2 = vector.load %arg1[%c0_3, %c0_4] : memref<12x512xf32, #tpu.memory_space<vmem>>, vector<12x512xf32>
    %3 = vector.broadcast %0 : vector<12x1xf32> to vector<12x512xf32>
    %4 = arith.mulf %2, %3 : vector<12x512xf32>
    %5 = vector.broadcast %1 : vector<12x1xf32> to vector<12x512xf32>
    %6 = arith.addf %4, %5 : vector<12x512xf32>
    %cst = arith.constant 0.000000e+00 : f32
    %7 = vector.broadcast %cst : f32 to vector<12x512xf32>
    %8 = arith.maximumf %6, %7 : vector<12x512xf32>
    %c0_5 = arith.constant 0 : index
    %c0_6 = arith.constant 0 : index
    %9 = vector.load %arg2[%c0_5, %c0_6] : memref<12x512xf32, #tpu.memory_space<vmem>>, vector<12x512xf32>
    %10 = vector.broadcast %0 : vector<12x1xf32> to vector<12x512xf32>
    %11 = arith.mulf %9, %10 : vector<12x512xf32>
    %12 = vector.broadcast %1 : vector<12x1xf32> to vector<12x512xf32>
    %13 = arith.addf %11, %12 : vector<12x512xf32>
    %cst_7 = arith.constant 0.000000e+00 : f32
    %14 = vector.broadcast %cst_7 : f32 to vector<12x512xf32>
    %15 = arith.maximumf %13, %14 : vector<12x512xf32>
    %c0_8 = arith.constant 0 : index
    %c0_9 = arith.constant 0 : index
    %16 = vector.load %arg3[%c0_8, %c0_9] : memref<12x512xf32, #tpu.memory_space<vmem>>, vector<12x512xf32>
    %17 = vector.broadcast %0 : vector<12x1xf32> to vector<12x512xf32>
    %18 = arith.mulf %16, %17 : vector<12x512xf32>
    %19 = vector.broadcast %1 : vector<12x1xf32> to vector<12x512xf32>
    %20 = arith.addf %18, %19 : vector<12x512xf32>
    %cst_10 = arith.constant 0.000000e+00 : f32
    %21 = vector.broadcast %cst_10 : f32 to vector<12x512xf32>
    %22 = arith.maximumf %20, %21 : vector<12x512xf32>
    %c0_11 = arith.constant 0 : index
    %c0_12 = arith.constant 0 : index
    %23 = vector.load %arg4[%c0_11, %c0_12] : memref<12x512xf32, #tpu.memory_space<vmem>>, vector<12x512xf32>
    %24 = vector.broadcast %0 : vector<12x1xf32> to vector<12x512xf32>
    %25 = arith.mulf %23, %24 : vector<12x512xf32>
    %26 = vector.broadcast %1 : vector<12x1xf32> to vector<12x512xf32>
    %27 = arith.addf %25, %26 : vector<12x512xf32>
    %cst_13 = arith.constant 0.000000e+00 : f32
    %28 = vector.broadcast %cst_13 : f32 to vector<12x512xf32>
    %29 = arith.maximumf %27, %28 : vector<12x512xf32>
    %30 = arith.maximumf %8, %15 : vector<12x512xf32>
    %31 = arith.maximumf %22, %29 : vector<12x512xf32>
    %32 = arith.maximumf %30, %31 : vector<12x512xf32>
    %c0_14 = arith.constant 0 : index
    %c0_15 = arith.constant 0 : index
    %33 = vector.load %arg7[%c0_14, %c0_15] : memref<12x512xf32, #tpu.memory_space<vmem>>, vector<12x512xf32>
    tpu.vector_store %arg7[%c0_14, %c0_15], %32 {strides = array<i32>} : memref<12x512xf32, #tpu.memory_space<vmem>>, vector<12x512xf32>,
    return
  }
  func.func @transform_0(%arg0: i32) -> (i32, i32) {
    %c0_i32 = arith.constant 0 : i32
    %c0_i32_0 = arith.constant 0 : i32
    return %c0_i32, %arg0 : i32, i32
  }
  func.func @transform_1(%arg0: i32) -> (i32, i32) {
    %c0_i32 = arith.constant 0 : i32
    %c0_i32_0 = arith.constant 0 : i32
    return %c0_i32, %arg0 : i32, i32
  }
  func.func @transform_2(%arg0: i32) -> (i32, i32) {
    %c0_i32 = arith.constant 0 : i32
    %c0_i32_0 = arith.constant 0 : i32
    return %c0_i32, %arg0 : i32, i32
  }
  func.func @transform_3(%arg0: i32) -> (i32, i32) {
    %c0_i32 = arith.constant 0 : i32
    %c0_i32_0 = arith.constant 0 : i32
    return %c0_i32, %arg0 : i32, i32
  }
  func.func @transform_4(%arg0: i32) -> (i32, i32) {
    %c0_i32 = arith.constant 0 : i32
    %c0_i32_0 = arith.constant 0 : i32
    %c0_i32_1 = arith.constant 0 : i32
    return %c0_i32, %c0_i32_0 : i32, i32
  }
  func.func @transform_5(%arg0: i32) -> (i32, i32) {
    %c0_i32 = arith.constant 0 : i32
    %c0_i32_0 = arith.constant 0 : i32
    %c0_i32_1 = arith.constant 0 : i32
    return %c0_i32, %c0_i32_0 : i32, i32
  }
  func.func @transform_6(%arg0: i32) -> (i32, i32) {
    %c0_i32 = arith.constant 0 : i32
    %c0_i32_0 = arith.constant 0 : i32
    return %c0_i32, %arg0 : i32, i32
  }
}

module attributes {stable_mosaic.version = 11 : i64} {
  func.func @conv_mm_stats_kernel(%arg0: i32, %arg1: memref<24x300xbf16, #tpu.memory_space<vmem>>, %arg2: memref<300x384xbf16, #tpu.memory_space<vmem>>, %arg3: memref<24x384xf32, #tpu.memory_space<vmem>>, %arg4: memref<1x24x1xf32, #tpu.memory_space<vmem>>, %arg5: memref<1x24x1xf32, #tpu.memory_space<vmem>>) attributes {dimension_semantics = [#tpu.dimension_semantics<parallel>], iteration_bounds = array<i64: 1>, scalar_prefetch = 0 : i64, scratch_operands = 0 : i64, tpu.core_type = #tpu.core_type<tc>, window_params = [{pipeline_mode = #tpu.pipeline_mode<synchronous>, transform_indices = @transform_0, window_bounds = array<i64: 24, 300>}, {transform_indices = @transform_1, window_bounds = array<i64: 300, 384>}, {transform_indices = @transform_2, window_bounds = array<i64: 24, 384>}, {transform_indices = @transform_3, window_bounds = array<i64: 1, 24, 1>}, {transform_indices = @transform_4, window_bounds = array<i64: 1, 24, 1>}]} {
    %c0 = arith.constant 0 : index
    %c0_0 = arith.constant 0 : index
    %0 = vector.load %arg1[%c0, %c0_0] : memref<24x300xbf16, #tpu.memory_space<vmem>>, vector<24x300xbf16>
    %c0_1 = arith.constant 0 : index
    %c0_2 = arith.constant 0 : index
    %1 = vector.load %arg2[%c0_1, %c0_2] : memref<300x384xbf16, #tpu.memory_space<vmem>>, vector<300x384xbf16>
    %cst = arith.constant dense<0.000000e+00> : vector<24x384xf32>
    %2 = tpu.matmul %0, %1, %cst {dimension_numbers = #tpu.dot_dimension_numbers<[1], [0], [0], [1], [0, 0, 1, 1], [], []>} : vector<24x300xbf16>, vector<300x384xbf16>, vector<24x384xf32> -> vector<24x384xf32>
    %c0_3 = arith.constant 0 : index
    %c0_4 = arith.constant 0 : index
    %3 = vector.load %arg3[%c0_3, %c0_4] : memref<24x384xf32, #tpu.memory_space<vmem>>, vector<24x384xf32>
    tpu.vector_store %arg3[%c0_3, %c0_4], %2 {strides = array<i32>} : memref<24x384xf32, #tpu.memory_space<vmem>>, vector<24x384xf32>,
    %cst_5 = arith.constant dense<0.000000e+00> : vector<24xf32>
    %4 = vector.multi_reduction <add>, %2, %cst_5 [1] : vector<24x384xf32> to vector<24xf32>
    %5 = vector.shape_cast %4 : vector<24xf32> to vector<24x1xf32>
    %6 = vector.shape_cast %5 : vector<24x1xf32> to vector<1x24x1xf32>
    %c0_6 = arith.constant 0 : index
    %c0_7 = arith.constant 0 : index
    %c0_8 = arith.constant 0 : index
    %7 = vector.load %arg4[%c0_6, %c0_7, %c0_8] : memref<1x24x1xf32, #tpu.memory_space<vmem>>, vector<1x24x1xf32>
    tpu.vector_store %arg4[%c0_6, %c0_7, %c0_8], %6 {strides = array<i32>} : memref<1x24x1xf32, #tpu.memory_space<vmem>>, vector<1x24x1xf32>,
    %8 = arith.mulf %2, %2 : vector<24x384xf32>
    %cst_9 = arith.constant dense<0.000000e+00> : vector<24xf32>
    %9 = vector.multi_reduction <add>, %8, %cst_9 [1] : vector<24x384xf32> to vector<24xf32>
    %10 = vector.shape_cast %9 : vector<24xf32> to vector<24x1xf32>
    %11 = vector.shape_cast %10 : vector<24x1xf32> to vector<1x24x1xf32>
    %c0_10 = arith.constant 0 : index
    %c0_11 = arith.constant 0 : index
    %c0_12 = arith.constant 0 : index
    %12 = vector.load %arg5[%c0_10, %c0_11, %c0_12] : memref<1x24x1xf32, #tpu.memory_space<vmem>>, vector<1x24x1xf32>
    tpu.vector_store %arg5[%c0_10, %c0_11, %c0_12], %11 {strides = array<i32>} : memref<1x24x1xf32, #tpu.memory_space<vmem>>, vector<1x24x1xf32>,
    return
  }
  func.func @transform_0(%arg0: i32) -> (i32, i32) {
    %c0_i32 = arith.constant 0 : i32
    %c0_i32_0 = arith.constant 0 : i32
    %c0_i32_1 = arith.constant 0 : i32
    return %c0_i32, %c0_i32_0 : i32, i32
  }
  func.func @transform_1(%arg0: i32) -> (i32, i32) {
    %c0_i32 = arith.constant 0 : i32
    %c0_i32_0 = arith.constant 0 : i32
    return %c0_i32, %arg0 : i32, i32
  }
  func.func @transform_2(%arg0: i32) -> (i32, i32) {
    %c0_i32 = arith.constant 0 : i32
    %c0_i32_0 = arith.constant 0 : i32
    return %c0_i32, %arg0 : i32, i32
  }
  func.func @transform_3(%arg0: i32) -> (i32, i32, i32) {
    %c0_i32 = arith.constant 0 : i32
    %c0_i32_0 = arith.constant 0 : i32
    %c0_i32_1 = arith.constant 0 : i32
    return %arg0, %c0_i32, %c0_i32_0 : i32, i32, i32
  }
  func.func @transform_4(%arg0: i32) -> (i32, i32, i32) {
    %c0_i32 = arith.constant 0 : i32
    %c0_i32_0 = arith.constant 0 : i32
    %c0_i32_1 = arith.constant 0 : i32
    return %arg0, %c0_i32, %c0_i32_0 : i32, i32, i32
  }
}

module attributes {stable_mosaic.version = 11 : i64} {
  func.func @bn_relu_kernel(%arg0: i32, %arg1: memref<24x384xf32, #tpu.memory_space<vmem>>, %arg2: memref<24x1xf32, #tpu.memory_space<vmem>>, %arg3: memref<24x1xf32, #tpu.memory_space<vmem>>, %arg4: memref<24x384xf32, #tpu.memory_space<vmem>>) attributes {dimension_semantics = [#tpu.dimension_semantics<parallel>], iteration_bounds = array<i64: 1>, scalar_prefetch = 0 : i64, scratch_operands = 0 : i64, tpu.core_type = #tpu.core_type<tc>, window_params = [{transform_indices = @transform_0, window_bounds = array<i64: 24, 384>}, {pipeline_mode = #tpu.pipeline_mode<synchronous>, transform_indices = @transform_1, window_bounds = array<i64: 24, 1>}, {pipeline_mode = #tpu.pipeline_mode<synchronous>, transform_indices = @transform_2, window_bounds = array<i64: 24, 1>}, {transform_indices = @transform_3, window_bounds = array<i64: 24, 384>}]} {
    %c0 = arith.constant 0 : index
    %c0_0 = arith.constant 0 : index
    %0 = vector.load %arg1[%c0, %c0_0] : memref<24x384xf32, #tpu.memory_space<vmem>>, vector<24x384xf32>
    %c0_1 = arith.constant 0 : index
    %c0_2 = arith.constant 0 : index
    %1 = vector.load %arg2[%c0_1, %c0_2] : memref<24x1xf32, #tpu.memory_space<vmem>>, vector<24x1xf32>
    %2 = vector.broadcast %1 : vector<24x1xf32> to vector<24x384xf32>
    %3 = arith.mulf %0, %2 : vector<24x384xf32>
    %c0_3 = arith.constant 0 : index
    %c0_4 = arith.constant 0 : index
    %4 = vector.load %arg3[%c0_3, %c0_4] : memref<24x1xf32, #tpu.memory_space<vmem>>, vector<24x1xf32>
    %5 = vector.broadcast %4 : vector<24x1xf32> to vector<24x384xf32>
    %6 = arith.addf %3, %5 : vector<24x384xf32>
    %cst = arith.constant 0.000000e+00 : f32
    %7 = vector.broadcast %cst : f32 to vector<24x384xf32>
    %8 = arith.maximumf %6, %7 : vector<24x384xf32>
    %c0_5 = arith.constant 0 : index
    %c0_6 = arith.constant 0 : index
    %9 = vector.load %arg4[%c0_5, %c0_6] : memref<24x384xf32, #tpu.memory_space<vmem>>, vector<24x384xf32>
    tpu.vector_store %arg4[%c0_5, %c0_6], %8 {strides = array<i32>} : memref<24x384xf32, #tpu.memory_space<vmem>>, vector<24x384xf32>,
    return
  }
  func.func @transform_0(%arg0: i32) -> (i32, i32) {
    %c0_i32 = arith.constant 0 : i32
    %c0_i32_0 = arith.constant 0 : i32
    return %c0_i32, %arg0 : i32, i32
  }
  func.func @transform_1(%arg0: i32) -> (i32, i32) {
    %c0_i32 = arith.constant 0 : i32
    %c0_i32_0 = arith.constant 0 : i32
    %c0_i32_1 = arith.constant 0 : i32
    return %c0_i32, %c0_i32_0 : i32, i32
  }
  func.func @transform_2(%arg0: i32) -> (i32, i32) {
    %c0_i32 = arith.constant 0 : i32
    %c0_i32_0 = arith.constant 0 : i32
    %c0_i32_1 = arith.constant 0 : i32
    return %c0_i32, %c0_i32_0 : i32, i32
  }
  func.func @transform_3(%arg0: i32) -> (i32, i32) {
    %c0_i32 = arith.constant 0 : i32
    %c0_i32_0 = arith.constant 0 : i32
    return %c0_i32, %arg0 : i32, i32
  }
}

module attributes {stable_mosaic.version = 11 : i64} {
  func.func @conv_mm_stats_kernel(%arg0: i32, %arg1: memref<24x600xbf16, #tpu.memory_space<vmem>>, %arg2: memref<600x256xbf16, #tpu.memory_space<vmem>>, %arg3: memref<24x256xf32, #tpu.memory_space<vmem>>, %arg4: memref<1x24x1xf32, #tpu.memory_space<vmem>>, %arg5: memref<1x24x1xf32, #tpu.memory_space<vmem>>) attributes {dimension_semantics = [#tpu.dimension_semantics<parallel>], iteration_bounds = array<i64: 1>, scalar_prefetch = 0 : i64, scratch_operands = 0 : i64, tpu.core_type = #tpu.core_type<tc>, window_params = [{pipeline_mode = #tpu.pipeline_mode<synchronous>, transform_indices = @transform_0, window_bounds = array<i64: 24, 600>}, {transform_indices = @transform_1, window_bounds = array<i64: 600, 256>}, {transform_indices = @transform_2, window_bounds = array<i64: 24, 256>}, {transform_indices = @transform_3, window_bounds = array<i64: 1, 24, 1>}, {transform_indices = @transform_4, window_bounds = array<i64: 1, 24, 1>}]} {
    %c0 = arith.constant 0 : index
    %c0_0 = arith.constant 0 : index
    %0 = vector.load %arg1[%c0, %c0_0] : memref<24x600xbf16, #tpu.memory_space<vmem>>, vector<24x600xbf16>
    %c0_1 = arith.constant 0 : index
    %c0_2 = arith.constant 0 : index
    %1 = vector.load %arg2[%c0_1, %c0_2] : memref<600x256xbf16, #tpu.memory_space<vmem>>, vector<600x256xbf16>
    %cst = arith.constant dense<0.000000e+00> : vector<24x256xf32>
    %2 = tpu.matmul %0, %1, %cst {dimension_numbers = #tpu.dot_dimension_numbers<[1], [0], [0], [1], [0, 0, 1, 1], [], []>} : vector<24x600xbf16>, vector<600x256xbf16>, vector<24x256xf32> -> vector<24x256xf32>
    %c0_3 = arith.constant 0 : index
    %c0_4 = arith.constant 0 : index
    %3 = vector.load %arg3[%c0_3, %c0_4] : memref<24x256xf32, #tpu.memory_space<vmem>>, vector<24x256xf32>
    tpu.vector_store %arg3[%c0_3, %c0_4], %2 {strides = array<i32>} : memref<24x256xf32, #tpu.memory_space<vmem>>, vector<24x256xf32>,
    %cst_5 = arith.constant dense<0.000000e+00> : vector<24xf32>
    %4 = vector.multi_reduction <add>, %2, %cst_5 [1] : vector<24x256xf32> to vector<24xf32>
    %5 = vector.shape_cast %4 : vector<24xf32> to vector<24x1xf32>
    %6 = vector.shape_cast %5 : vector<24x1xf32> to vector<1x24x1xf32>
    %c0_6 = arith.constant 0 : index
    %c0_7 = arith.constant 0 : index
    %c0_8 = arith.constant 0 : index
    %7 = vector.load %arg4[%c0_6, %c0_7, %c0_8] : memref<1x24x1xf32, #tpu.memory_space<vmem>>, vector<1x24x1xf32>
    tpu.vector_store %arg4[%c0_6, %c0_7, %c0_8], %6 {strides = array<i32>} : memref<1x24x1xf32, #tpu.memory_space<vmem>>, vector<1x24x1xf32>,
    %8 = arith.mulf %2, %2 : vector<24x256xf32>
    %cst_9 = arith.constant dense<0.000000e+00> : vector<24xf32>
    %9 = vector.multi_reduction <add>, %8, %cst_9 [1] : vector<24x256xf32> to vector<24xf32>
    %10 = vector.shape_cast %9 : vector<24xf32> to vector<24x1xf32>
    %11 = vector.shape_cast %10 : vector<24x1xf32> to vector<1x24x1xf32>
    %c0_10 = arith.constant 0 : index
    %c0_11 = arith.constant 0 : index
    %c0_12 = arith.constant 0 : index
    %12 = vector.load %arg5[%c0_10, %c0_11, %c0_12] : memref<1x24x1xf32, #tpu.memory_space<vmem>>, vector<1x24x1xf32>
    tpu.vector_store %arg5[%c0_10, %c0_11, %c0_12], %11 {strides = array<i32>} : memref<1x24x1xf32, #tpu.memory_space<vmem>>, vector<1x24x1xf32>,
    return
  }
  func.func @transform_0(%arg0: i32) -> (i32, i32) {
    %c0_i32 = arith.constant 0 : i32
    %c0_i32_0 = arith.constant 0 : i32
    %c0_i32_1 = arith.constant 0 : i32
    return %c0_i32, %c0_i32_0 : i32, i32
  }
  func.func @transform_1(%arg0: i32) -> (i32, i32) {
    %c0_i32 = arith.constant 0 : i32
    %c0_i32_0 = arith.constant 0 : i32
    return %c0_i32, %arg0 : i32, i32
  }
  func.func @transform_2(%arg0: i32) -> (i32, i32) {
    %c0_i32 = arith.constant 0 : i32
    %c0_i32_0 = arith.constant 0 : i32
    return %c0_i32, %arg0 : i32, i32
  }
  func.func @transform_3(%arg0: i32) -> (i32, i32, i32) {
    %c0_i32 = arith.constant 0 : i32
    %c0_i32_0 = arith.constant 0 : i32
    %c0_i32_1 = arith.constant 0 : i32
    return %arg0, %c0_i32, %c0_i32_0 : i32, i32, i32
  }
  func.func @transform_4(%arg0: i32) -> (i32, i32, i32) {
    %c0_i32 = arith.constant 0 : i32
    %c0_i32_0 = arith.constant 0 : i32
    %c0_i32_1 = arith.constant 0 : i32
    return %arg0, %c0_i32, %c0_i32_0 : i32, i32, i32
  }
}

module attributes {stable_mosaic.version = 11 : i64} {
  func.func @bn_relu_kernel(%arg0: i32, %arg1: memref<24x256xf32, #tpu.memory_space<vmem>>, %arg2: memref<24x1xf32, #tpu.memory_space<vmem>>, %arg3: memref<24x1xf32, #tpu.memory_space<vmem>>, %arg4: memref<24x256xf32, #tpu.memory_space<vmem>>) attributes {dimension_semantics = [#tpu.dimension_semantics<parallel>], iteration_bounds = array<i64: 1>, scalar_prefetch = 0 : i64, scratch_operands = 0 : i64, tpu.core_type = #tpu.core_type<tc>, window_params = [{transform_indices = @transform_0, window_bounds = array<i64: 24, 256>}, {pipeline_mode = #tpu.pipeline_mode<synchronous>, transform_indices = @transform_1, window_bounds = array<i64: 24, 1>}, {pipeline_mode = #tpu.pipeline_mode<synchronous>, transform_indices = @transform_2, window_bounds = array<i64: 24, 1>}, {transform_indices = @transform_3, window_bounds = array<i64: 24, 256>}]} {
    %c0 = arith.constant 0 : index
    %c0_0 = arith.constant 0 : index
    %0 = vector.load %arg1[%c0, %c0_0] : memref<24x256xf32, #tpu.memory_space<vmem>>, vector<24x256xf32>
    %c0_1 = arith.constant 0 : index
    %c0_2 = arith.constant 0 : index
    %1 = vector.load %arg2[%c0_1, %c0_2] : memref<24x1xf32, #tpu.memory_space<vmem>>, vector<24x1xf32>
    %2 = vector.broadcast %1 : vector<24x1xf32> to vector<24x256xf32>
    %3 = arith.mulf %0, %2 : vector<24x256xf32>
    %c0_3 = arith.constant 0 : index
    %c0_4 = arith.constant 0 : index
    %4 = vector.load %arg3[%c0_3, %c0_4] : memref<24x1xf32, #tpu.memory_space<vmem>>, vector<24x1xf32>
    %5 = vector.broadcast %4 : vector<24x1xf32> to vector<24x256xf32>
    %6 = arith.addf %3, %5 : vector<24x256xf32>
    %cst = arith.constant 0.000000e+00 : f32
    %7 = vector.broadcast %cst : f32 to vector<24x256xf32>
    %8 = arith.maximumf %6, %7 : vector<24x256xf32>
    %c0_5 = arith.constant 0 : index
    %c0_6 = arith.constant 0 : index
    %9 = vector.load %arg4[%c0_5, %c0_6] : memref<24x256xf32, #tpu.memory_space<vmem>>, vector<24x256xf32>
    tpu.vector_store %arg4[%c0_5, %c0_6], %8 {strides = array<i32>} : memref<24x256xf32, #tpu.memory_space<vmem>>, vector<24x256xf32>,
    return
  }
  func.func @transform_0(%arg0: i32) -> (i32, i32) {
    %c0_i32 = arith.constant 0 : i32
    %c0_i32_0 = arith.constant 0 : i32
    return %c0_i32, %arg0 : i32, i32
  }
  func.func @transform_1(%arg0: i32) -> (i32, i32) {
    %c0_i32 = arith.constant 0 : i32
    %c0_i32_0 = arith.constant 0 : i32
    %c0_i32_1 = arith.constant 0 : i32
    return %c0_i32, %c0_i32_0 : i32, i32
  }
  func.func @transform_2(%arg0: i32) -> (i32, i32) {
    %c0_i32 = arith.constant 0 : i32
    %c0_i32_0 = arith.constant 0 : i32
    %c0_i32_1 = arith.constant 0 : i32
    return %c0_i32, %c0_i32_0 : i32, i32
  }
  func.func @transform_3(%arg0: i32) -> (i32, i32) {
    %c0_i32 = arith.constant 0 : i32
    %c0_i32_0 = arith.constant 0 : i32
    return %c0_i32, %arg0 : i32, i32
  }
}

module attributes {stable_mosaic.version = 11 : i64} {
  func.func @linear_kernel(%arg0: i32, %arg1: memref<10x2400xbf16, #tpu.memory_space<vmem>>, %arg2: memref<2400x128xbf16, #tpu.memory_space<vmem>>, %arg3: memref<10x1xf32, #tpu.memory_space<vmem>>, %arg4: memref<10x128xf32, #tpu.memory_space<vmem>>) attributes {dimension_semantics = [#tpu.dimension_semantics<parallel>], iteration_bounds = array<i64: 1>, scalar_prefetch = 0 : i64, scratch_operands = 0 : i64, tpu.core_type = #tpu.core_type<tc>, window_params = [{pipeline_mode = #tpu.pipeline_mode<synchronous>, transform_indices = @transform_0, window_bounds = array<i64: 10, 2400>}, {transform_indices = @transform_1, window_bounds = array<i64: 2400, 128>}, {pipeline_mode = #tpu.pipeline_mode<synchronous>, transform_indices = @transform_2, window_bounds = array<i64: 10, 1>}, {transform_indices = @transform_3, window_bounds = array<i64: 10, 128>}]} {
    %c0 = arith.constant 0 : index
    %c0_0 = arith.constant 0 : index
    %0 = vector.load %arg1[%c0, %c0_0] : memref<10x2400xbf16, #tpu.memory_space<vmem>>, vector<10x2400xbf16>
    %c0_1 = arith.constant 0 : index
    %c0_2 = arith.constant 0 : index
    %1 = vector.load %arg2[%c0_1, %c0_2] : memref<2400x128xbf16, #tpu.memory_space<vmem>>, vector<2400x128xbf16>
    %cst = arith.constant dense<0.000000e+00> : vector<10x128xf32>
    %2 = tpu.matmul %0, %1, %cst {dimension_numbers = #tpu.dot_dimension_numbers<[1], [0], [0], [1], [0, 0, 1, 1], [], []>} : vector<10x2400xbf16>, vector<2400x128xbf16>, vector<10x128xf32> -> vector<10x128xf32>
    %c0_3 = arith.constant 0 : index
    %c0_4 = arith.constant 0 : index
    %3 = vector.load %arg3[%c0_3, %c0_4] : memref<10x1xf32, #tpu.memory_space<vmem>>, vector<10x1xf32>
    %4 = vector.broadcast %3 : vector<10x1xf32> to vector<10x128xf32>
    %5 = arith.addf %2, %4 : vector<10x128xf32>
    %c0_5 = arith.constant 0 : index
    %c0_6 = arith.constant 0 : index
    %6 = vector.load %arg4[%c0_5, %c0_6] : memref<10x128xf32, #tpu.memory_space<vmem>>, vector<10x128xf32>
    tpu.vector_store %arg4[%c0_5, %c0_6], %5 {strides = array<i32>} : memref<10x128xf32, #tpu.memory_space<vmem>>, vector<10x128xf32>,
    return
  }
  func.func @transform_0(%arg0: i32) -> (i32, i32) {
    %c0_i32 = arith.constant 0 : i32
    %c0_i32_0 = arith.constant 0 : i32
    %c0_i32_1 = arith.constant 0 : i32
    return %c0_i32, %c0_i32_0 : i32, i32
  }
  func.func @transform_1(%arg0: i32) -> (i32, i32) {
    %c0_i32 = arith.constant 0 : i32
    %c0_i32_0 = arith.constant 0 : i32
    return %c0_i32, %arg0 : i32, i32
  }
  func.func @transform_2(%arg0: i32) -> (i32, i32) {
    %c0_i32 = arith.constant 0 : i32
    %c0_i32_0 = arith.constant 0 : i32
    %c0_i32_1 = arith.constant 0 : i32
    return %c0_i32, %c0_i32_0 : i32, i32
  }
  func.func @transform_3(%arg0: i32) -> (i32, i32) {
    %c0_i32 = arith.constant 0 : i32
    %c0_i32_0 = arith.constant 0 : i32
    return %c0_i32, %arg0 : i32, i32
  }
}

</mosaic_0001>

<bundles_post_ra>
// kernel: network_forward.9
= control target key start
LH: loop header
LB: loop body
LE: loop exit
PB: predicated region body
PF: predicated region fallthrough
CT: control target
= control target key end

     0   :  { %s875_s15 = smov 0   ;;  %s877_s16 = smov 0   ;;  %s1042_s0 = inlined_call_operand.vmem [shape: bf16[12,75], index: 0, kind: input, shape index: {}]   ;;  %s1043_s1 = inlined_call_operand.vmem [shape: bf16[75,2048], index: 1, kind: input, shape index: {}]   ;;  %s1044_s2 = inlined_call_operand.vmem [shape: f32[12,2048], index: 2, kind: output, shape index: {0}]   ;;  %s1045_s3 = inlined_call_operand.vmem [shape: f32[4,12,1], index: 3, kind: output, shape index: {1}]   ;;  %s1046_s4 = inlined_call_operand.vmem [shape: f32[4,12,1], index: 4, kind: output, shape index: {2}]  }
   0x1   :  { %s879_s17 = smov 0  }
   0x2 LB: > { %s891_s18 = sadd.s32 4294967295, %s846_s17   ;;  %s894_s19 = sadd.s32 1, %s846_s17   ;;  %s846_s17 = sphi %s879_s17, %s1050_s17   ;;  %s842_s16 = sphi %s877_s16, %s1049_s16   ;;  %s838_s15 = sphi %s875_s15, %s1048_s15  }
   0x3   : > { %s40_s20 = ssub.s32 %s846_s17, %s894_s19  ;;  %s43_s21 = sadd.s32 1, %s842_s16 }
   0x4   : > { %p41_p0 = scmp.eq.s32.totalorder %s40_s20, 0  ;;  %p50_p1 = scmp.ne.s32.totalorder %s842_s16, %s838_s15 }
   0x5   : > { %p51_p2 = scmp.eq.s32.totalorder %s846_s17, 0  ;;  %p80_p3 = scmp.eq.s32.totalorder %s891_s18, 3 }
   0x6   : > { %s904_s22 = scalar_select %p41_p0, %s842_s16, %s43_s21  }
   0x7   : > { %p52_p4 = por %p51_p2, %p50_p1  ;;  %p906_p5 = por %p80_p3, %p50_p1 }
   0x8   : > { %p724_p6 = scmp.ge.s32.totalorder %s846_s17, 4 }
   0xa   : > { %157 = sbr.rel (%p724_p6) target bundleno = 29 (0x1d), region = 20 }
   0xf   : > { %160 = sbr.rel (!%p52_p4) target bundleno = 29 (0x1d), region = 24  ;;  %s162_s24 = sand.u32 (%p52_p4), 1, %s842_s16  }
  0x10   : > { %s761_s25 = sshll.u32 (%p52_p4), %s846_s17, 4  ;;  %s765_s26 = smul.u32 (%p52_p4), 160, %s162_s24 }
  0x11   : > { %s916_s29 = scalar_lea.vmem (%p52_p4), %s1043_s1, %s761_s25 }
  0x12   : > { %v180_v0 = vld [vmem:[%s916_s29] sm:$0xff] (%p52_p4)  ;;  %v182_v1 = vld [vmem:[%s916_s29 + $0x8] sm:$0xff] (%p52_p4)  ;;  %s924_s30 = scalar_lea.vmem (%p52_p4), [#allocation2], %s765_s26 }
  0x13   : > { %v184_v2 = vld [vmem:[%s916_s29 + $0x40] sm:$0xff] (%p52_p4)  ;;  %v186_v3 = vld [vmem:[%s916_s29 + $0x48] sm:$0xff] (%p52_p4)  ;;  %181 = vst [vmem:[%s924_s30] sm:$0xff] (%p52_p4), %v180_v0  ;;  %183 = vst [vmem:[%s924_s30 + $0x8] sm:$0xff] (%p52_p4), %v182_v1 }
  0x14   : > { %v188_v4 = vld [vmem:[%s916_s29 + $0x80] sm:$0xff]  ;;  %v190_v5 = vld [vmem:[%s916_s29 + $0x88] sm:$0xff]  ;;  %185 = vst [vmem:[%s924_s30 + $0x10] sm:$0xff] %v184_v2  ;;  %187 = vst [vmem:[%s924_s30 + $0x18] sm:$0xff] %v186_v3 }
  0x15   : > { %189 = vst [vmem:[%s924_s30 + $0x20] sm:$0xff] %v188_v4  ;;  %191 = vst [vmem:[%s924_s30 + $0x28] sm:$0xff] %v190_v5  ;;  %v192_v6 = vld [vmem:[%s916_s29 + $0xc0] sm:$0xff]  ;;  %v194_v7 = vld [vmem:[%s916_s29 + $0xc8] sm:$0xff] }
  0x16   : > { %v196_v8 = vld [vmem:[%s916_s29 + $0x100] sm:$0xff]  ;;  %193 = vst [vmem:[%s924_s30 + $0x30] sm:$0xff] %v192_v6  ;;  %195 = vst [vmem:[%s924_s30 + $0x38] sm:$0xff] %v194_v7  ;;  %v198_v9 = vld [vmem:[%s916_s29 + $0x108] sm:$0xff] }
  0x17   : > { %197 = vst [vmem:[%s924_s30 + $0x40] sm:$0xff] %v196_v8  ;;  %v200_v10 = vld [vmem:[%s916_s29 + $0x140] sm:$0xff]  ;;  %v202_v11 = vld [vmem:[%s916_s29 + $0x148] sm:$0xff]  ;;  %199 = vst [vmem:[%s924_s30 + $0x48] sm:$0xff] %v198_v9 }
  0x18   : > { %201 = vst [vmem:[%s924_s30 + $0x50] sm:$0xff] %v200_v10  ;;  %203 = vst [vmem:[%s924_s30 + $0x58] sm:$0xff] %v202_v11  ;;  %v204_v12 = vld [vmem:[%s916_s29 + $0x180] sm:$0xff]  ;;  %v206_v13 = vld [vmem:[%s916_s29 + $0x188] sm:$0xff] }
  0x19   : > { %v208_v14 = vld [vmem:[%s916_s29 + $0x1c0] sm:$0xff]  ;;  %205 = vst [vmem:[%s924_s30 + $0x60] sm:$0xff] %v204_v12  ;;  %207 = vst [vmem:[%s924_s30 + $0x68] sm:$0xff] %v206_v13  ;;  %v210_v15 = vld [vmem:[%s916_s29 + $0x1c8] sm:$0xff] }
  0x1a   : > { %209 = vst [vmem:[%s924_s30 + $0x70] sm:$0xff] %v208_v14  ;;  %v212_v16 = vld [vmem:[%s916_s29 + $0x200] sm:$0xff]  ;;  %v214_v17 = vld [vmem:[%s916_s29 + $0x208] sm:$0xff]  ;;  %211 = vst [vmem:[%s924_s30 + $0x78] sm:$0xff] %v210_v15 }
  0x1b   : > { %213 = vst [vmem:[%s924_s30 + $0x80] sm:$0xff] %v212_v16  ;;  %215 = vst [vmem:[%s924_s30 + $0x88] sm:$0xff] %v214_v17  ;;  %v216_v18 = vld [vmem:[%s916_s29 + $0x240] sm:$0xff]  ;;  %v218_v19 = vld [vmem:[%s916_s29 + $0x248] sm:$0xff] }
  0x1c   : > { %217 = vst [vmem:[%s924_s30 + $0x90] sm:$0xff] %v216_v18  ;;  %219 = vst [vmem:[%s924_s30 + $0x98] sm:$0xff] %v218_v19 }
  0x1d PF: > { %p727_p7 = scmp.ge.s32.totalorder %s846_s17, 1  ;;  %p224_p8 = scmp.lt.s32.totalorder %s846_s17, 5 }
  0x1f   : > { %p225_p9 = pnand %p727_p7, %p224_p8 }
  0x20   : > { %s231_s5 = sand.u32 (!%p225_p9), 1, %s838_s15   ;;  %p267_p10 = scmp.lt.s32.totalorder (!%p225_p9), %s891_s18, 3 }
  0x21   : > { %228 = sbr.rel (%p225_p9) target bundleno = 410 (0x19a), region = 47  ;;  %s728_s10 = sshll.u32 (!%p225_p9), %s231_s5, 6 }
  0x22   : > { %s766_s6 = smul.u32 (!%p225_p9), 160, %s231_s5  ;;  %s992_s11 = scalar_lea.vmem (!%p225_p9), [#allocation3], %s728_s10 }
  0x24   : > { %s965_s7 = scalar_lea.vmem (!%p225_p9), [#allocation2], %s766_s6 }
  0x26   : > { %vm405_vm0 = vcmask 1044480   ;;  %vm406_vm1 = vcmask 1045504   ;;  %v848_v20 = vmov 65535   ;;  %v849_v22 = vmov 0   ;;  %v799_v30 = vld [vmem:[%s965_s7 + $0x64] ss:$16 sps:$4 sm:$0xff]  }
  0x27   : > { %v407_v21 = vsel %vm405_vm0, 4294967295, %v848_v20  ;;  %453 = vmatprep.mubr.bf16.mxu0 %v849_v22  ;;  %496 = vmatprep.mubr.bf16.mxu1 %v849_v22  ;;  %v793_v24 = vld [vmem:[%s965_s7 + $0x84] ss:$16 sps:$4 sm:$0x3f]   ;;  %v801_v33 = vld [vmem:[%s965_s7 + $0x6c] ss:$16 sps:$4 sm:$0xff]  }
  0x28   : > { %v408_v23 = vsel %vm406_vm1, %v407_v21, 0  ;;  %v795_v25 = vld [vmem:[%s965_s7 + $0x8c] ss:$16 sps:$4 sm:$0x3f]   ;;  %v803_v34 = vld [vmem:[%s965_s7 + $0x60] ss:$16 sps:$4 sm:$0xff]  }
  0x29   : > { %v413_v26 = vand.u32 %v793_v24, %v408_v23  ;;  %v797_v27 = vld [vmem:[%s965_s7 + $0x80] ss:$16 sps:$4 sm:$0x3f]   ;;  %v798_v28 = vld [vmem:[%s965_s7 + $0x88] ss:$16 sps:$4 sm:$0x3f]   ;;  %v419_v29 = vand.u32 %v795_v25, %v408_v23 }
  0x2a   : > { %v410_v31 = vand.u32 %v797_v27, %v408_v23  ;;  %v416_v32 = vand.u32 %v798_v28, %v408_v23  ;;  %v804_v35 = vld [vmem:[%s965_s7 + $0x68] ss:$16 sps:$4 sm:$0xff]   ;;  %v805_v36 = vld [vmem:[%s965_s7 + $0x44] ss:$16 sps:$4 sm:$0xff]   ;;  %v807_v37 = vld [vmem:[%s965_s7 + $0x4c] ss:$16 sps:$4 sm:$0xff]  }
  0x2b   : > { %427 = vmatprep.subr.bf16.mxu0 %v413_v26  ;;  %470 = vmatprep.subr.bf16.mxu1 %v419_v29  ;;  %v809_v38 = vld [vmem:[%s965_s7 + $0x40] ss:$16 sps:$4 sm:$0xff]   ;;  %v810_v39 = vld [vmem:[%s965_s7 + $0x48] ss:$16 sps:$4 sm:$0xff]   ;;  %v811_v40 = vld [vmem:[%s965_s7 + $0x24] ss:$16 sps:$4 sm:$0xff]  }
  0x2c   : > { %428 = vmatpush1.bf16.msra.mxu0 %v410_v31  ;;  %471 = vmatpush1.bf16.msra.mxu1 %v416_v32  ;;  %v813_v41 = vld [vmem:[%s965_s7 + $0x2c] ss:$16 sps:$4 sm:$0xff]   ;;  %v815_v42 = vld [vmem:[%s965_s7 + $0x20] ss:$16 sps:$4 sm:$0xff]   ;;  %v816_v43 = vld [vmem:[%s965_s7 + $0x28] ss:$16 sps:$4 sm:$0xff]  }
  0x2d   : > { %429 = vmatprep.subr.bf16.mxu0 %v799_v30  ;;  %472 = vmatprep.subr.bf16.mxu1 %v801_v33  ;;  %v817_v44 = vld [vmem:[%s965_s7 + $0x4] ss:$16 sps:$4 sm:$0xff]   ;;  %v819_v45 = vld [vmem:[%s965_s7 + $0xc] ss:$16 sps:$4 sm:$0xff]   ;;  %v821_v46 = vld [vmem:[%s965_s7] ss:$16 sps:$4 sm:$0xff]  }
  0x2e   : > { %v822_v47 = vld [vmem:[%s965_s7 + $0x8] ss:$16 sps:$4 sm:$0xff]   ;;  %v823_v48 = vld [vmem:[%s1042_s0] sm:$0x3f]   ;;  %vm401_vm2 = vcmask 613376   ;;  %vm520_vm3 = vcmask 1043456  }
  0x2f   : > { %s268_s12 = scalar_select %p267_p10, %s891_s18, 3  ;;  %vm530_vm4 = vcmask 7168   ;;  %vm532_vm5 = vcmask 3072  }
  0x30   : > { %430 = vmatpush1.bf16.msra.mxu0 %v803_v34  ;;  %473 = vmatpush1.bf16.msra.mxu1 %v804_v35  ;;  %s764_s25 = sshll.u32 (%p906_p5), %s891_s18, 5 }
  0x31   : > { %431 = vmatprep.subr.bf16.mxu0 %v805_v36  ;;  %474 = vmatprep.subr.bf16.mxu1 %v807_v37  ;;  %s762_s13 = sshll.u32 %s268_s12, 4  ;;  %s577_s28 = scalar_lea.vmem (%p906_p5), %s1044_s2, %s764_s25 }
  0x32   : > { %s271_s17 = scalar_lea.vmem %s1045_s3, %s762_s13  ;;  %s276_s24 = scalar_lea.vmem %s1046_s4, %s762_s13 }
  0x34   : > { %432 = vmatpush1.bf16.msra.mxu0 %v809_v38  ;;  %475 = vmatpush1.bf16.msra.mxu1 %v810_v39 }
  0x35   : > { %433 = vmatprep.subr.bf16.mxu0 %v811_v40  ;;  %476 = vmatprep.subr.bf16.mxu1 %v813_v41 }
  0x38   : > { %434 = vmatpush1.bf16.msra.mxu0 %v815_v42  ;;  %477 = vmatpush1.bf16.msra.mxu1 %v816_v43 }
  0x39   : > { %435 = vmatprep.subr.bf16.mxu0 %v817_v44  ;;  %478 = vmatprep.subr.bf16.mxu1 %v819_v45 }
  0x3c   : > { %436 = vmatpush1.bf16.msra.mxu0 %v821_v46  ;;  %479 = vmatpush1.bf16.msra.mxu1 %v822_v47 }
  0x3f   : > { %754 = vmatmul.mubr.msk.bf16.vlgmr.msra.gmra.mxu0 %vm401_vm2, %v823_v48  ;;  %755 = vmatmul.mubr.msk.bf16.vlgmr.msra.gmra.mxu1 %vm401_vm2, %v823_v48 }
  0xff   : > { %v455_v49 = vpop.f32.mrf.mxu0  ;;  %v498_v50 = vpop.f32.mrf.mxu1 }
 0x100   : > { %507 = vst [vmem:[%s992_s11] sm:$0xff] %v455_v49  ;;  %509 = vst [vmem:[%s992_s11 + $0x10] sm:$0xff] %v498_v50  ;;  %v534_v55 = vmul.f32 %v455_v49, %v455_v49  ;;  %v536_v56 = vmul.f32 %v498_v50, %v498_v50 }
 0x101   : > { %v457_v51 = vpop.f32.mrf.mxu0  ;;  %v500_v52 = vpop.f32.mrf.mxu1 }
 0x102   : > { %508 = vst [vmem:[%s992_s11 + $0x8] sm:$0xff] %v457_v51  ;;  %v515_v53 = vadd.f32 %v457_v51, %v455_v49  ;;  %v535_v54 = vmul.f32 %v457_v51, %v457_v51  ;;  %510 = vst [vmem:[%s992_s11 + $0x18] sm:$0xff] %v500_v52  ;;  %v537_v6 = vmul.f32 %v500_v52, %v500_v52 }
 0x103   : > { %v459_v57 = vpop.f32.mrf.mxu0  ;;  %v502_v58 = vpop.f32.mrf.mxu1 }
 0x104   : > { %511 = vst [vmem:[%s992_s11 + $0x20] sm:$0xf] %v459_v57  ;;  %v538_v59 = vmul.f32 %v459_v57, %v459_v57  ;;  %513 = vst [vmem:[%s992_s11 + $0x30] sm:$0xf] %v502_v58  ;;  %v516_v62 = vadd.f32 %v515_v53, %v498_v50  ;;  %v542_v63 = vadd.f32 %v535_v54, %v534_v55  ;;  %v521_v0 = vsel %vm520_vm3, %v459_v57, 0.0 }
 0x105   : > { %v461_v60 = vpop.f32.mrf.mxu0  ;;  %v504_v61 = vpop.f32.mrf.mxu1  ;;  %v540_v1 = vmul.f32 %v502_v58, %v502_v58  ;;  %v524_v9 = vsel %vm520_vm3, %v502_v58, 0.0 }
 0x106   : > { %512 = vst [vmem:[%s992_s11 + $0x28] sm:$0xf] %v461_v60  ;;  %v522_v2 = vsel %vm520_vm3, %v461_v60, 0.0  ;;  %v539_v3 = vmul.f32 %v461_v60, %v461_v60  ;;  %514 = vst [vmem:[%s992_s11 + $0x38] sm:$0xf] %v504_v61  ;;  %v517_v5 = vadd.f32 %v516_v62, %v500_v52  ;;  %v543_v7 = vadd.f32 %v542_v63, %v536_v56 }
 0x107   : > { %v523_v4 = vadd.f32 %v522_v2, %v521_v0  ;;  %v547_v8 = vsel %vm520_vm3, %v538_v59, 0.0  ;;  %v541_v11 = vmul.f32 %v504_v61, %v504_v61  ;;  %v526_v15 = vsel %vm520_vm3, %v504_v61, 0.0  ;;  %v590_v25 = vld [vmem:[%s992_s11] sm:$0xff] (%p906_p5)  ;;  %v594_v27 = vld [vmem:[%s992_s11 + $0x10] sm:$0xff] (%p906_p5) }
 0x108   : > { %v548_v10 = vsel %vm520_vm3, %v539_v3, 0.0  ;;  %518 = vadd.xlane.f32.xlu0 %v517_v5  ;;  %v544_v13 = vadd.f32 %v543_v7, %v537_v6  ;;  %v550_v16 = vsel %vm520_vm3, %v540_v1, 0.0  ;;  %591 = vst [vmem:[%s577_s28] sm:$0xff] (%p906_p5), %v590_v25  ;;  %595 = vst [vmem:[%s577_s28 + $0x10] sm:$0xff] (%p906_p5), %v594_v27 }
 0x109   : > { %v549_v12 = vadd.f32 %v548_v10, %v547_v8  ;;  %v525_v14 = vadd.f32 %v524_v9, %v523_v4  ;;  %v552_v19 = vsel %vm520_vm3, %v541_v11, 0.0  ;;  %v592_v26 = vld [vmem:[%s992_s11 + $0x8] sm:$0xff] (%p906_p5)  ;;  %v596_v28 = vld [vmem:[%s992_s11 + $0x18] sm:$0xff] (%p906_p5) }
 0x10a   : > { %545 = vadd.xlane.f32.xlu1 %v544_v13  ;;  %593 = vst [vmem:[%s577_s28 + $0x8] sm:$0xff] (%p906_p5), %v592_v26  ;;  %597 = vst [vmem:[%s577_s28 + $0x18] sm:$0xff] (%p906_p5), %v596_v28 }
 0x10b   : > { %v527_v17 = vadd.f32 %v526_v15, %v525_v14  ;;  %v551_v18 = vadd.f32 %v550_v16, %v549_v12  ;;  %v598_v29 = vld [vmem:[%s992_s11 + $0x20] sm:$0xff] (%p906_p5)  ;;  %v602_v31 = vld [vmem:[%s992_s11 + $0x30] sm:$0xff] (%p906_p5) }
 0x10c   : > { %599 = vst [vmem:[%s577_s28 + $0x80] sm:$0xff] (%p906_p5), %v598_v29  ;;  %603 = vst [vmem:[%s577_s28 + $0x90] sm:$0xff] (%p906_p5), %v602_v31 }
 0x10d   : > { %528 = vadd.xlane.f32.xlu0 %v527_v17  ;;  %v553_v20 = vadd.f32 %v552_v19, %v551_v18  ;;  %v600_v30 = vld [vmem:[%s992_s11 + $0x28] sm:$0xff] (%p906_p5)  ;;  %v604_v32 = vld [vmem:[%s992_s11 + $0x38] sm:$0xff] (%p906_p5) }
 0x10e   : > { %601 = vst [vmem:[%s577_s28 + $0x88] sm:$0xff] (%p906_p5), %v600_v30  ;;  %605 = vst [vmem:[%s577_s28 + $0x98] sm:$0xff] (%p906_p5), %v604_v32 }
 0x10f   : > { %554 = vadd.xlane.f32.xlu1 %v553_v20 }
 0x191   : > { %v519_v21 = vpop.xlane.xlu0 %518 }
 0x192   : > { %531 = vst.msk [vmem:[%s271_s17] sm:$0xff] %vm530_vm4, %v519_v21 }
 0x193   : > { %v546_v22 = vpop.xlane.xlu1 %545 }
 0x194   : > { %556 = vst.msk [vmem:[%s276_s24] sm:$0xff] %vm530_vm4, %v546_v22 }
 0x195   : > { %574 = sbr.rel (!%p906_p5) target bundleno = 410 (0x19a), region = 55 }
 0x196   : > { %v529_v23 = vpop.xlane.xlu0 %528 }
 0x197   : > { %533 = vst.msk [vmem:[%s271_s17 + $0x8] sm:$0xf] %vm532_vm5, %v529_v23 }
 0x198   : > { %v555_v24 = vpop.xlane.xlu1 %554 }
 0x199   : > { %557 = vst.msk [vmem:[%s276_s24 + $0x8] sm:$0xf] %vm532_vm5, %v555_v24 }
 0x19a PF: > { %p12_p11 = scmp.ge.s32.totalorder %s894_s19, 6   ;;  %s1048_s15 = smov %s842_s16 }
 0x19b   : > { %s1049_s16 = smov %s904_s22  ;;  %s1050_s17 = smov %s894_s19 }
 0x19c   :  { %14 = sbr.rel (!%p12_p11) target bundleno = 2 (0x2), region = 133 }

// kernel: network_forward.10
= control target key start
LH: loop header
LB: loop body
LE: loop exit
PB: predicated region body
PF: predicated region fallthrough
CT: control target
= control target key end

     0   :  { %s451_s12 = smov 0   ;;  %s453_s13 = smov 0   ;;  %s541_s0 = inlined_call_operand.vmem [shape: f32[12,2048], index: 0, kind: input, shape index: {}]   ;;  %s542_s1 = inlined_call_operand.vmem [shape: f32[12,1], index: 1, kind: input, shape index: {}]   ;;  %s543_s2 = inlined_call_operand.vmem [shape: f32[12,1], index: 2, kind: input, shape index: {}]   ;;  %s544_s3 = inlined_call_operand.vmem [shape: f32[12,2048], index: 3, kind: output, shape index: {}]  }
   0x1   :  { %s455_s14 = smov 0  }
   0x2 LB: > { %s362_s15 = sadd.s32 4294967295, %s428_s14   ;;  %s468_s16 = sadd.s32 1, %s428_s14   ;;  %s428_s14 = sphi %s455_s14, %s548_s14   ;;  %s424_s13 = sphi %s453_s13, %s547_s13   ;;  %s420_s12 = sphi %s451_s12, %s546_s12  }
   0x3   : > { %s17_s17 = ssub.s32 %s428_s14, %s468_s16  ;;  %s20_s18 = sadd.s32 1, %s424_s13 }
   0x4   : > { %p18_p0 = scmp.eq.s32.totalorder %s17_s17, 0  ;;  %p27_p1 = scmp.ne.s32.totalorder %s424_s13, %s420_s12 }
   0x5   : > { %p28_p2 = scmp.eq.s32.totalorder %s428_s14, 0  ;;  %p99_p3 = scmp.eq.s32.totalorder %s362_s15, 3 }
   0x6   : > { %s479_s19 = scalar_select %p18_p0, %s424_s13, %s20_s18  }
   0x7   : > { %p29_p4 = por %p28_p2, %p27_p1  ;;  %p481_p5 = por %p99_p3, %p27_p1 }
   0x8   : > { %p365_p6 = scmp.ge.s32.totalorder %s428_s14, 4 }
   0xa   : > { %127 = sbr.rel (%p365_p6) target bundleno = 23 (0x17), region = 24 }
   0xf   : > { %130 = sbr.rel (!%p29_p4) target bundleno = 23 (0x17), region = 28  ;;  %s132_s21 = sand.u32 (%p29_p4), 1, %s424_s13  }
  0x10   : > { %s377_s22 = sshll.u32 (%p29_p4), %s428_s14, 5  ;;  %s366_s23 = sshll.u32 (%p29_p4), %s132_s21, 6 }
  0x11   : > { %s137_s26 = scalar_lea.vmem (%p29_p4), %s541_s0, %s377_s22  ;;  %s134_s27 = scalar_lea.vmem (%p29_p4), [#allocation2], %s366_s23 }
  0x12   : > { %v150_v0 = vld [vmem:[%s137_s26] sm:$0xff] (%p29_p4)  ;;  %v152_v1 = vld [vmem:[%s137_s26 + $0x8] sm:$0xff] (%p29_p4)  ;;  %v154_v2 = vld [vmem:[%s137_s26 + $0x10] sm:$0xff] (%p29_p4) }
  0x13   : > { %151 = vst [vmem:[%s134_s27] sm:$0xff] (%p29_p4), %v150_v0  ;;  %153 = vst [vmem:[%s134_s27 + $0x8] sm:$0xff] (%p29_p4), %v152_v1  ;;  %v156_v3 = vld [vmem:[%s137_s26 + $0x18] sm:$0xff] (%p29_p4)  ;;  %v158_v4 = vld [vmem:[%s137_s26 + $0x80] sm:$0xff] (%p29_p4) }
  0x14   : > { %155 = vst [vmem:[%s134_s27 + $0x10] sm:$0xff] %v154_v2  ;;  %v160_v5 = vld [vmem:[%s137_s26 + $0x88] sm:$0xff]  ;;  %157 = vst [vmem:[%s134_s27 + $0x18] sm:$0xff] %v156_v3  ;;  %v162_v6 = vld [vmem:[%s137_s26 + $0x90] sm:$0xff] }
  0x15   : > { %159 = vst [vmem:[%s134_s27 + $0x20] sm:$0xff] %v158_v4  ;;  %161 = vst [vmem:[%s134_s27 + $0x28] sm:$0xff] %v160_v5  ;;  %v164_v7 = vld [vmem:[%s137_s26 + $0x98] sm:$0xff] }
  0x16   : > { %163 = vst [vmem:[%s134_s27 + $0x30] sm:$0xff] %v162_v6  ;;  %165 = vst [vmem:[%s134_s27 + $0x38] sm:$0xff] %v164_v7 }
  0x17 PF: > { %p369_p7 = scmp.ge.s32.totalorder %s428_s14, 1  ;;  %p170_p8 = scmp.lt.s32.totalorder %s428_s14, 5 }
  0x19   : > { %p171_p9 = pnand %p369_p7, %p170_p8 }
  0x1a   : > { %s177_s9 = sand.u32 (!%p171_p9), 1, %s420_s12  }
  0x1b   : > { %174 = sbr.rel (%p171_p9) target bundleno = 179 (0xb3), region = 51  ;;  %s370_s10 = sshll.u32 (!%p171_p9), %s177_s9, 6 }
  0x1c   : > { %s179_s11 = scalar_lea.vmem (!%p171_p9), [#allocation2], %s370_s10  ;;  %s506_s12 = scalar_lea.vmem (!%p171_p9), [#allocation3], %s370_s10 }
  0x20   : > { %v229_v8 = vld [vmem:[%s543_s2] sm:$0xff]  ;;  %v430_v10 = vmov 0   ;;  %v230_v11 = vld [vmem:[%s543_s2 + $0x8] sm:$0xf]  ;;  %v203_v15 = vld [vmem:[%s179_s11 + $0x10] sm:$0xff]  ;;  %s378_s17 = sshll.u32 (%p481_p5), %s362_s15, 5 }
  0x21   : > { %v209_v9 = vld [vmem:[%s542_s1] sm:$0xff]  ;;  %405 = vset.pattern.permute.xlu1 %v430_v10  ;;  %404 = vset.pattern.permute.xlu0 %v430_v10  ;;  %v210_v12 = vld [vmem:[%s542_s1 + $0x8] sm:$0xf]  ;;  %v204_v16 = vld [vmem:[%s179_s11 + $0x18] sm:$0xff]  ;;  %s274_s22 = scalar_lea.vmem (%p481_p5), %s544_s3, %s378_s17 }
  0x22   : > { %233 = vperm.xlu1 %405, %v229_v8   ;;  %213 = vperm.xlu0 %404, %v209_v9   ;;  %v201_v13 = vld [vmem:[%s179_s11] sm:$0xff]  ;;  %v202_v14 = vld [vmem:[%s179_s11 + $0x8] sm:$0xff]  ;;  %v207_v29 = vld [vmem:[%s179_s11 + $0x30] sm:$0xf] }
  0x23   : > { %v205_v23 = vld [vmem:[%s179_s11 + $0x20] sm:$0xf]  ;;  %v206_v28 = vld [vmem:[%s179_s11 + $0x28] sm:$0xf]  ;;  %v208_v30 = vld [vmem:[%s179_s11 + $0x38] sm:$0xf] }
  0x26   : > { %238 = vperm.xlu1 %405, %v230_v11   ;;  %218 = vperm.xlu0 %404, %v210_v12  }
  0x9d   : > { %v214_v17 = vpop.permute.xlu0 %213  ;;  %v234_v18 = vpop.permute.xlu1 %233 }
  0x9e   : > { %v221_v19 = vmul.f32 %v214_v17, %v201_v13  ;;  %v222_v20 = vmul.f32 %v214_v17, %v202_v14  ;;  %v223_v21 = vmul.f32 %v214_v17, %v203_v15  ;;  %v224_v22 = vmul.f32 %v214_v17, %v204_v16 }
  0xa0   : > { %v241_v24 = vadd.f32 %v234_v18, %v221_v19  ;;  %v242_v25 = vadd.f32 %v234_v18, %v222_v20  ;;  %v243_v26 = vadd.f32 %v234_v18, %v223_v21  ;;  %v244_v27 = vadd.f32 %v234_v18, %v224_v22 }
  0xa1   : > { %v219_v31 = vpop.permute.xlu0 %218  ;;  %v239_v40 = vpop.permute.xlu1 %238 }
  0xa2   : > { %v249_v32 = vmax.f32 %v241_v24, 0.0  ;;  %v250_v33 = vmax.f32 %v242_v25, 0.0  ;;  %v251_v34 = vmax.f32 %v243_v26, 0.0  ;;  %v252_v35 = vmax.f32 %v244_v27, 0.0 }
  0xa3   : > { %v225_v36 = vmul.f32 %v219_v31, %v205_v23  ;;  %v226_v37 = vmul.f32 %v219_v31, %v206_v28  ;;  %v227_v38 = vmul.f32 %v219_v31, %v207_v29  ;;  %v228_v39 = vmul.f32 %v219_v31, %v208_v30 }
  0xa4   : > { %257 = vst [vmem:[%s506_s12] sm:$0xff] %v249_v32  ;;  %258 = vst [vmem:[%s506_s12 + $0x8] sm:$0xff] %v250_v33 }
  0xa5   : > { %259 = vst [vmem:[%s506_s12 + $0x10] sm:$0xff] %v251_v34  ;;  %260 = vst [vmem:[%s506_s12 + $0x18] sm:$0xff] %v252_v35  ;;  %v245_v41 = vadd.f32 %v239_v40, %v225_v36  ;;  %v246_v42 = vadd.f32 %v239_v40, %v226_v37  ;;  %v247_v43 = vadd.f32 %v239_v40, %v227_v38 }
  0xa6   : > { %v248_v44 = vadd.f32 %v239_v40, %v228_v39  ;;  %271 = sbr.rel (!%p481_p5) target bundleno = 179 (0xb3), region = 59 }
  0xa7   : > { %v253_v45 = vmax.f32 %v245_v41, 0.0  ;;  %v254_v46 = vmax.f32 %v246_v42, 0.0  ;;  %v255_v47 = vmax.f32 %v247_v43, 0.0 }
  0xa8   : > { %v256_v48 = vmax.f32 %v248_v44, 0.0 }
  0xa9   : > { %261 = vst [vmem:[%s506_s12 + $0x20] sm:$0xf] %v253_v45  ;;  %262 = vst [vmem:[%s506_s12 + $0x28] sm:$0xf] %v254_v46 }
  0xaa   : > { %263 = vst [vmem:[%s506_s12 + $0x30] sm:$0xf] %v255_v47  ;;  %264 = vst [vmem:[%s506_s12 + $0x38] sm:$0xf] %v256_v48 }
  0xab   : > { %v287_v49 = vld [vmem:[%s506_s12] sm:$0xff]  ;;  %v289_v50 = vld [vmem:[%s506_s12 + $0x8] sm:$0xff] }
  0xac   : > { %v291_v51 = vld [vmem:[%s506_s12 + $0x10] sm:$0xff]  ;;  %v293_v52 = vld [vmem:[%s506_s12 + $0x18] sm:$0xff]  ;;  %288 = vst [vmem:[%s274_s22] sm:$0xff] %v287_v49  ;;  %290 = vst [vmem:[%s274_s22 + $0x8] sm:$0xff] %v289_v50 }
  0xad   : > { %292 = vst [vmem:[%s274_s22 + $0x10] sm:$0xff] %v291_v51  ;;  %294 = vst [vmem:[%s274_s22 + $0x18] sm:$0xff] %v293_v52 }
  0xb0   : > { %v295_v53 = vld [vmem:[%s506_s12 + $0x20] sm:$0xff]  ;;  %v297_v54 = vld [vmem:[%s506_s12 + $0x28] sm:$0xff] }
  0xb1   : > { %296 = vst [vmem:[%s274_s22 + $0x80] sm:$0xff] %v295_v53  ;;  %298 = vst [vmem:[%s274_s22 + $0x88] sm:$0xff] %v297_v54  ;;  %v299_v55 = vld [vmem:[%s506_s12 + $0x30] sm:$0xff]  ;;  %v301_v56 = vld [vmem:[%s506_s12 + $0x38] sm:$0xff] }
  0xb2   : > { %300 = vst [vmem:[%s274_s22 + $0x90] sm:$0xff] %v299_v55  ;;  %302 = vst [vmem:[%s274_s22 + $0x98] sm:$0xff] %v301_v56 }
  0xb3 PF: > { %p10_p10 = scmp.ge.s32.totalorder %s468_s16, 6   ;;  %s546_s12 = smov %s424_s13 }
  0xb4   : > { %s547_s13 = smov %s479_s19  ;;  %s548_s14 = smov %s468_s16 }
  0xb5   :  { %12 = sbr.rel (!%p10_p10) target bundleno = 2 (0x2), region = 113 }

// kernel: network_forward.11
= control target key start
LH: loop header
LB: loop body
LE: loop exit
PB: predicated region body
PF: predicated region fallthrough
CT: control target
= control target key end

     0   :  { %s1563_s15 = smov 0   ;;  %s1565_s16 = smov 0   ;;  %s1916_s0 = inlined_call_operand.vmem [shape: bf16[12,300], index: 0, kind: input, shape index: {}]   ;;  %s1917_s1 = inlined_call_operand.vmem [shape: bf16[300,2048], index: 1, kind: input, shape index: {}]   ;;  %s1918_s2 = inlined_call_operand.vmem [shape: f32[12,2048], index: 2, kind: output, shape index: {0}]   ;;  %s1919_s3 = inlined_call_operand.vmem [shape: f32[4,12,1], index: 3, kind: output, shape index: {1}]   ;;  %s1920_s4 = inlined_call_operand.vmem [shape: f32[4,12,1], index: 4, kind: output, shape index: {2}]  }
   0x1   :  { %s1567_s17 = smov 0  }
   0x2 LB: > { %s1579_s18 = sadd.s32 4294967295, %s1535_s17   ;;  %s1582_s19 = sadd.s32 1, %s1535_s17   ;;  %s1535_s17 = sphi %s1567_s17, %s1924_s17   ;;  %s1531_s16 = sphi %s1565_s16, %s1923_s16   ;;  %s1527_s15 = sphi %s1563_s15, %s1922_s15  }
   0x3   : > { %s40_s20 = ssub.s32 %s1535_s17, %s1582_s19  ;;  %s43_s21 = sadd.s32 1, %s1531_s16 }
   0x4   : > { %p41_p0 = scmp.eq.s32.totalorder %s40_s20, 0  ;;  %p50_p1 = scmp.ne.s32.totalorder %s1531_s16, %s1527_s15 }
   0x5   : > { %p51_p2 = scmp.eq.s32.totalorder %s1535_s17, 0  ;;  %p80_p3 = scmp.eq.s32.totalorder %s1579_s18, 3 }
   0x6   : > { %s1592_s22 = scalar_select %p41_p0, %s1531_s16, %s43_s21  }
   0x7   : > { %p52_p4 = por %p51_p2, %p50_p1  ;;  %p1594_p5 = por %p80_p3, %p50_p1 }
   0x8   : > { %p1267_p6 = scmp.ge.s32.totalorder %s1535_s17, 4 }
   0xa   : > { %157 = sbr.rel (%p1267_p6) target bundleno = 57 (0x39), region = 20 }
   0xf   : > { %160 = sbr.rel (!%p52_p4) target bundleno = 57 (0x39), region = 24  ;;  %s162_s24 = sand.u32 (%p52_p4), 1, %s1531_s16  }
  0x10   : > { %s1364_s25 = sshll.u32 (%p52_p4), %s1535_s17, 4  ;;  %s1368_s26 = smul.u32 (%p52_p4), 608, %s162_s24 }
  0x11   : > { %s1604_s29 = scalar_lea.vmem (%p52_p4), %s1917_s1, %s1364_s25 }
  0x12   : > { %v180_v0 = vld [vmem:[%s1604_s29] sm:$0xff] (%p52_p4)  ;;  %v182_v1 = vld [vmem:[%s1604_s29 + $0x8] sm:$0xff] (%p52_p4)  ;;  %s1612_s30 = scalar_lea.vmem (%p52_p4), [#allocation2], %s1368_s26 }
  0x13   : > { %v184_v2 = vld [vmem:[%s1604_s29 + $0x40] sm:$0xff] (%p52_p4)  ;;  %v186_v3 = vld [vmem:[%s1604_s29 + $0x48] sm:$0xff] (%p52_p4)  ;;  %181 = vst [vmem:[%s1612_s30] sm:$0xff] (%p52_p4), %v180_v0  ;;  %183 = vst [vmem:[%s1612_s30 + $0x8] sm:$0xff] (%p52_p4), %v182_v1 }
  0x14   : > { %v188_v4 = vld [vmem:[%s1604_s29 + $0x80] sm:$0xff]  ;;  %v190_v5 = vld [vmem:[%s1604_s29 + $0x88] sm:$0xff]  ;;  %185 = vst [vmem:[%s1612_s30 + $0x10] sm:$0xff] %v184_v2  ;;  %187 = vst [vmem:[%s1612_s30 + $0x18] sm:$0xff] %v186_v3 }
  0x15   : > { %189 = vst [vmem:[%s1612_s30 + $0x20] sm:$0xff] %v188_v4  ;;  %191 = vst [vmem:[%s1612_s30 + $0x28] sm:$0xff] %v190_v5  ;;  %v192_v6 = vld [vmem:[%s1604_s29 + $0xc0] sm:$0xff]  ;;  %v194_v7 = vld [vmem:[%s1604_s29 + $0xc8] sm:$0xff] }
  0x16   : > { %v196_v8 = vld [vmem:[%s1604_s29 + $0x100] sm:$0xff]  ;;  %193 = vst [vmem:[%s1612_s30 + $0x30] sm:$0xff] %v192_v6  ;;  %195 = vst [vmem:[%s1612_s30 + $0x38] sm:$0xff] %v194_v7  ;;  %v198_v9 = vld [vmem:[%s1604_s29 + $0x108] sm:$0xff] }
  0x17   : > { %197 = vst [vmem:[%s1612_s30 + $0x40] sm:$0xff] %v196_v8  ;;  %v200_v10 = vld [vmem:[%s1604_s29 + $0x140] sm:$0xff]  ;;  %v202_v11 = vld [vmem:[%s1604_s29 + $0x148] sm:$0xff]  ;;  %199 = vst [vmem:[%s1612_s30 + $0x48] sm:$0xff] %v198_v9 }
  0x18   : > { %201 = vst [vmem:[%s1612_s30 + $0x50] sm:$0xff] %v200_v10  ;;  %203 = vst [vmem:[%s1612_s30 + $0x58] sm:$0xff] %v202_v11  ;;  %v204_v12 = vld [vmem:[%s1604_s29 + $0x180] sm:$0xff]  ;;  %v206_v13 = vld [vmem:[%s1604_s29 + $0x188] sm:$0xff] }
  0x19   : > { %v208_v14 = vld [vmem:[%s1604_s29 + $0x1c0] sm:$0xff]  ;;  %205 = vst [vmem:[%s1612_s30 + $0x60] sm:$0xff] %v204_v12  ;;  %207 = vst [vmem:[%s1612_s30 + $0x68] sm:$0xff] %v206_v13  ;;  %v210_v15 = vld [vmem:[%s1604_s29 + $0x1c8] sm:$0xff] }
  0x1a   : > { %209 = vst [vmem:[%s1612_s30 + $0x70] sm:$0xff] %v208_v14  ;;  %v212_v16 = vld [vmem:[%s1604_s29 + $0x200] sm:$0xff]  ;;  %v214_v17 = vld [vmem:[%s1604_s29 + $0x208] sm:$0xff]  ;;  %211 = vst [vmem:[%s1612_s30 + $0x78] sm:$0xff] %v210_v15 }
  0x1b   : > { %213 = vst [vmem:[%s1612_s30 + $0x80] sm:$0xff] %v212_v16  ;;  %215 = vst [vmem:[%s1612_s30 + $0x88] sm:$0xff] %v214_v17  ;;  %v216_v18 = vld [vmem:[%s1604_s29 + $0x240] sm:$0xff]  ;;  %v218_v19 = vld [vmem:[%s1604_s29 + $0x248] sm:$0xff] }
  0x1c   : > { %v220_v20 = vld [vmem:[%s1604_s29 + $0x280] sm:$0xff]  ;;  %217 = vst [vmem:[%s1612_s30 + $0x90] sm:$0xff] %v216_v18  ;;  %219 = vst [vmem:[%s1612_s30 + $0x98] sm:$0xff] %v218_v19  ;;  %v222_v21 = vld [vmem:[%s1604_s29 + $0x288] sm:$0xff] }
  0x1d   : > { %221 = vst [vmem:[%s1612_s30 + $0xa0] sm:$0xff] %v220_v20  ;;  %v224_v22 = vld [vmem:[%s1604_s29 + $0x2c0] sm:$0xff]  ;;  %v226_v23 = vld [vmem:[%s1604_s29 + $0x2c8] sm:$0xff]  ;;  %223 = vst [vmem:[%s1612_s30 + $0xa8] sm:$0xff] %v222_v21 }
  0x1e   : > { %225 = vst [vmem:[%s1612_s30 + $0xb0] sm:$0xff] %v224_v22  ;;  %227 = vst [vmem:[%s1612_s30 + $0xb8] sm:$0xff] %v226_v23  ;;  %v228_v24 = vld [vmem:[%s1604_s29 + $0x300] sm:$0xff]  ;;  %v230_v25 = vld [vmem:[%s1604_s29 + $0x308] sm:$0xff] }
  0x1f   : > { %v232_v26 = vld [vmem:[%s1604_s29 + $0x340] sm:$0xff]  ;;  %229 = vst [vmem:[%s1612_s30 + $0xc0] sm:$0xff] %v228_v24  ;;  %231 = vst [vmem:[%s1612_s30 + $0xc8] sm:$0xff] %v230_v25  ;;  %v234_v27 = vld [vmem:[%s1604_s29 + $0x348] sm:$0xff] }
  0x20   : > { %233 = vst [vmem:[%s1612_s30 + $0xd0] sm:$0xff] %v232_v26  ;;  %v236_v28 = vld [vmem:[%s1604_s29 + $0x380] sm:$0xff]  ;;  %v238_v29 = vld [vmem:[%s1604_s29 + $0x388] sm:$0xff]  ;;  %235 = vst [vmem:[%s1612_s30 + $0xd8] sm:$0xff] %v234_v27 }
  0x21   : > { %237 = vst [vmem:[%s1612_s30 + $0xe0] sm:$0xff] %v236_v28  ;;  %239 = vst [vmem:[%s1612_s30 + $0xe8] sm:$0xff] %v238_v29  ;;  %v240_v30 = vld [vmem:[%s1604_s29 + $0x3c0] sm:$0xff]  ;;  %v242_v31 = vld [vmem:[%s1604_s29 + $0x3c8] sm:$0xff] }
  0x22   : > { %v244_v32 = vld [vmem:[%s1604_s29 + $0x400] sm:$0xff]  ;;  %241 = vst [vmem:[%s1612_s30 + $0xf0] sm:$0xff] %v240_v30  ;;  %243 = vst [vmem:[%s1612_s30 + $0xf8] sm:$0xff] %v242_v31  ;;  %v246_v33 = vld [vmem:[%s1604_s29 + $0x408] sm:$0xff] }
  0x23   : > { %245 = vst [vmem:[%s1612_s30 + $0x100] sm:$0xff] %v244_v32  ;;  %v248_v34 = vld [vmem:[%s1604_s29 + $0x440] sm:$0xff]  ;;  %v250_v35 = vld [vmem:[%s1604_s29 + $0x448] sm:$0xff]  ;;  %247 = vst [vmem:[%s1612_s30 + $0x108] sm:$0xff] %v246_v33 }
  0x24   : > { %249 = vst [vmem:[%s1612_s30 + $0x110] sm:$0xff] %v248_v34  ;;  %251 = vst [vmem:[%s1612_s30 + $0x118] sm:$0xff] %v250_v35  ;;  %v252_v36 = vld [vmem:[%s1604_s29 + $0x480] sm:$0xff]  ;;  %v254_v37 = vld [vmem:[%s1604_s29 + $0x488] sm:$0xff] }
  0x25   : > { %v256_v38 = vld [vmem:[%s1604_s29 + $0x4c0] sm:$0xff]  ;;  %253 = vst [vmem:[%s1612_s30 + $0x120] sm:$0xff] %v252_v36  ;;  %255 = vst [vmem:[%s1612_s30 + $0x128] sm:$0xff] %v254_v37  ;;  %v258_v39 = vld [vmem:[%s1604_s29 + $0x4c8] sm:$0xff] }
  0x26   : > { %257 = vst [vmem:[%s1612_s30 + $0x130] sm:$0xff] %v256_v38  ;;  %v260_v40 = vld [vmem:[%s1604_s29 + $0x500] sm:$0xff]  ;;  %v262_v41 = vld [vmem:[%s1604_s29 + $0x508] sm:$0xff]  ;;  %259 = vst [vmem:[%s1612_s30 + $0x138] sm:$0xff] %v258_v39 }
  0x27   : > { %261 = vst [vmem:[%s1612_s30 + $0x140] sm:$0xff] %v260_v40  ;;  %263 = vst [vmem:[%s1612_s30 + $0x148] sm:$0xff] %v262_v41  ;;  %v264_v42 = vld [vmem:[%s1604_s29 + $0x540] sm:$0xff]  ;;  %v266_v43 = vld [vmem:[%s1604_s29 + $0x548] sm:$0xff] }
  0x28   : > { %v268_v44 = vld [vmem:[%s1604_s29 + $0x580] sm:$0xff]  ;;  %265 = vst [vmem:[%s1612_s30 + $0x150] sm:$0xff] %v264_v42  ;;  %267 = vst [vmem:[%s1612_s30 + $0x158] sm:$0xff] %v266_v43  ;;  %v270_v45 = vld [vmem:[%s1604_s29 + $0x588] sm:$0xff] }
  0x29   : > { %269 = vst [vmem:[%s1612_s30 + $0x160] sm:$0xff] %v268_v44  ;;  %v272_v46 = vld [vmem:[%s1604_s29 + $0x5c0] sm:$0xff]  ;;  %v274_v47 = vld [vmem:[%s1604_s29 + $0x5c8] sm:$0xff]  ;;  %271 = vst [vmem:[%s1612_s30 + $0x168] sm:$0xff] %v270_v45 }
  0x2a   : > { %273 = vst [vmem:[%s1612_s30 + $0x170] sm:$0xff] %v272_v46  ;;  %275 = vst [vmem:[%s1612_s30 + $0x178] sm:$0xff] %v274_v47  ;;  %v276_v48 = vld [vmem:[%s1604_s29 + $0x600] sm:$0xff]  ;;  %v278_v49 = vld [vmem:[%s1604_s29 + $0x608] sm:$0xff] }
  0x2b   : > { %v280_v50 = vld [vmem:[%s1604_s29 + $0x640] sm:$0xff]  ;;  %277 = vst [vmem:[%s1612_s30 + $0x180] sm:$0xff] %v276_v48  ;;  %279 = vst [vmem:[%s1612_s30 + $0x188] sm:$0xff] %v278_v49  ;;  %v282_v51 = vld [vmem:[%s1604_s29 + $0x648] sm:$0xff] }
  0x2c   : > { %281 = vst [vmem:[%s1612_s30 + $0x190] sm:$0xff] %v280_v50  ;;  %v284_v52 = vld [vmem:[%s1604_s29 + $0x680] sm:$0xff]  ;;  %v286_v53 = vld [vmem:[%s1604_s29 + $0x688] sm:$0xff]  ;;  %283 = vst [vmem:[%s1612_s30 + $0x198] sm:$0xff] %v282_v51 }
  0x2d   : > { %285 = vst [vmem:[%s1612_s30 + $0x1a0] sm:$0xff] %v284_v52  ;;  %287 = vst [vmem:[%s1612_s30 + $0x1a8] sm:$0xff] %v286_v53  ;;  %v288_v54 = vld [vmem:[%s1604_s29 + $0x6c0] sm:$0xff]  ;;  %v290_v55 = vld [vmem:[%s1604_s29 + $0x6c8] sm:$0xff] }
  0x2e   : > { %v292_v56 = vld [vmem:[%s1604_s29 + $0x700] sm:$0xff]  ;;  %289 = vst [vmem:[%s1612_s30 + $0x1b0] sm:$0xff] %v288_v54  ;;  %291 = vst [vmem:[%s1612_s30 + $0x1b8] sm:$0xff] %v290_v55  ;;  %v294_v57 = vld [vmem:[%s1604_s29 + $0x708] sm:$0xff] }
  0x2f   : > { %293 = vst [vmem:[%s1612_s30 + $0x1c0] sm:$0xff] %v292_v56  ;;  %v296_v58 = vld [vmem:[%s1604_s29 + $0x740] sm:$0xff]  ;;  %v298_v59 = vld [vmem:[%s1604_s29 + $0x748] sm:$0xff]  ;;  %295 = vst [vmem:[%s1612_s30 + $0x1c8] sm:$0xff] %v294_v57 }
  0x30   : > { %297 = vst [vmem:[%s1612_s30 + $0x1d0] sm:$0xff] %v296_v58  ;;  %299 = vst [vmem:[%s1612_s30 + $0x1d8] sm:$0xff] %v298_v59  ;;  %v300_v60 = vld [vmem:[%s1604_s29 + $0x780] sm:$0xff]  ;;  %v302_v61 = vld [vmem:[%s1604_s29 + $0x788] sm:$0xff] }
  0x31   : > { %v304_v62 = vld [vmem:[%s1604_s29 + $0x7c0] sm:$0xff]  ;;  %301 = vst [vmem:[%s1612_s30 + $0x1e0] sm:$0xff] %v300_v60  ;;  %303 = vst [vmem:[%s1612_s30 + $0x1e8] sm:$0xff] %v302_v61  ;;  %v306_v63 = vld [vmem:[%s1604_s29 + $0x7c8] sm:$0xff] }
  0x32   : > { %305 = vst [vmem:[%s1612_s30 + $0x1f0] sm:$0xff] %v304_v62  ;;  %v308_v0 = vld [vmem:[%s1604_s29 + $0x800] sm:$0xff]  ;;  %v310_v1 = vld [vmem:[%s1604_s29 + $0x808] sm:$0xff]  ;;  %307 = vst [vmem:[%s1612_s30 + $0x1f8] sm:$0xff] %v306_v63 }
  0x33   : > { %309 = vst [vmem:[%s1612_s30 + $0x200] sm:$0xff] %v308_v0  ;;  %311 = vst [vmem:[%s1612_s30 + $0x208] sm:$0xff] %v310_v1  ;;  %v312_v2 = vld [vmem:[%s1604_s29 + $0x840] sm:$0xff]  ;;  %v314_v3 = vld [vmem:[%s1604_s29 + $0x848] sm:$0xff] }
  0x34   : > { %v316_v4 = vld [vmem:[%s1604_s29 + $0x880] sm:$0xff]  ;;  %313 = vst [vmem:[%s1612_s30 + $0x210] sm:$0xff] %v312_v2  ;;  %315 = vst [vmem:[%s1612_s30 + $0x218] sm:$0xff] %v314_v3  ;;  %v318_v5 = vld [vmem:[%s1604_s29 + $0x888] sm:$0xff] }
  0x35   : > { %317 = vst [vmem:[%s1612_s30 + $0x220] sm:$0xff] %v316_v4  ;;  %v320_v6 = vld [vmem:[%s1604_s29 + $0x8c0] sm:$0xff]  ;;  %v322_v7 = vld [vmem:[%s1604_s29 + $0x8c8] sm:$0xff]  ;;  %319 = vst [vmem:[%s1612_s30 + $0x228] sm:$0xff] %v318_v5 }
  0x36   : > { %321 = vst [vmem:[%s1612_s30 + $0x230] sm:$0xff] %v320_v6  ;;  %323 = vst [vmem:[%s1612_s30 + $0x238] sm:$0xff] %v322_v7  ;;  %v324_v8 = vld [vmem:[%s1604_s29 + $0x900] sm:$0xff]  ;;  %v326_v9 = vld [vmem:[%s1604_s29 + $0x908] sm:$0xff] }
  0x37   : > { %v328_v10 = vld [vmem:[%s1604_s29 + $0x940] sm:$0xff]  ;;  %325 = vst [vmem:[%s1612_s30 + $0x240] sm:$0xff] %v324_v8  ;;  %327 = vst [vmem:[%s1612_s30 + $0x248] sm:$0xff] %v326_v9  ;;  %v330_v11 = vld [vmem:[%s1604_s29 + $0x948] sm:$0xff] }
  0x38   : > { %329 = vst [vmem:[%s1612_s30 + $0x250] sm:$0xff] %v328_v10  ;;  %331 = vst [vmem:[%s1612_s30 + $0x258] sm:$0xff] %v330_v11 }
  0x39 PF: > { %p1270_p7 = scmp.ge.s32.totalorder %s1535_s17, 1  ;;  %p336_p8 = scmp.lt.s32.totalorder %s1535_s17, 5 }
  0x3b   : > { %p337_p9 = pnand %p1270_p7, %p336_p8 }
  0x3c   : > { %s343_s5 = sand.u32 (!%p337_p9), 1, %s1527_s15   ;;  %p379_p10 = scmp.lt.s32.totalorder (!%p337_p9), %s1579_s18, 3 }
  0x3d   : > { %340 = sbr.rel (%p337_p9) target bundleno = 490 (0x1ea), region = 47  ;;  %s1271_s14 = sshll.u32 (!%p337_p9), %s343_s5, 6 }
  0x3e   : > { %s1369_s6 = smul.u32 (!%p337_p9), 608, %s343_s5  ;;  %s1866_s17 = scalar_lea.vmem (!%p337_p9), [#allocation3], %s1271_s14 }
  0x40   : > { %s1769_s9 = scalar_lea.vmem (!%p337_p9), [#allocation2], %s1369_s6 }
  0x42   : > { %v1537_v12 = vmov 0   ;;  %v1494_v13 = vld [vmem:[%s1916_s0 + $0x4] ss:$12 sps:$4 sm:$0x3f]   ;;  %vm865_vm0 = vcmask 1045504   ;;  %vm861_vm1 = vcmask 359424  }
  0x43   : > { %953 = vmatprep.mubr.bf16.mxu1 %v1537_v12  ;;  %v1395_v14 = vld [vmem:[%s1769_s9 + $0xe4] ss:$16 sps:$4 sm:$0xff]   ;;  %910 = vmatprep.mubr.bf16.mxu0 %v1494_v13  ;;  %v1399_v16 = vld [vmem:[%s1769_s9 + $0xe0] ss:$16 sps:$4 sm:$0xff]   ;;  %v1418_v28 = vld [vmem:[%s1769_s9 + $0xec] ss:$16 sps:$4 sm:$0xff]  }
  0x44   : > { %v1397_v15 = vld [vmem:[%s1769_s9 + $0x244] ss:$16 sps:$4 sm:$0x3f]   ;;  %878 = vmatprep.subr.bf16.mxu0 %v1395_v14  ;;  %v1400_v17 = vld [vmem:[%s1769_s9 + $0x240] ss:$16 sps:$4 sm:$0x3f]  }
  0x45   : > { %1355 = vmatprep.subr.msk.bf16.mxu1 %vm865_vm0, %v1397_v15  ;;  %v1401_v18 = vld [vmem:[%s1769_s9 + $0xc4] ss:$16 sps:$4 sm:$0xff]   ;;  %879 = vmatpush1.bf16.msra.mxu0 %v1399_v16  ;;  %v867_v19 = vsel %vm865_vm0, %v1400_v17, 0  ;;  %v1405_v21 = vld [vmem:[%s1769_s9 + $0xc0] ss:$16 sps:$4 sm:$0xff]   ;;  %vm1063_vm2 = vcmask 1043456  }
  0x46   : > { %v1403_v20 = vld [vmem:[%s1769_s9 + $0x224] ss:$16 sps:$4 sm:$0xff]   ;;  %932 = vmatpush1.bf16.msra.mxu1 %v867_v19  ;;  %880 = vmatprep.subr.bf16.mxu0 %v1401_v18  ;;  %v1406_v22 = vld [vmem:[%s1769_s9 + $0x220] ss:$16 sps:$4 sm:$0xff]   ;;  %v1416_v30 = vld [vmem:[%s1769_s9 + $0xe8] ss:$16 sps:$4 sm:$0xff]  }
  0x47   : > { %933 = vmatprep.subr.bf16.mxu1 %v1403_v20  ;;  %v1407_v23 = vld [vmem:[%s1769_s9 + $0xa4] ss:$16 sps:$4 sm:$0xff]   ;;  %v1411_v25 = vld [vmem:[%s1769_s9 + $0xa0] ss:$16 sps:$4 sm:$0xff]   ;;  %v1424_v33 = vld [vmem:[%s1769_s9 + $0xcc] ss:$16 sps:$4 sm:$0xff]  }
  0x48   : > { %v1409_v24 = vld [vmem:[%s1769_s9 + $0x204] ss:$16 sps:$4 sm:$0xff]   ;;  %v1412_v26 = vld [vmem:[%s1769_s9 + $0x200] ss:$16 sps:$4 sm:$0xff]   ;;  %v1422_v34 = vld [vmem:[%s1769_s9 + $0xc8] ss:$16 sps:$4 sm:$0xff]  }
  0x49   : > { %881 = vmatpush1.bf16.msra.mxu0 %v1405_v21  ;;  %v1413_v27 = vld [vmem:[%s1769_s9 + $0x84] ss:$16 sps:$4 sm:$0xff]   ;;  %v1419_v31 = vld [vmem:[%s1769_s9 + $0x80] ss:$16 sps:$4 sm:$0xff]   ;;  %v1430_v37 = vld [vmem:[%s1769_s9 + $0xac] ss:$16 sps:$4 sm:$0xff]  }
  0x4a   : > { %934 = vmatpush1.bf16.msra.mxu1 %v1406_v22  ;;  %882 = vmatprep.subr.bf16.mxu0 %v1407_v23  ;;  %v1790_v29 = vld [vmem:[%s1916_s0 + $0x8] ss:$12 sps:$4 sm:$0x3f]   ;;  %v1425_v35 = vld [vmem:[%s1769_s9 + $0x60] ss:$16 sps:$4 sm:$0xff]   ;;  %s380_s15 = scalar_select %p379_p10, %s1579_s18, 3 }
  0x4b   : > { %935 = vmatprep.subr.bf16.mxu1 %v1409_v24  ;;  %v1420_v32 = vld [vmem:[%s1769_s9 + $0x64] ss:$16 sps:$4 sm:$0xff]   ;;  %v1428_v38 = vld [vmem:[%s1769_s9 + $0xa8] ss:$16 sps:$4 sm:$0xff]   ;;  %v1431_v39 = vld [vmem:[%s1769_s9 + $0x40] ss:$16 sps:$4 sm:$0xff]  }
  0x4c   : > { %v1426_v36 = vld [vmem:[%s1769_s9 + $0x44] ss:$16 sps:$4 sm:$0xff]   ;;  %v1436_v41 = vld [vmem:[%s1769_s9 + $0x8c] ss:$16 sps:$4 sm:$0xff]   ;;  %v1434_v42 = vld [vmem:[%s1769_s9 + $0x88] ss:$16 sps:$4 sm:$0xff]  }
  0x4d   : > { %883 = vmatpush1.bf16.msra.mxu0 %v1411_v25  ;;  %v1432_v40 = vld [vmem:[%s1769_s9 + $0x24] ss:$16 sps:$4 sm:$0xff]   ;;  %v1437_v43 = vld [vmem:[%s1769_s9 + $0x20] ss:$16 sps:$4 sm:$0xff]   ;;  %v1442_v45 = vld [vmem:[%s1769_s9 + $0x6c] ss:$16 sps:$4 sm:$0xff]  }
  0x4e   : > { %936 = vmatpush1.bf16.msra.mxu1 %v1412_v26  ;;  %884 = vmatprep.subr.bf16.mxu0 %v1413_v27  ;;  %v1438_v44 = vld [vmem:[%s1769_s9 + $0x4] ss:$16 sps:$4 sm:$0xff]   ;;  %v1440_v46 = vld [vmem:[%s1769_s9 + $0x68] ss:$16 sps:$4 sm:$0xff]   ;;  %v1443_v47 = vld [vmem:[%s1769_s9] ss:$16 sps:$4 sm:$0xff]  }
  0x4f   : > { %964 = vmatprep.subr.bf16.mxu1 %v1418_v28  ;;  %v1444_v48 = vld [vmem:[%s1769_s9 + $0x1e4] ss:$16 sps:$4 sm:$0xff]   ;;  %v1448_v49 = vld [vmem:[%s1769_s9 + $0x4c] ss:$16 sps:$4 sm:$0xff]   ;;  %v1446_v50 = vld [vmem:[%s1769_s9 + $0x48] ss:$16 sps:$4 sm:$0xff]  }
  0x50   : > { %v1449_v51 = vld [vmem:[%s1769_s9 + $0x1e0] ss:$16 sps:$4 sm:$0xff]   ;;  %v1450_v52 = vld [vmem:[%s1769_s9 + $0x1c4] ss:$16 sps:$4 sm:$0xff]   ;;  %v1454_v53 = vld [vmem:[%s1769_s9 + $0x2c] ss:$16 sps:$4 sm:$0xff]  }
  0x51   : > { %1356 = vmatmul.mubr.msk.bf16.vlgmr.msra.gmra.mxu1 %vm861_vm1, %v1790_v29  ;;  %885 = vmatpush1.bf16.msra.mxu0 %v1419_v31  ;;  %v1452_v54 = vld [vmem:[%s1769_s9 + $0x28] ss:$16 sps:$4 sm:$0xff]   ;;  %v1455_v55 = vld [vmem:[%s1769_s9 + $0x1c0] ss:$16 sps:$4 sm:$0xff]   ;;  %v1456_v56 = vld [vmem:[%s1769_s9 + $0x1a4] ss:$16 sps:$4 sm:$0xff]  }
  0x52   : > { %965 = vmatpush1.bf16.msra.mxu1 %v1416_v30  ;;  %886 = vmatprep.subr.bf16.mxu0 %v1420_v32  ;;  %v1460_v57 = vld [vmem:[%s1769_s9 + $0xc] ss:$16 sps:$4 sm:$0xff]   ;;  %v1458_v58 = vld [vmem:[%s1769_s9 + $0x8] ss:$16 sps:$4 sm:$0xff]   ;;  %v1461_v59 = vld [vmem:[%s1769_s9 + $0x1a0] ss:$16 sps:$4 sm:$0xff]  }
  0x53   : > { %966 = vmatprep.subr.bf16.mxu1 %v1424_v33  ;;  %996 = vmatprep.mubr.bf16.mxu1 %v1494_v13  ;;  %v1462_v60 = vld [vmem:[%s1769_s9 + $0x184] ss:$16 sps:$4 sm:$0xff]   ;;  %v1466_v61 = vld [vmem:[%s1769_s9 + $0x1ec] ss:$16 sps:$4 sm:$0xff]   ;;  %v1464_v62 = vld [vmem:[%s1769_s9 + $0x1e8] ss:$16 sps:$4 sm:$0xff]  }
  0x54   : > { %v1467_v63 = vld [vmem:[%s1769_s9 + $0x180] ss:$16 sps:$4 sm:$0xff]   ;;  %v1468_v0 = vld [vmem:[%s1769_s9 + $0x164] ss:$16 sps:$4 sm:$0xff]   ;;  %v1472_v2 = vld [vmem:[%s1769_s9 + $0x1cc] ss:$16 sps:$4 sm:$0xff]  }
  0x55   : > { %887 = vmatpush1.bf16.msra.mxu0 %v1425_v35  ;;  %v1500_v1 = vld [vmem:[%s1769_s9 + $0x248] ss:$16 sps:$4 sm:$0x3f]   ;;  %v1473_v5 = vld [vmem:[%s1769_s9 + $0x160] ss:$16 sps:$4 sm:$0xff]   ;;  %s1365_s20 = sshll.u32 %s380_s15, 4 }
  0x56   : > { %967 = vmatpush1.bf16.msra.mxu1 %v1422_v34  ;;  %888 = vmatprep.subr.bf16.mxu0 %v1426_v36  ;;  %v1470_v3 = vld [vmem:[%s1769_s9 + $0x1c8] ss:$16 sps:$4 sm:$0xff]   ;;  %v873_v4 = vsel %vm865_vm0, %v1500_v1, 0  ;;  %v1474_v6 = vld [vmem:[%s1769_s9 + $0x144] ss:$16 sps:$4 sm:$0xff]   ;;  %s383_s25 = scalar_lea.vmem %s1919_s3, %s1365_s20  ;;  %vm1073_vm3 = vcmask 7168   ;;  %s388_s28 = scalar_lea.vmem %s1920_s4, %s1365_s20 }
  0x57   : > { %968 = vmatprep.subr.bf16.mxu1 %v1430_v37  ;;  %v1478_v7 = vld [vmem:[%s1769_s9 + $0x1ac] ss:$16 sps:$4 sm:$0xff]   ;;  %v1479_v8 = vld [vmem:[%s1769_s9 + $0x140] ss:$16 sps:$4 sm:$0xff]   ;;  %v1476_v9 = vld [vmem:[%s1769_s9 + $0x1a8] ss:$16 sps:$4 sm:$0xff]  }
  0x58   : > { %v1480_v10 = vld [vmem:[%s1769_s9 + $0x124] ss:$16 sps:$4 sm:$0xff]   ;;  %v1484_v11 = vld [vmem:[%s1769_s9 + $0x18c] ss:$16 sps:$4 sm:$0xff]   ;;  %v1485_v13 = vld [vmem:[%s1769_s9 + $0x120] ss:$16 sps:$4 sm:$0xff]  }
  0x59   : > { %889 = vmatpush1.bf16.msra.mxu0 %v1431_v39  ;;  %v1482_v14 = vld [vmem:[%s1769_s9 + $0x188] ss:$16 sps:$4 sm:$0xff]   ;;  %v1486_v15 = vld [vmem:[%s1769_s9 + $0x104] ss:$16 sps:$4 sm:$0xff]   ;;  %v1490_v16 = vld [vmem:[%s1769_s9 + $0x16c] ss:$16 sps:$4 sm:$0xff]  }
  0x5a   : > { %969 = vmatpush1.bf16.msra.mxu1 %v1428_v38  ;;  %890 = vmatprep.subr.bf16.mxu0 %v1432_v40  ;;  %v1491_v17 = vld [vmem:[%s1769_s9 + $0x100] ss:$16 sps:$4 sm:$0xff]   ;;  %v1488_v18 = vld [vmem:[%s1769_s9 + $0x168] ss:$16 sps:$4 sm:$0xff]   ;;  %v1497_v20 = vld [vmem:[%s1769_s9 + $0x14c] ss:$16 sps:$4 sm:$0xff]  }
  0x5b   : > { %970 = vmatprep.subr.bf16.mxu1 %v1436_v41  ;;  %v1498_v19 = vld [vmem:[%s1769_s9 + $0x24c] ss:$16 sps:$4 sm:$0x3f]   ;;  %v1495_v22 = vld [vmem:[%s1769_s9 + $0x148] ss:$16 sps:$4 sm:$0xff]   ;;  %vm1075_vm4 = vcmask 3072  }
  0x5c   : > { %v1492_v21 = vld [vmem:[%s1916_s0] ss:$12 sps:$4 sm:$0x3f]   ;;  %v1504_v25 = vld [vmem:[%s1769_s9 + $0x228] ss:$16 sps:$4 sm:$0xff]   ;;  %s1367_s29 = sshll.u32 (%p1594_p5), %s1579_s18, 5 }
  0x5d   : > { %891 = vmatpush1.bf16.msra.mxu0 %v1437_v43  ;;  %v1506_v23 = vld [vmem:[%s1769_s9 + $0x22c] ss:$16 sps:$4 sm:$0xff]   ;;  %v1501_v26 = vld [vmem:[%s1769_s9 + $0x128] ss:$16 sps:$4 sm:$0xff]   ;;  %s1120_s6 = scalar_lea.vmem (%p1594_p5), %s1918_s2, %s1367_s29 }
  0x5e   : > { %971 = vmatpush1.bf16.msra.mxu1 %v1434_v42  ;;  %892 = vmatprep.subr.bf16.mxu0 %v1438_v44  ;;  %v1503_v24 = vld [vmem:[%s1769_s9 + $0x12c] ss:$16 sps:$4 sm:$0xff]   ;;  %v1510_v30 = vld [vmem:[%s1769_s9 + $0x208] ss:$16 sps:$4 sm:$0xff]  }
  0x5f   : > { %972 = vmatprep.subr.bf16.mxu1 %v1442_v45  ;;  %v1512_v27 = vld [vmem:[%s1769_s9 + $0x20c] ss:$16 sps:$4 sm:$0xff]   ;;  %v1507_v31 = vld [vmem:[%s1769_s9 + $0x108] ss:$16 sps:$4 sm:$0xff]  }
  0x60   : > { %v1509_v28 = vld [vmem:[%s1769_s9 + $0x10c] ss:$16 sps:$4 sm:$0xff]  }
  0x61   : > { %893 = vmatpush1.bf16.msra.mxu0 %v1443_v47 }
  0x62   : > { %973 = vmatpush1.bf16.msra.mxu1 %v1440_v46  ;;  %894 = vmatprep.subr.bf16.mxu0 %v1444_v48 }
  0x63   : > { %974 = vmatprep.subr.bf16.mxu1 %v1448_v49 }
  0x65   : > { %895 = vmatpush2.bf16.msra.mxu0 %v1449_v51 }
  0x66   : > { %975 = vmatpush1.bf16.msra.mxu1 %v1446_v50  ;;  %896 = vmatprep.subr.bf16.mxu0 %v1450_v52 }
  0x67   : > { %976 = vmatprep.subr.bf16.mxu1 %v1454_v53 }
  0x69   : > { %897 = vmatpush2.bf16.msra.mxu0 %v1455_v55 }
  0x6a   : > { %977 = vmatpush1.bf16.msra.mxu1 %v1452_v54  ;;  %898 = vmatprep.subr.bf16.mxu0 %v1456_v56 }
  0x6b   : > { %978 = vmatprep.subr.bf16.mxu1 %v1460_v57 }
  0x6d   : > { %899 = vmatpush2.bf16.msra.mxu0 %v1461_v59 }
  0x6e   : > { %979 = vmatpush1.bf16.msra.mxu1 %v1458_v58  ;;  %900 = vmatprep.subr.bf16.mxu0 %v1462_v60 }
  0x6f   : > { %980 = vmatprep.subr.bf16.mxu1 %v1466_v61 }
  0x71   : > { %901 = vmatpush2.bf16.msra.mxu0 %v1467_v63 }
  0x72   : > { %981 = vmatpush2.bf16.msra.mxu1 %v1464_v62  ;;  %902 = vmatprep.subr.bf16.mxu0 %v1468_v0 }
  0x73   : > { %982 = vmatprep.subr.bf16.mxu1 %v1472_v2 }
  0x75   : > { %903 = vmatpush2.bf16.msra.mxu0 %v1473_v5 }
  0x76   : > { %983 = vmatpush2.bf16.msra.mxu1 %v1470_v3  ;;  %904 = vmatprep.subr.bf16.mxu0 %v1474_v6 }
  0x77   : > { %984 = vmatprep.subr.bf16.mxu1 %v1478_v7 }
  0x79   : > { %905 = vmatpush2.bf16.msra.mxu0 %v1479_v8 }
  0x7a   : > { %985 = vmatpush2.bf16.msra.mxu1 %v1476_v9  ;;  %906 = vmatprep.subr.bf16.mxu0 %v1480_v10 }
  0x7b   : > { %986 = vmatprep.subr.bf16.mxu1 %v1484_v11 }
  0x7d   : > { %907 = vmatpush2.bf16.msra.mxu0 %v1485_v13 }
  0x7e   : > { %987 = vmatpush2.bf16.msra.mxu1 %v1482_v14  ;;  %908 = vmatprep.subr.bf16.mxu0 %v1486_v15 }
  0x7f   : > { %988 = vmatprep.subr.bf16.mxu1 %v1490_v16 }
  0x81   : > { %909 = vmatpush2.bf16.msra.mxu0 %v1491_v17 }
  0x82   : > { %989 = vmatpush2.bf16.msra.mxu1 %v1488_v18  ;;  %1357 = vmatprep.subr.msk.bf16.mxu0 %vm865_vm0, %v1498_v19 }
  0x83   : > { %990 = vmatprep.subr.bf16.mxu1 %v1497_v20 }
  0x84   : > { %911 = vmatmul.mubr.bf16.vlgmr.msra.gmra.mxu0 %v1492_v21 }
  0x85   : > { %1018 = vmatpush1.bf16.msra.mxu0 %v873_v4  ;;  %1039 = vmatprep.mubr.bf16.mxu0 %v1537_v12 }
  0x86   : > { %991 = vmatpush2.bf16.msra.mxu1 %v1495_v22  ;;  %1019 = vmatprep.subr.bf16.mxu0 %v1506_v23 }
  0x87   : > { %992 = vmatprep.subr.bf16.mxu1 %v1503_v24 }
  0x89   : > { %1020 = vmatpush1.bf16.msra.mxu0 %v1504_v25 }
  0x8a   : > { %993 = vmatpush2.bf16.msra.mxu1 %v1501_v26  ;;  %1021 = vmatprep.subr.bf16.mxu0 %v1512_v27 }
  0x8b   : > { %994 = vmatprep.subr.bf16.mxu1 %v1509_v28 }
  0x8d   : > { %1022 = vmatpush1.bf16.msra.mxu0 %v1510_v30 }
  0x8e   : > { %995 = vmatpush2.bf16.msra.mxu1 %v1507_v31 }
  0x90   : > { %1358 = vmatmul.mubr.msk.bf16.vlgmr.msra.gmra.mxu0 %vm861_vm1, %v1790_v29 }
  0x91   : > { %997 = vmatmul.mubr.bf16.vlgmr.msra.gmra.mxu1 %v1492_v21 }
 0x111   : > { %v955_v12 = vpop.f32.mrf.mxu1 }
 0x113   : > { %v957_v32 = vpop.f32.mrf.mxu1 }
 0x115   : > { %v959_v35 = vpop.f32.mrf.mxu1 }
 0x117   : > { %v961_v39 = vpop.f32.mrf.mxu1 }
 0x144   : > { %v912_v33 = vpop.f32.mrf.mxu0 }
 0x145   : > { %v956_v34 = vadd.f32 %v955_v12, %v912_v33 }
 0x146   : > { %v914_v36 = vpop.f32.mrf.mxu0 }
 0x147   : > { %1050 = vst [vmem:[%s1866_s17] sm:$0xff] %v956_v34  ;;  %v958_v37 = vadd.f32 %v957_v32, %v914_v36  ;;  %v1077_v44 = vmul.f32 %v956_v34, %v956_v34 }
 0x148   : > { %v916_v38 = vpop.f32.mrf.mxu0 }
 0x149   : > { %1051 = vst [vmem:[%s1866_s17 + $0x8] sm:$0xff] %v958_v37  ;;  %v960_v29 = vadd.f32 %v959_v35, %v916_v38  ;;  %v1078_v42 = vmul.f32 %v958_v37, %v958_v37  ;;  %v1058_v49 = vadd.f32 %v958_v37, %v956_v34 }
 0x14a   : > { %v918_v40 = vpop.f32.mrf.mxu0 }
 0x14b   : > { %1054 = vst [vmem:[%s1866_s17 + $0x20] sm:$0xf] %v960_v29  ;;  %v962_v41 = vadd.f32 %v961_v39, %v918_v40  ;;  %v1081_v50 = vmul.f32 %v960_v29, %v960_v29  ;;  %v1085_v52 = vadd.f32 %v1078_v42, %v1077_v44  ;;  %v1064_v58 = vsel %vm1063_vm2, %v960_v29, 0.0 }
 0x14d   : > { %1055 = vst [vmem:[%s1866_s17 + $0x28] sm:$0xf] %v962_v41  ;;  %v1082_v45 = vmul.f32 %v962_v41, %v962_v41  ;;  %v1065_v53 = vsel %vm1063_vm2, %v962_v41, 0.0  ;;  %v1090_v4 = vsel %vm1063_vm2, %v1081_v50, 0.0 }
 0x14e   : > { %v1066_v3 = vadd.f32 %v1065_v53, %v1064_v58  ;;  %v1133_v23 = vld [vmem:[%s1866_s17] sm:$0xff] (%p1594_p5) }
 0x14f   : > { %v1091_v60 = vsel %vm1063_vm2, %v1082_v45, 0.0  ;;  %1134 = vst [vmem:[%s1120_s6] sm:$0xff] (%p1594_p5), %v1133_v23 }
 0x150   : > { %v1041_v43 = vpop.f32.mrf.mxu0  ;;  %v1092_v10 = vadd.f32 %v1091_v60, %v1090_v4  ;;  %v1135_v24 = vld [vmem:[%s1866_s17 + $0x8] sm:$0xff] (%p1594_p5) }
 0x151   : > { %v998_v46 = vpop.f32.mrf.mxu1  ;;  %1136 = vst [vmem:[%s1120_s6 + $0x8] sm:$0xff] (%p1594_p5), %v1135_v24 }
 0x152   : > { %v1042_v47 = vadd.f32 %v1041_v43, %v998_v46  ;;  %v1043_v48 = vpop.f32.mrf.mxu0  ;;  %v1141_v27 = vld [vmem:[%s1866_s17 + $0x20] sm:$0xff] (%p1594_p5) }
 0x153   : > { %v1000_v51 = vpop.f32.mrf.mxu1  ;;  %1142 = vst [vmem:[%s1120_s6 + $0x80] sm:$0xff] (%p1594_p5), %v1141_v27 }
 0x154   : > { %1052 = vst [vmem:[%s1866_s17 + $0x10] sm:$0xff] %v1042_v47  ;;  %v1044_v54 = vadd.f32 %v1043_v48, %v1000_v51  ;;  %v1045_v55 = vpop.f32.mrf.mxu0  ;;  %v1059_v56 = vadd.f32 %v1058_v49, %v1042_v47  ;;  %v1079_v57 = vmul.f32 %v1042_v47, %v1042_v47  ;;  %v1143_v28 = vld [vmem:[%s1866_s17 + $0x28] sm:$0xff] (%p1594_p5) }
 0x155   : > { %v1002_v59 = vpop.f32.mrf.mxu1  ;;  %1144 = vst [vmem:[%s1120_s6 + $0x88] sm:$0xff] (%p1594_p5), %v1143_v28 }
 0x156   : > { %1053 = vst [vmem:[%s1866_s17 + $0x18] sm:$0xff] %v1044_v54  ;;  %v1046_v61 = vadd.f32 %v1045_v55, %v1002_v59  ;;  %v1047_v62 = vpop.f32.mrf.mxu0  ;;  %v1060_v63 = vadd.f32 %v1059_v56, %v1044_v54  ;;  %v1080_v0 = vmul.f32 %v1044_v54, %v1044_v54  ;;  %v1086_v1 = vadd.f32 %v1085_v52, %v1079_v57 }
 0x157   : > { %v1004_v2 = vpop.f32.mrf.mxu1 }
 0x158   : > { %1056 = vst [vmem:[%s1866_s17 + $0x30] sm:$0xf] %v1046_v61  ;;  %v1083_v5 = vmul.f32 %v1046_v61, %v1046_v61  ;;  %v1048_v6 = vadd.f32 %v1047_v62, %v1004_v2  ;;  %1061 = vadd.xlane.f32.xlu0 %v1060_v63  ;;  %v1087_v7 = vadd.f32 %v1086_v1, %v1080_v0  ;;  %v1067_v8 = vsel %vm1063_vm2, %v1046_v61, 0.0 }
 0x159   : > { %v1068_v9 = vadd.f32 %v1067_v8, %v1066_v3 }
 0x15a   : > { %1057 = vst [vmem:[%s1866_s17 + $0x38] sm:$0xf] %v1048_v6  ;;  %1088 = vadd.xlane.f32.xlu1 %v1087_v7  ;;  %v1069_v11 = vsel %vm1063_vm2, %v1048_v6, 0.0  ;;  %v1084_v13 = vmul.f32 %v1048_v6, %v1048_v6  ;;  %v1093_v14 = vsel %vm1063_vm2, %v1083_v5, 0.0 }
 0x15b   : > { %v1070_v15 = vadd.f32 %v1069_v11, %v1068_v9  ;;  %v1094_v16 = vadd.f32 %v1093_v14, %v1092_v10  ;;  %v1137_v25 = vld [vmem:[%s1866_s17 + $0x10] sm:$0xff] (%p1594_p5) }
 0x15c   : > { %v1095_v17 = vsel %vm1063_vm2, %v1084_v13, 0.0  ;;  %1138 = vst [vmem:[%s1120_s6 + $0x10] sm:$0xff] (%p1594_p5), %v1137_v25 }
 0x15d   : > { %1071 = vadd.xlane.f32.xlu0 %v1070_v15  ;;  %v1096_v18 = vadd.f32 %v1095_v17, %v1094_v16  ;;  %v1139_v26 = vld [vmem:[%s1866_s17 + $0x18] sm:$0xff] (%p1594_p5) }
 0x15e   : > { %1140 = vst [vmem:[%s1120_s6 + $0x18] sm:$0xff] (%p1594_p5), %v1139_v26 }
 0x15f   : > { %1097 = vadd.xlane.f32.xlu1 %v1096_v18  ;;  %v1145_v30 = vld [vmem:[%s1866_s17 + $0x30] sm:$0xff] (%p1594_p5) }
 0x160   : > { %1146 = vst [vmem:[%s1120_s6 + $0x90] sm:$0xff] (%p1594_p5), %v1145_v30 }
 0x161   : > { %v1147_v31 = vld [vmem:[%s1866_s17 + $0x38] sm:$0xff] (%p1594_p5) }
 0x162   : > { %1148 = vst [vmem:[%s1120_s6 + $0x98] sm:$0xff] (%p1594_p5), %v1147_v31 }
 0x1e1   : > { %v1062_v19 = vpop.xlane.xlu0 %1061 }
 0x1e2   : > { %1074 = vst.msk [vmem:[%s383_s25] sm:$0xff] %vm1073_vm3, %v1062_v19 }
 0x1e3   : > { %v1089_v20 = vpop.xlane.xlu1 %1088 }
 0x1e4   : > { %1099 = vst.msk [vmem:[%s388_s28] sm:$0xff] %vm1073_vm3, %v1089_v20 }
 0x1e5   : > { %1117 = sbr.rel (!%p1594_p5) target bundleno = 490 (0x1ea), region = 55 }
 0x1e6   : > { %v1072_v21 = vpop.xlane.xlu0 %1071 }
 0x1e7   : > { %1076 = vst.msk [vmem:[%s383_s25 + $0x8] sm:$0xf] %vm1075_vm4, %v1072_v21 }
 0x1e8   : > { %v1098_v22 = vpop.xlane.xlu1 %1097 }
 0x1e9   : > { %1100 = vst.msk [vmem:[%s388_s28 + $0x8] sm:$0xf] %vm1075_vm4, %v1098_v22 }
 0x1ea PF: > { %p12_p11 = scmp.ge.s32.totalorder %s1582_s19, 6   ;;  %s1922_s15 = smov %s1531_s16 }
 0x1eb   : > { %s1923_s16 = smov %s1592_s22  ;;  %s1924_s17 = smov %s1582_s19 }
 0x1ec   :  { %14 = sbr.rel (!%p12_p11) target bundleno = 2 (0x2), region = 133 }

// kernel: network_forward.12
= control target key start
LH: loop header
LB: loop body
LE: loop exit
PB: predicated region body
PF: predicated region fallthrough
CT: control target
= control target key end

     0   :  { %v214_v0 = vmov 0   ;;  %s400_s5 = inlined_call_operand.vmem [shape: f32[12,1], index: 5, kind: input, shape index: {}]   ;;  %s401_s4 = inlined_call_operand.vmem [shape: f32[12,1], index: 4, kind: input, shape index: {}]   ;;  %s402_s0 = inlined_call_operand.vmem [shape: f32[12,512], index: 0, kind: input, shape index: {}]   ;;  %s403_s1 = inlined_call_operand.vmem [shape: f32[12,512], index: 1, kind: input, shape index: {}]   ;;  %s404_s2 = inlined_call_operand.vmem [shape: f32[12,512], index: 2, kind: input, shape index: {}]   ;;  %s405_s3 = inlined_call_operand.vmem [shape: f32[12,512], index: 3, kind: input, shape index: {}]   ;;  %s406_s6 = inlined_call_operand.vmem [shape: f32[12,512], index: 6, kind: output, shape index: {}]  }
   0x1   :  { %213 = vset.pattern.permute.xlu1 %v214_v0  ;;  %212 = vset.pattern.permute.xlu0 %v214_v0  ;;  %v25_v1 = vld [vmem:[%s400_s5] sm:$0xff]  ;;  %v26_v3 = vld [vmem:[%s400_s5 + $0x8] sm:$0xf]  ;;  %v29_v7 = vld [vmem:[%s402_s0 + $0x10] sm:$0xff] }
   0x2   :  { %v23_v2 = vld [vmem:[%s401_s4] sm:$0xff]  ;;  %55 = vperm.xlu1 %213, %v25_v1   ;;  %v24_v4 = vld [vmem:[%s401_s4 + $0x8] sm:$0xf]  ;;  %v30_v8 = vld [vmem:[%s402_s0 + $0x18] sm:$0xff] }
   0x3   :  { %37 = vperm.xlu0 %212, %v23_v2   ;;  %v27_v5 = vld [vmem:[%s402_s0] sm:$0xff]  ;;  %v28_v6 = vld [vmem:[%s402_s0 + $0x8] sm:$0xff]  ;;  %v81_v11 = vld [vmem:[%s403_s1 + $0x10] sm:$0xff] }
   0x4   :  { %v79_v9 = vld [vmem:[%s403_s1] sm:$0xff]  ;;  %v80_v10 = vld [vmem:[%s403_s1 + $0x8] sm:$0xff]  ;;  %v82_v12 = vld [vmem:[%s403_s1 + $0x18] sm:$0xff] }
   0x5   :  { %v111_v27 = vld [vmem:[%s404_s2] sm:$0xff]  ;;  %v112_v28 = vld [vmem:[%s404_s2 + $0x8] sm:$0xff]  ;;  %v113_v29 = vld [vmem:[%s404_s2 + $0x10] sm:$0xff] }
   0x6   :  { %60 = vperm.xlu1 %213, %v26_v3   ;;  %v114_v34 = vld [vmem:[%s404_s2 + $0x18] sm:$0xff]  ;;  %v143_v35 = vld [vmem:[%s405_s3] sm:$0xff]  ;;  %v144_v36 = vld [vmem:[%s405_s3 + $0x8] sm:$0xff] }
   0x7   :  { %42 = vperm.xlu0 %212, %v24_v4   ;;  %v145_v41 = vld [vmem:[%s405_s3 + $0x10] sm:$0xff]  ;;  %v146_v42 = vld [vmem:[%s405_s3 + $0x18] sm:$0xff]  ;;  %v31_v63 = vld [vmem:[%s402_s0 + $0x20] sm:$0xf] }
   0x8   :  { %v32_v0 = vld [vmem:[%s402_s0 + $0x28] sm:$0xf] }
  0x7d   :  { %v56_v18 = vpop.permute.xlu1 %55 }
  0x7e   :  { %v38_v13 = vpop.permute.xlu0 %37 }
  0x7f   :  { %v45_v14 = vmul.f32 %v38_v13, %v27_v5  ;;  %v46_v15 = vmul.f32 %v38_v13, %v28_v6  ;;  %v47_v16 = vmul.f32 %v38_v13, %v29_v7  ;;  %v48_v17 = vmul.f32 %v38_v13, %v30_v8  ;;  %v33_v5 = vld [vmem:[%s402_s0 + $0x30] sm:$0xf] }
  0x80   :  { %v87_v19 = vmul.f32 %v79_v9, %v38_v13  ;;  %v88_v20 = vmul.f32 %v80_v10, %v38_v13  ;;  %v89_v21 = vmul.f32 %v81_v11, %v38_v13  ;;  %v90_v22 = vmul.f32 %v82_v12, %v38_v13  ;;  %v34_v11 = vld [vmem:[%s402_s0 + $0x38] sm:$0xf] }
  0x81   :  { %v63_v23 = vadd.f32 %v56_v18, %v45_v14  ;;  %v64_v24 = vadd.f32 %v56_v18, %v46_v15  ;;  %v65_v25 = vadd.f32 %v56_v18, %v47_v16  ;;  %v66_v26 = vadd.f32 %v56_v18, %v48_v17 }
  0x82   :  { %v95_v30 = vadd.f32 %v87_v19, %v56_v18  ;;  %v96_v31 = vadd.f32 %v88_v20, %v56_v18  ;;  %v97_v32 = vadd.f32 %v89_v21, %v56_v18  ;;  %v98_v33 = vadd.f32 %v90_v22, %v56_v18  ;;  %v319_v10 = vpop.permute.xlu0 %42  ;;  %v83_v20 = vld [vmem:[%s403_s1 + $0x20] sm:$0xf] }
  0x83   :  { %v71_v37 = vmax.f32 %v63_v23, 0.0  ;;  %v72_v38 = vmax.f32 %v64_v24, 0.0  ;;  %v73_v39 = vmax.f32 %v65_v25, 0.0  ;;  %v74_v40 = vmax.f32 %v66_v26, 0.0  ;;  %v84_v25 = vld [vmem:[%s403_s1 + $0x28] sm:$0xf] }
  0x84   :  { %v103_v43 = vmax.f32 %v95_v30, 0.0  ;;  %v104_v44 = vmax.f32 %v96_v31, 0.0  ;;  %v105_v45 = vmax.f32 %v97_v32, 0.0  ;;  %v106_v46 = vmax.f32 %v98_v33, 0.0  ;;  %v85_v26 = vld [vmem:[%s403_s1 + $0x30] sm:$0xf]  ;;  %v61_v32 = vpop.permute.xlu1 %60 }
  0x85   :  { %v119_v47 = vmul.f32 %v111_v27, %v38_v13  ;;  %v120_v48 = vmul.f32 %v112_v28, %v38_v13  ;;  %v121_v49 = vmul.f32 %v113_v29, %v38_v13  ;;  %v122_v50 = vmul.f32 %v114_v34, %v38_v13  ;;  %v86_v27 = vld [vmem:[%s403_s1 + $0x38] sm:$0xf] }
  0x86   :  { %v151_v51 = vmul.f32 %v143_v35, %v38_v13  ;;  %v152_v52 = vmul.f32 %v144_v36, %v38_v13  ;;  %v153_v53 = vmul.f32 %v145_v41, %v38_v13  ;;  %v154_v54 = vmul.f32 %v146_v42, %v38_v13  ;;  %v116_v42 = vld [vmem:[%s404_s2 + $0x28] sm:$0xf] }
  0x87   :  { %v127_v55 = vadd.f32 %v119_v47, %v56_v18  ;;  %v128_v56 = vadd.f32 %v120_v48, %v56_v18  ;;  %v129_v57 = vadd.f32 %v121_v49, %v56_v18  ;;  %v130_v58 = vadd.f32 %v122_v50, %v56_v18 }
  0x88   :  { %v159_v59 = vadd.f32 %v151_v51, %v56_v18  ;;  %v160_v60 = vadd.f32 %v152_v52, %v56_v18  ;;  %v161_v61 = vadd.f32 %v153_v53, %v56_v18  ;;  %v162_v62 = vadd.f32 %v154_v54, %v56_v18  ;;  %v147_v53 = vld [vmem:[%s405_s3 + $0x20] sm:$0xf] }
  0x89   :  { %v135_v1 = vmax.f32 %v127_v55, 0.0  ;;  %v136_v2 = vmax.f32 %v128_v56, 0.0  ;;  %v137_v3 = vmax.f32 %v129_v57, 0.0  ;;  %v138_v4 = vmax.f32 %v130_v58, 0.0  ;;  %v148_v58 = vld [vmem:[%s405_s3 + $0x28] sm:$0xf] }
  0x8a   :  { %v167_v6 = vmax.f32 %v159_v59, 0.0  ;;  %v168_v7 = vmax.f32 %v160_v60, 0.0  ;;  %v169_v8 = vmax.f32 %v161_v61, 0.0  ;;  %v170_v9 = vmax.f32 %v162_v62, 0.0  ;;  %v149_v59 = vld [vmem:[%s405_s3 + $0x30] sm:$0xf] }
  0x8b   :  { %v175_v12 = vmax.f32 %v71_v37, %v103_v43  ;;  %v176_v13 = vmax.f32 %v72_v38, %v104_v44  ;;  %v177_v14 = vmax.f32 %v73_v39, %v105_v45  ;;  %v178_v15 = vmax.f32 %v74_v40, %v106_v46  ;;  %v115_v37 = vld [vmem:[%s404_s2 + $0x20] sm:$0xf]  ;;  %v117_v43 = vld [vmem:[%s404_s2 + $0x30] sm:$0xf]  ;;  %v118_v44 = vld [vmem:[%s404_s2 + $0x38] sm:$0xf] }
  0x8c   :  { %v183_v16 = vmax.f32 %v135_v1, %v167_v6  ;;  %v184_v17 = vmax.f32 %v136_v2, %v168_v7  ;;  %v185_v18 = vmax.f32 %v137_v3, %v169_v8  ;;  %v186_v19 = vmax.f32 %v138_v4, %v170_v9  ;;  %v150_v60 = vld [vmem:[%s405_s3 + $0x38] sm:$0xf] }
  0x8d   :  { %v49_v21 = vmul.f32 %v319_v10, %v31_v63  ;;  %v50_v22 = vmul.f32 %v319_v10, %v32_v0  ;;  %v51_v23 = vmul.f32 %v319_v10, %v33_v5  ;;  %v52_v24 = vmul.f32 %v319_v10, %v34_v11 }
  0x8e   :  { %v191_v28 = vmax.f32 %v175_v12, %v183_v16  ;;  %v192_v29 = vmax.f32 %v176_v13, %v184_v17  ;;  %v193_v30 = vmax.f32 %v177_v14, %v185_v18  ;;  %v194_v31 = vmax.f32 %v178_v15, %v186_v19 }
  0x8f   :  { %v67_v33 = vadd.f32 %v61_v32, %v49_v21  ;;  %v68_v34 = vadd.f32 %v61_v32, %v50_v22  ;;  %v69_v35 = vadd.f32 %v61_v32, %v51_v23  ;;  %v70_v36 = vadd.f32 %v61_v32, %v52_v24 }
  0x90   :  { %199 = vst [vmem:[%s406_s6] sm:$0xff] %v191_v28  ;;  %200 = vst [vmem:[%s406_s6 + $0x8] sm:$0xff] %v192_v29  ;;  %v91_v38 = vmul.f32 %v83_v20, %v319_v10  ;;  %v92_v39 = vmul.f32 %v84_v25, %v319_v10  ;;  %v93_v40 = vmul.f32 %v85_v26, %v319_v10 }
  0x91   :  { %201 = vst [vmem:[%s406_s6 + $0x10] sm:$0xff] %v193_v30  ;;  %202 = vst [vmem:[%s406_s6 + $0x18] sm:$0xff] %v194_v31  ;;  %v94_v41 = vmul.f32 %v86_v27, %v319_v10  ;;  %v75_v45 = vmax.f32 %v67_v33, 0.0  ;;  %v76_v46 = vmax.f32 %v68_v34, 0.0  ;;  %v77_v47 = vmax.f32 %v69_v35, 0.0 }
  0x92   :  { %v78_v48 = vmax.f32 %v70_v36, 0.0  ;;  %v99_v49 = vadd.f32 %v91_v38, %v61_v32  ;;  %v100_v50 = vadd.f32 %v92_v39, %v61_v32  ;;  %v101_v51 = vadd.f32 %v93_v40, %v61_v32 }
  0x93   :  { %v102_v52 = vadd.f32 %v94_v41, %v61_v32  ;;  %v123_v54 = vmul.f32 %v115_v37, %v319_v10  ;;  %v124_v55 = vmul.f32 %v116_v42, %v319_v10  ;;  %v125_v56 = vmul.f32 %v117_v43, %v319_v10 }
  0x94   :  { %v126_v57 = vmul.f32 %v118_v44, %v319_v10  ;;  %v107_v61 = vmax.f32 %v99_v49, 0.0  ;;  %v108_v62 = vmax.f32 %v100_v50, 0.0  ;;  %v109_v63 = vmax.f32 %v101_v51, 0.0 }
  0x95   :  { %v110_v0 = vmax.f32 %v102_v52, 0.0  ;;  %v131_v1 = vadd.f32 %v123_v54, %v61_v32  ;;  %v132_v2 = vadd.f32 %v124_v55, %v61_v32  ;;  %v133_v3 = vadd.f32 %v125_v56, %v61_v32 }
  0x96   :  { %v134_v4 = vadd.f32 %v126_v57, %v61_v32  ;;  %v155_v5 = vmul.f32 %v147_v53, %v319_v10  ;;  %v156_v6 = vmul.f32 %v148_v58, %v319_v10  ;;  %v157_v7 = vmul.f32 %v149_v59, %v319_v10 }
  0x97   :  { %v158_v8 = vmul.f32 %v150_v60, %v319_v10  ;;  %v139_v9 = vmax.f32 %v131_v1, 0.0  ;;  %v140_v11 = vmax.f32 %v132_v2, 0.0  ;;  %v141_v12 = vmax.f32 %v133_v3, 0.0 }
  0x98   :  { %v142_v13 = vmax.f32 %v134_v4, 0.0  ;;  %v163_v14 = vadd.f32 %v155_v5, %v61_v32  ;;  %v164_v15 = vadd.f32 %v156_v6, %v61_v32  ;;  %v165_v16 = vadd.f32 %v157_v7, %v61_v32 }
  0x99   :  { %v166_v17 = vadd.f32 %v158_v8, %v61_v32  ;;  %v179_v18 = vmax.f32 %v75_v45, %v107_v61  ;;  %v180_v19 = vmax.f32 %v76_v46, %v108_v62  ;;  %v181_v20 = vmax.f32 %v77_v47, %v109_v63 }
  0x9a   :  { %v182_v21 = vmax.f32 %v78_v48, %v110_v0  ;;  %v171_v22 = vmax.f32 %v163_v14, 0.0  ;;  %v172_v23 = vmax.f32 %v164_v15, 0.0  ;;  %v173_v24 = vmax.f32 %v165_v16, 0.0 }
  0x9b   :  { %v174_v25 = vmax.f32 %v166_v17, 0.0 }
  0x9c   :  { %v187_v26 = vmax.f32 %v139_v9, %v171_v22  ;;  %v188_v27 = vmax.f32 %v140_v11, %v172_v23  ;;  %v189_v28 = vmax.f32 %v141_v12, %v173_v24 }
  0x9d   :  { %v190_v10 = vmax.f32 %v142_v13, %v174_v25 }
  0x9e   :  { %v195_v29 = vmax.f32 %v179_v18, %v187_v26  ;;  %v196_v30 = vmax.f32 %v180_v19, %v188_v27  ;;  %v197_v31 = vmax.f32 %v181_v20, %v189_v28 }
  0x9f   :  { %v198_v33 = vmax.f32 %v182_v21, %v190_v10 }
  0xa0   :  { %203 = vst [vmem:[%s406_s6 + $0x20] sm:$0xf] %v195_v29  ;;  %204 = vst [vmem:[%s406_s6 + $0x28] sm:$0xf] %v196_v30 }
  0xa1   :  { %205 = vst [vmem:[%s406_s6 + $0x30] sm:$0xf] %v197_v31  ;;  %206 = vst [vmem:[%s406_s6 + $0x38] sm:$0xf] %v198_v33 }

// kernel: network_forward.14
= control target key start
LH: loop header
LB: loop body
LE: loop exit
PB: predicated region body
PF: predicated region fallthrough
CT: control target
= control target key end

     0   :  { %v102_v0 = vmov 0   ;;  %s195_s1 = inlined_call_operand.vmem [shape: f32[24,1], index: 1, kind: input, shape index: {}]   ;;  %s196_s2 = inlined_call_operand.vmem [shape: f32[24,1], index: 2, kind: input, shape index: {}]   ;;  %s197_s0 = inlined_call_operand.vmem [shape: f32[24,384], index: 0, kind: input, shape index: {}]   ;;  %s198_s3 = inlined_call_operand.vmem [shape: f32[24,384], index: 3, kind: output, shape index: {}]  }
   0x1   :  { %101 = vset.pattern.permute.xlu1 %v102_v0  ;;  %100 = vset.pattern.permute.xlu0 %v102_v0  ;;  %v25_v1 = vld [vmem:[%s195_s1 + $0x10] sm:$0xff]  ;;  %v23_v2 = vld [vmem:[%s195_s1] sm:$0xff]  ;;  %v24_v4 = vld [vmem:[%s195_s1 + $0x8] sm:$0xff] }
   0x2   :  { %38 = vperm.xlu1 %101, %v25_v1   ;;  %28 = vperm.xlu0 %100, %v23_v2   ;;  %v50_v3 = vld [vmem:[%s196_s2] sm:$0xff]  ;;  %v52_v5 = vld [vmem:[%s196_s2 + $0x10] sm:$0xff]  ;;  %v51_v6 = vld [vmem:[%s196_s2 + $0x8] sm:$0xff] }
   0x3   :  { %v14_v9 = vld [vmem:[%s197_s0] sm:$0xff]  ;;  %v15_v10 = vld [vmem:[%s197_s0 + $0x8] sm:$0xff]  ;;  %v16_v11 = vld [vmem:[%s197_s0 + $0x10] sm:$0xff] }
   0x4   :  { %v20_v12 = vld [vmem:[%s197_s0 + $0x30] sm:$0xff]  ;;  %v21_v13 = vld [vmem:[%s197_s0 + $0x38] sm:$0xff]  ;;  %v22_v14 = vld [vmem:[%s197_s0 + $0x40] sm:$0xff] }
   0x5   :  { %v17_v20 = vld [vmem:[%s197_s0 + $0x18] sm:$0xff]  ;;  %v18_v24 = vld [vmem:[%s197_s0 + $0x20] sm:$0xff]  ;;  %v19_v25 = vld [vmem:[%s197_s0 + $0x28] sm:$0xff] }
   0x6   :  { %55 = vperm.xlu1 %101, %v50_v3   ;;  %33 = vperm.xlu0 %100, %v24_v4  }
   0xa   :  { %65 = vperm.xlu1 %101, %v52_v5   ;;  %60 = vperm.xlu0 %100, %v51_v6  }
  0x7d   :  { %v39_v7 = vpop.permute.xlu1 %38  ;;  %v29_v8 = vpop.permute.xlu0 %28 }
  0x7e   :  { %v41_v15 = vmul.f32 %v29_v8, %v14_v9  ;;  %v42_v16 = vmul.f32 %v29_v8, %v15_v10  ;;  %v43_v17 = vmul.f32 %v29_v8, %v16_v11  ;;  %v47_v26 = vmul.f32 %v39_v7, %v20_v12 }
  0x7f   :  { %v48_v27 = vmul.f32 %v39_v7, %v21_v13  ;;  %v49_v28 = vmul.f32 %v39_v7, %v22_v14 }
  0x81   :  { %v56_v18 = vpop.permute.xlu1 %55  ;;  %v34_v19 = vpop.permute.xlu0 %33 }
  0x82   :  { %v68_v21 = vadd.f32 %v56_v18, %v41_v15  ;;  %v69_v22 = vadd.f32 %v56_v18, %v42_v16  ;;  %v70_v23 = vadd.f32 %v56_v18, %v43_v17  ;;  %v44_v32 = vmul.f32 %v34_v19, %v17_v20 }
  0x83   :  { %v45_v33 = vmul.f32 %v34_v19, %v18_v24  ;;  %v46_v34 = vmul.f32 %v34_v19, %v19_v25 }
  0x84   :  { %v77_v29 = vmax.f32 %v68_v21, 0.0  ;;  %v78_v30 = vmax.f32 %v69_v22, 0.0  ;;  %v79_v31 = vmax.f32 %v70_v23, 0.0 }
  0x85   :  { %v66_v35 = vpop.permute.xlu1 %65  ;;  %v61_v36 = vpop.permute.xlu0 %60 }
  0x86   :  { %86 = vst [vmem:[%s198_s3] sm:$0xff] %v77_v29  ;;  %87 = vst [vmem:[%s198_s3 + $0x8] sm:$0xff] %v78_v30  ;;  %v74_v37 = vadd.f32 %v66_v35, %v47_v26  ;;  %v75_v38 = vadd.f32 %v66_v35, %v48_v27  ;;  %v76_v39 = vadd.f32 %v66_v35, %v49_v28 }
  0x87   :  { %88 = vst [vmem:[%s198_s3 + $0x10] sm:$0xff] %v79_v31  ;;  %v71_v40 = vadd.f32 %v61_v36, %v44_v32  ;;  %v72_v41 = vadd.f32 %v61_v36, %v45_v33  ;;  %v73_v42 = vadd.f32 %v61_v36, %v46_v34 }
  0x88   :  { %v83_v43 = vmax.f32 %v74_v37, 0.0  ;;  %v84_v44 = vmax.f32 %v75_v38, 0.0  ;;  %v85_v45 = vmax.f32 %v76_v39, 0.0 }
  0x89   :  { %v80_v46 = vmax.f32 %v71_v40, 0.0  ;;  %v81_v47 = vmax.f32 %v72_v41, 0.0  ;;  %v82_v48 = vmax.f32 %v73_v42, 0.0 }
  0x8a   :  { %92 = vst [vmem:[%s198_s3 + $0x30] sm:$0xff] %v83_v43  ;;  %93 = vst [vmem:[%s198_s3 + $0x38] sm:$0xff] %v84_v44 }
  0x8b   :  { %94 = vst [vmem:[%s198_s3 + $0x40] sm:$0xff] %v85_v45  ;;  %89 = vst [vmem:[%s198_s3 + $0x18] sm:$0xff] %v80_v46 }
  0x8c   :  { %90 = vst [vmem:[%s198_s3 + $0x20] sm:$0xff] %v81_v47  ;;  %91 = vst [vmem:[%s198_s3 + $0x28] sm:$0xff] %v82_v48 }

// kernel: network_forward.13
= control target key start
LH: loop header
LB: loop body
LE: loop exit
PB: predicated region body
PF: predicated region fallthrough
CT: control target
= control target key end

     0   :  { %vm430_vm0 = vcmask 1045504   ;;  %v895_v1 = vmov 0   ;;  %vm423_vm1 = vcmask 359424   ;;  %vm659_vm2 = vcmask 7168   ;;  %s1168_s1 = inlined_call_operand.vmem [shape: bf16[300,384], index: 1, kind: input, shape index: {}]   ;;  %s1169_s0 = inlined_call_operand.vmem [shape: bf16[24,300], index: 0, kind: input, shape index: {}]   ;;  %s1170_s2 = inlined_call_operand.vmem [shape: f32[24,384], index: 2, kind: output, shape index: {0}]   ;;  %s1171_s3 = inlined_call_operand.vmem [shape: f32[1,24,1], index: 3, kind: output, shape index: {1}]   ;;  %s1172_s4 = inlined_call_operand.vmem [shape: f32[1,24,1], index: 4, kind: output, shape index: {2}]  }
   0x1   :  { %v812_v0 = vld [vmem:[%s1168_s1 + $0xac] ss:$12 sps:$4 sm:$0xff]   ;;  %523 = vmatprep.mubr.bf16.mxu1 %v895_v1  ;;  %v814_v2 = vld [vmem:[%s1168_s1 + $0x1b4] ss:$12 sps:$4 sm:$0x3f]  }
   0x2   :  { %440 = vmatprep.subr.bf16.mxu0 %v812_v0  ;;  %v816_v3 = vld [vmem:[%s1168_s1 + $0xa8] ss:$12 sps:$4 sm:$0xff]   ;;  %v817_v4 = vld [vmem:[%s1168_s1 + $0x1b0] ss:$12 sps:$4 sm:$0x3f]   ;;  %762 = vmatprep.subr.msk.bf16.mxu1 %vm430_vm0, %v814_v2 }
   0x3   :  { %v818_v5 = vld [vmem:[%s1168_s1 + $0x94] ss:$12 sps:$4 sm:$0xff]   ;;  %441 = vmatpush1.bf16.msra.mxu0 %v816_v3  ;;  %v432_v6 = vsel %vm430_vm0, %v817_v4, 0  ;;  %v820_v7 = vld [vmem:[%s1168_s1 + $0x19c] ss:$12 sps:$4 sm:$0xff]  }
   0x4   :  { %v822_v8 = vld [vmem:[%s1168_s1 + $0x90] ss:$12 sps:$4 sm:$0xff]   ;;  %502 = vmatpush1.bf16.msra.mxu1 %v432_v6  ;;  %442 = vmatprep.subr.bf16.mxu0 %v818_v5  ;;  %v823_v9 = vld [vmem:[%s1168_s1 + $0x198] ss:$12 sps:$4 sm:$0xff]   ;;  %v829_v13 = vld [vmem:[%s1168_s1 + $0x180] ss:$12 sps:$4 sm:$0xff]  }
   0x5   :  { %503 = vmatprep.subr.bf16.mxu1 %v820_v7  ;;  %v824_v10 = vld [vmem:[%s1168_s1 + $0x7c] ss:$12 sps:$4 sm:$0xff]   ;;  %v826_v11 = vld [vmem:[%s1168_s1 + $0x184] ss:$12 sps:$4 sm:$0xff]   ;;  %v833_v16 = vld [vmem:[%s1168_s1 + $0x60] ss:$12 sps:$4 sm:$0xff]  }
   0x6   :  { %v828_v12 = vld [vmem:[%s1168_s1 + $0x78] ss:$12 sps:$4 sm:$0xff]   ;;  %v832_v15 = vld [vmem:[%s1168_s1 + $0x170] ss:$12 sps:$4 sm:$0xff]   ;;  %v971_v17 = vld [vmem:[%s1169_s0 + $0x8] ss:$12 sps:$4 sm:$0xff]  }
   0x7   :  { %443 = vmatpush1.bf16.msra.mxu0 %v822_v8  ;;  %v830_v14 = vld [vmem:[%s1168_s1 + $0x64] ss:$12 sps:$4 sm:$0xff]   ;;  %v836_v19 = vld [vmem:[%s1168_s1 + $0x4c] ss:$12 sps:$4 sm:$0xff]   ;;  %v839_v21 = vld [vmem:[%s1168_s1 + $0x48] ss:$12 sps:$4 sm:$0xff]  }
   0x8   :  { %504 = vmatpush1.bf16.msra.mxu1 %v823_v9  ;;  %444 = vmatprep.subr.bf16.mxu0 %v824_v10  ;;  %v835_v18 = vld [vmem:[%s1168_s1 + $0xb0] ss:$12 sps:$4 sm:$0xff]   ;;  %v838_v20 = vld [vmem:[%s1168_s1 + $0x158] ss:$12 sps:$4 sm:$0xff]   ;;  %v841_v23 = vld [vmem:[%s1168_s1 + $0x34] ss:$12 sps:$4 sm:$0xff]  }
   0x9   :  { %505 = vmatprep.subr.bf16.mxu1 %v826_v11  ;;  %v840_v22 = vld [vmem:[%s1168_s1 + $0x98] ss:$12 sps:$4 sm:$0xff]   ;;  %v843_v24 = vld [vmem:[%s1168_s1 + $0x140] ss:$12 sps:$4 sm:$0xff]   ;;  %v844_v25 = vld [vmem:[%s1168_s1 + $0x30] ss:$12 sps:$4 sm:$0xff]  }
   0xa   :  { %v845_v26 = vld [vmem:[%s1168_s1 + $0x80] ss:$12 sps:$4 sm:$0xff]   ;;  %v846_v27 = vld [vmem:[%s1168_s1 + $0x1c] ss:$12 sps:$4 sm:$0xff]   ;;  %v849_v29 = vld [vmem:[%s1168_s1 + $0x18] ss:$12 sps:$4 sm:$0xff]  }
   0xb   :  { %445 = vmatpush1.bf16.msra.mxu0 %v828_v12  ;;  %v848_v28 = vld [vmem:[%s1168_s1 + $0x128] ss:$12 sps:$4 sm:$0xff]   ;;  %v851_v31 = vld [vmem:[%s1168_s1 + $0x4] ss:$12 sps:$4 sm:$0xff]   ;;  %v854_v33 = vld [vmem:[%s1168_s1] ss:$12 sps:$4 sm:$0xff]  }
   0xc   :  { %506 = vmatpush1.bf16.msra.mxu1 %v829_v13  ;;  %446 = vmatprep.subr.bf16.mxu0 %v830_v14  ;;  %v850_v30 = vld [vmem:[%s1168_s1 + $0x68] ss:$12 sps:$4 sm:$0xff]   ;;  %v853_v32 = vld [vmem:[%s1168_s1 + $0x110] ss:$12 sps:$4 sm:$0xff]   ;;  %v856_v35 = vld [vmem:[%s1168_s1 + $0x16c] ss:$12 sps:$4 sm:$0xff]  }
   0xd   :  { %767 = vmatprep.subr.bf16.mxu1 %v832_v15  ;;  %v855_v34 = vld [vmem:[%s1168_s1 + $0x50] ss:$12 sps:$4 sm:$0xff]   ;;  %v858_v36 = vld [vmem:[%s1168_s1 + $0xf8] ss:$12 sps:$4 sm:$0xff]   ;;  %v1035_v37 = vld [vmem:[%s1169_s0 + $0x20] ss:$0 sps:$4 sm:$0xff]  }
   0xe   :  { %v859_v38 = vld [vmem:[%s1168_s1 + $0x168] ss:$12 sps:$4 sm:$0xff]   ;;  %v860_v39 = vld [vmem:[%s1168_s1 + $0x38] ss:$12 sps:$4 sm:$0xff]   ;;  %v864_v41 = vld [vmem:[%s1168_s1 + $0xe0] ss:$12 sps:$4 sm:$0xff]  }
   0xf   :  { %447 = vmatpush1.bf16.msra.mxu0 %v833_v16  ;;  %763 = vmatmul.mubr.msk.bf16.vlgmr.msra.gmra.mxu1 %vm423_vm1, %v971_v17  ;;  %v861_v40 = vld [vmem:[%s1168_s1 + $0x154] ss:$12 sps:$4 sm:$0xff]   ;;  %v865_v42 = vld [vmem:[%s1168_s1 + $0x150] ss:$12 sps:$4 sm:$0xff]   ;;  %v870_v47 = vld [vmem:[%s1168_s1 + $0x138] ss:$12 sps:$4 sm:$0xff]  }
  0x10   :  { %768 = vmatpush3.bf16.msra.mxu1 %v835_v18  ;;  %448 = vmatprep.subr.bf16.mxu0 %v836_v19  ;;  %v866_v43 = vld [vmem:[%s1168_s1 + $0x20] ss:$12 sps:$4 sm:$0xff]   ;;  %v867_v44 = vld [vmem:[%s1168_s1 + $0x13c] ss:$12 sps:$4 sm:$0xff]   ;;  %v874_v45 = vld [vmem:[%s1169_s0 + $0x4] ss:$12 sps:$4 sm:$0xff]  }
  0x11   :  { %769 = vmatprep.subr.bf16.mxu1 %v838_v20  ;;  %533 = vmatprep.mubr.bf16.mxu1 %v895_v1  ;;  %v869_v46 = vld [vmem:[%s1168_s1 + $0xc8] ss:$12 sps:$4 sm:$0xff]   ;;  %v875_v49 = vld [vmem:[%s1168_s1 + $0x124] ss:$12 sps:$4 sm:$0xff]   ;;  %v19_v51 = vld [vmem:[%s1169_s0 + $0x18] sm:$0xff] }
  0x12   :  { %472 = vmatprep.mubr.bf16.mxu0 %v874_v45  ;;  %v871_v48 = vld [vmem:[%s1168_s1 + $0x8] ss:$12 sps:$4 sm:$0xff]   ;;  %v880_v50 = vld [vmem:[%s1168_s1 + $0x1b8] ss:$12 sps:$4 sm:$0x3f]   ;;  %v703_v56 = vcombine.high %v19_v51, %v19_v51  ;;  %v702_v61 = vcombine.low %v19_v51, %v19_v51 }
  0x13   :  { %449 = vmatpush1.bf16.msra.mxu0 %v839_v21  ;;  %v872_v52 = vld [vmem:[%s1169_s0] ss:$12 sps:$4 sm:$0xff]   ;;  %v438_v55 = vsel %vm430_vm0, %v880_v50, 0  ;;  %v881_v58 = vld [vmem:[%s1168_s1 + $0x108] ss:$12 sps:$4 sm:$0xff]  }
  0x14   :  { %770 = vmatpush3.bf16.msra.mxu1 %v840_v22  ;;  %450 = vmatprep.subr.bf16.mxu0 %v841_v23  ;;  %v877_v53 = vld [vmem:[%s1168_s1 + $0x120] ss:$12 sps:$4 sm:$0xff]   ;;  %v890_v60 = vld [vmem:[%s1168_s1 + $0x188] ss:$12 sps:$4 sm:$0xff]   ;;  %v887_v62 = vld [vmem:[%s1168_s1 + $0xf0] ss:$12 sps:$4 sm:$0xff]  }
  0x15   :  { %771 = vmatprep.subr.bf16.mxu1 %v843_v24  ;;  %v878_v54 = vld [vmem:[%s1168_s1 + $0x10c] ss:$12 sps:$4 sm:$0xff]   ;;  %v883_v59 = vld [vmem:[%s1168_s1 + $0xf4] ss:$12 sps:$4 sm:$0xff]   ;;  %v888_v63 = vld [vmem:[%s1168_s1 + $0xdc] ss:$12 sps:$4 sm:$0xff]  }
  0x16   :  { %v886_v57 = vld [vmem:[%s1168_s1 + $0x1a0] ss:$12 sps:$4 sm:$0xff]   ;;  %v891_v0 = vld [vmem:[%s1168_s1 + $0xd8] ss:$12 sps:$4 sm:$0xff]  }
  0x17   :  { %451 = vmatpush1.bf16.msra.mxu0 %v844_v25  ;;  %764 = vmatmul.mubr.msk.bf16.gmra.mxu1 %vm423_vm1, %v1035_v37  ;;  %v892_v1 = vld [vmem:[%s1168_s1 + $0xc4] ss:$12 sps:$4 sm:$0xff]   ;;  %v894_v2 = vld [vmem:[%s1168_s1 + $0xc0] ss:$12 sps:$4 sm:$0xff]  }
  0x18   :  { %772 = vmatpush3.bf16.msra.mxu1 %v845_v26  ;;  %452 = vmatprep.subr.bf16.mxu0 %v846_v27 }
  0x19   :  { %773 = vmatprep.subr.bf16.mxu1 %v848_v28  ;;  %574 = vmatprep.mubr.bf16.mxu1 %v874_v45 }
  0x1b   :  { %453 = vmatpush1.bf16.msra.mxu0 %v849_v29 }
  0x1c   :  { %774 = vmatpush3.bf16.msra.mxu1 %v850_v30  ;;  %454 = vmatprep.subr.bf16.mxu0 %v851_v31 }
  0x1d   :  { %775 = vmatprep.subr.bf16.mxu1 %v853_v32 }
  0x1f   :  { %455 = vmatpush1.bf16.msra.mxu0 %v854_v33 }
  0x20   :  { %776 = vmatpush3.bf16.msra.mxu1 %v855_v34  ;;  %456 = vmatprep.subr.bf16.mxu0 %v856_v35 }
  0x21   :  { %777 = vmatprep.subr.bf16.mxu1 %v858_v36 }
  0x23   :  { %457 = vmatpush2.bf16.msra.mxu0 %v859_v38 }
  0x24   :  { %778 = vmatpush3.bf16.msra.mxu1 %v860_v39  ;;  %458 = vmatprep.subr.bf16.mxu0 %v861_v40 }
  0x25   :  { %779 = vmatprep.subr.bf16.mxu1 %v864_v41 }
  0x27   :  { %459 = vmatpush2.bf16.msra.mxu0 %v865_v42 }
  0x28   :  { %780 = vmatpush3.bf16.msra.mxu1 %v866_v43  ;;  %460 = vmatprep.subr.bf16.mxu0 %v867_v44 }
  0x29   :  { %781 = vmatprep.subr.bf16.mxu1 %v869_v46 }
  0x2b   :  { %461 = vmatpush2.bf16.msra.mxu0 %v870_v47 }
  0x2c   :  { %782 = vmatpush3.bf16.msra.mxu1 %v871_v48  ;;  %462 = vmatprep.subr.bf16.mxu0 %v875_v49 }
  0x2d   :  { %810 = vmatprep.subr.msk.bf16.mxu1 %vm430_vm0, %v880_v50 }
  0x2f   :  { %575 = vmatmul.mubr.bf16.vlgmr.msra.gmra.mxu1 %v872_v52  ;;  %463 = vmatpush2.bf16.msra.mxu0 %v877_v53 }
  0x30   :  { %464 = vmatprep.subr.bf16.mxu0 %v878_v54  ;;  %801 = vmatpush3.bf16.msra.mxu1 %v438_v55 }
  0x31   :  { %582 = vmatprep.mubr.bf16.mxu1 %v703_v56  ;;  %802 = vmatprep.subr.bf16.mxu1 %v886_v57 }
  0x33   :  { %465 = vmatpush2.bf16.msra.mxu0 %v881_v58 }
  0x34   :  { %466 = vmatprep.subr.bf16.mxu0 %v883_v59  ;;  %803 = vmatpush3.bf16.msra.mxu1 %v886_v57 }
  0x35   :  { %804 = vmatprep.subr.bf16.mxu1 %v890_v60 }
  0x37   :  { %583 = vmatmul.mubr.bf16.gmra.mxu1 %v702_v61  ;;  %467 = vmatpush2.bf16.msra.mxu0 %v887_v62 }
  0x38   :  { %468 = vmatprep.subr.bf16.mxu0 %v888_v63  ;;  %805 = vmatpush3.bf16.msra.mxu1 %v890_v60 }
  0x39   :  { %806 = vmatprep.mubr.msk.bf16.mxu1 %vm423_vm1, %v971_v17 }
  0x3b   :  { %469 = vmatpush2.bf16.msra.mxu0 %v891_v0 }
  0x3c   :  { %470 = vmatprep.subr.bf16.mxu0 %v892_v1 }
  0x3f   :  { %807 = vmatmul.mubr.msk.bf16.vlgmr.msra.gmra.mxu1 %vm423_vm1, %v1035_v37  ;;  %471 = vmatpush2.bf16.msra.mxu0 %v894_v2 }
  0x42   :  { %473 = vmatmul.mubr.bf16.vlgmr.msra.gmra.mxu0 %v872_v52 }
  0x43   :  { %482 = vmatprep.mubr.bf16.mxu0 %v703_v56 }
  0x4a   :  { %483 = vmatmul.mubr.bf16.gmra.mxu0 %v702_v61 }
  0xcf   :  { %v525_v3 = vpop.f32.mrf.mxu1 }
  0xd1   :  { %v527_v4 = vpop.f32.mrf.mxu1 }
  0xd3   :  { %v529_v5 = vpop.f32.mrf.mxu1 }
  0xd5   :  { %v531_v6 = vpop.f32.mrf.mxu1 }
  0xd7   :  { %v535_v7 = vpop.f32.mrf.mxu1 }
  0xd9   :  { %v537_v8 = vpop.f32.mrf.mxu1 }
  0xdb   :  { %v539_v9 = vpop.f32.mrf.mxu1 }
  0xdd   :  { %v540_v10 = vpop.f32.mrf.mxu1 }
  0xef   :  { %v783_v11 = vpop.f32.mrf.mxu1 }
  0xf1   :  { %v784_v12 = vpop.f32.mrf.mxu1 }
  0xf2   :  { %v785_v21 = vadd.f32 %v784_v12, %v783_v11 }
  0xf3   :  { %v786_v13 = vpop.f32.mrf.mxu1 }
  0xf5   :  { %v787_v14 = vpop.f32.mrf.mxu1 }
  0xf6   :  { %v788_v28 = vadd.f32 %v787_v14, %v786_v13 }
  0xf7   :  { %v789_v15 = vpop.f32.mrf.mxu1 }
  0xf9   :  { %v790_v16 = vpop.f32.mrf.mxu1 }
  0xfa   :  { %v791_v18 = vadd.f32 %v790_v16, %v789_v15 }
  0xfb   :  { %v792_v17 = vpop.f32.mrf.mxu1 }
  0xfd   :  { %v793_v19 = vpop.f32.mrf.mxu1 }
  0xff   :  { %v808_v20 = vpop.f32.mrf.mxu1 }
 0x100   :  { %v633_v22 = vadd.f32 %v808_v20, %v791_v18 }
 0x101   :  { %v624_v23 = vpop.f32.mrf.mxu1 }
 0x102   :  { %646 = vst [vmem:[%s1170_s2 + $0x40] sm:$0xff] %v633_v22  ;;  %v625_v24 = vadd.f32 %v785_v21, %v624_v23  ;;  %v474_v25 = vpop.f32.mrf.mxu0  ;;  %v671_v62 = vmul.f32 %v633_v22, %v633_v22 }
 0x103   :  { %v526_v26 = vadd.f32 %v525_v3, %v474_v25  ;;  %v809_v27 = vpop.f32.mrf.mxu1 }
 0x104   :  { %640 = vst [vmem:[%s1170_s2 + $0x10] sm:$0xff] %v625_v24  ;;  %v476_v29 = vpop.f32.mrf.mxu0  ;;  %v665_v41 = vmul.f32 %v625_v24, %v625_v24 }
 0x105   :  { %638 = vst [vmem:[%s1170_s2] sm:$0xff] %v526_v26  ;;  %v528_v30 = vadd.f32 %v527_v4, %v476_v29  ;;  %v627_v31 = vpop.f32.mrf.mxu1  ;;  %v663_v36 = vmul.f32 %v526_v26, %v526_v26 }
 0x106   :  { %v628_v32 = vadd.f32 %v788_v28, %v627_v31  ;;  %v478_v33 = vpop.f32.mrf.mxu0 }
 0x107   :  { %639 = vst [vmem:[%s1170_s2 + $0x8] sm:$0xff] %v528_v30  ;;  %v530_v34 = vadd.f32 %v529_v5, %v478_v33  ;;  %v647_v35 = vadd.f32 %v528_v30, %v526_v26  ;;  %v664_v37 = vmul.f32 %v528_v30, %v528_v30 }
 0x108   :  { %643 = vst [vmem:[%s1170_s2 + $0x28] sm:$0xff] %v628_v32  ;;  %v480_v38 = vpop.f32.mrf.mxu0  ;;  %v668_v56 = vmul.f32 %v628_v32, %v628_v32 }
 0x109   :  { %641 = vst [vmem:[%s1170_s2 + $0x18] sm:$0xff] %v530_v34  ;;  %v532_v39 = vadd.f32 %v531_v6, %v480_v38  ;;  %v648_v40 = vadd.f32 %v647_v35, %v625_v24  ;;  %v672_v42 = vadd.f32 %v664_v37, %v663_v36  ;;  %v666_v43 = vmul.f32 %v530_v34, %v530_v34 }
 0x10a   :  { %v484_v44 = vpop.f32.mrf.mxu0 }
 0x10b   :  { %642 = vst [vmem:[%s1170_s2 + $0x20] sm:$0xff] %v532_v39  ;;  %v667_v45 = vmul.f32 %v532_v39, %v532_v39  ;;  %v536_v46 = vadd.f32 %v535_v7, %v484_v44  ;;  %649 = vadd.xlane.f32.xlu0 %v648_v40  ;;  %v673_v47 = vadd.f32 %v672_v42, %v665_v41 }
 0x10c   :  { %v651_v48 = vadd.f32 %v532_v39, %v530_v34  ;;  %v486_v49 = vpop.f32.mrf.mxu0 }
 0x10d   :  { %644 = vst [vmem:[%s1170_s2 + $0x30] sm:$0xff] %v536_v46  ;;  %v538_v50 = vadd.f32 %v537_v8, %v486_v49  ;;  %674 = vadd.xlane.f32.xlu1 %v673_v47  ;;  %v676_v52 = vadd.f32 %v667_v45, %v666_v43  ;;  %v669_v54 = vmul.f32 %v536_v46, %v536_v46 }
 0x10e   :  { %v652_v51 = vadd.f32 %v651_v48, %v628_v32  ;;  %v488_v53 = vpop.f32.mrf.mxu0 }
 0x10f   :  { %645 = vst [vmem:[%s1170_s2 + $0x38] sm:$0xff] %v538_v50  ;;  %v670_v55 = vmul.f32 %v538_v50, %v538_v50  ;;  %v655_v57 = vadd.f32 %v538_v50, %v536_v46  ;;  %v677_v59 = vadd.f32 %v676_v52, %v668_v56 }
 0x110   :  { %653 = vadd.xlane.f32.xlu0 %v652_v51  ;;  %v489_v58 = vpop.f32.mrf.mxu0 }
 0x111   :  { %v656_v60 = vadd.f32 %v655_v57, %v633_v22  ;;  %v680_v61 = vadd.f32 %v670_v55, %v669_v54 }
 0x113   :  { %657 = vadd.xlane.f32.xlu1 %v656_v60  ;;  %v681_v63 = vadd.f32 %v680_v61, %v671_v62 }
 0x114   :  { %678 = vadd.xlane.f32.xlu0 %v677_v59 }
 0x117   :  { %682 = vadd.xlane.f32.xlu1 %v681_v63 }
 0x194   :  { %v650_v0 = vpop.xlane.xlu0 %649 }
 0x195   :  { %660 = vst.msk [vmem:[%s1171_s3] sm:$0xff] %vm659_vm2, %v650_v0 }
 0x196   :  { %v675_v1 = vpop.xlane.xlu1 %674 }
 0x197   :  { %684 = vst.msk [vmem:[%s1172_s4] sm:$0xff] %vm659_vm2, %v675_v1 }
 0x199   :  { %v654_v2 = vpop.xlane.xlu0 %653 }
 0x19a   :  { %661 = vst.msk [vmem:[%s1171_s3 + $0x8] sm:$0xff] %vm659_vm2, %v654_v2 }
 0x19c   :  { %v658_v4 = vpop.xlane.xlu1 %657 }
 0x19d   :  { %v679_v3 = vpop.xlane.xlu0 %678  ;;  %662 = vst.msk [vmem:[%s1171_s3 + $0x10] sm:$0xff] %vm659_vm2, %v658_v4 }
 0x19e   :  { %685 = vst.msk [vmem:[%s1172_s4 + $0x8] sm:$0xff] %vm659_vm2, %v679_v3 }
 0x1a0   :  { %v683_v5 = vpop.xlane.xlu1 %682 }
 0x1a1   :  { %686 = vst.msk [vmem:[%s1172_s4 + $0x10] sm:$0xff] %vm659_vm2, %v683_v5 }

// kernel: network_forward.16
= control target key start
LH: loop header
LB: loop body
LE: loop exit
PB: predicated region body
PF: predicated region fallthrough
CT: control target
= control target key end

     0   :  { %v87_v0 = vmov 0   ;;  %s162_s1 = inlined_call_operand.vmem [shape: f32[24,1], index: 1, kind: input, shape index: {}]   ;;  %s163_s2 = inlined_call_operand.vmem [shape: f32[24,1], index: 2, kind: input, shape index: {}]   ;;  %s164_s0 = inlined_call_operand.vmem [shape: f32[24,256], index: 0, kind: input, shape index: {}]   ;;  %s165_s3 = inlined_call_operand.vmem [shape: f32[24,256], index: 3, kind: output, shape index: {}]  }
   0x1   :  { %86 = vset.pattern.permute.xlu1 %v87_v0  ;;  %85 = vset.pattern.permute.xlu0 %v87_v0  ;;  %v22_v1 = vld [vmem:[%s162_s1 + $0x10] sm:$0xff]  ;;  %v20_v2 = vld [vmem:[%s162_s1] sm:$0xff]  ;;  %v21_v4 = vld [vmem:[%s162_s1 + $0x8] sm:$0xff] }
   0x2   :  { %35 = vperm.xlu1 %86, %v22_v1   ;;  %25 = vperm.xlu0 %85, %v20_v2   ;;  %v44_v3 = vld [vmem:[%s163_s2] sm:$0xff]  ;;  %v46_v5 = vld [vmem:[%s163_s2 + $0x10] sm:$0xff]  ;;  %v45_v6 = vld [vmem:[%s163_s2 + $0x8] sm:$0xff] }
   0x3   :  { %v14_v9 = vld [vmem:[%s164_s0] sm:$0xff]  ;;  %v15_v10 = vld [vmem:[%s164_s0 + $0x8] sm:$0xff]  ;;  %v16_v17 = vld [vmem:[%s164_s0 + $0x10] sm:$0xff] }
   0x4   :  { %v18_v11 = vld [vmem:[%s164_s0 + $0x20] sm:$0xff]  ;;  %v19_v12 = vld [vmem:[%s164_s0 + $0x28] sm:$0xff]  ;;  %v17_v18 = vld [vmem:[%s164_s0 + $0x18] sm:$0xff] }
   0x6   :  { %49 = vperm.xlu1 %86, %v44_v3   ;;  %30 = vperm.xlu0 %85, %v21_v4  }
   0xa   :  { %59 = vperm.xlu1 %86, %v46_v5   ;;  %54 = vperm.xlu0 %85, %v45_v6  }
  0x7d   :  { %v36_v7 = vpop.permute.xlu1 %35  ;;  %v26_v8 = vpop.permute.xlu0 %25 }
  0x7e   :  { %v38_v13 = vmul.f32 %v26_v8, %v14_v9  ;;  %v39_v14 = vmul.f32 %v26_v8, %v15_v10  ;;  %v42_v21 = vmul.f32 %v36_v7, %v18_v11  ;;  %v43_v22 = vmul.f32 %v36_v7, %v19_v12 }
  0x81   :  { %v50_v15 = vpop.permute.xlu1 %49  ;;  %v31_v16 = vpop.permute.xlu0 %30 }
  0x82   :  { %v62_v19 = vadd.f32 %v50_v15, %v38_v13  ;;  %v63_v20 = vadd.f32 %v50_v15, %v39_v14  ;;  %v40_v25 = vmul.f32 %v31_v16, %v16_v17  ;;  %v41_v26 = vmul.f32 %v31_v16, %v17_v18 }
  0x84   :  { %v68_v23 = vmax.f32 %v62_v19, 0.0  ;;  %v69_v24 = vmax.f32 %v63_v20, 0.0 }
  0x85   :  { %v60_v27 = vpop.permute.xlu1 %59  ;;  %v55_v28 = vpop.permute.xlu0 %54 }
  0x86   :  { %74 = vst [vmem:[%s165_s3] sm:$0xff] %v68_v23  ;;  %75 = vst [vmem:[%s165_s3 + $0x8] sm:$0xff] %v69_v24  ;;  %v66_v29 = vadd.f32 %v60_v27, %v42_v21  ;;  %v67_v30 = vadd.f32 %v60_v27, %v43_v22  ;;  %v64_v31 = vadd.f32 %v55_v28, %v40_v25 }
  0x87   :  { %v65_v32 = vadd.f32 %v55_v28, %v41_v26 }
  0x88   :  { %v72_v33 = vmax.f32 %v66_v29, 0.0  ;;  %v73_v34 = vmax.f32 %v67_v30, 0.0  ;;  %v70_v35 = vmax.f32 %v64_v31, 0.0 }
  0x89   :  { %v71_v36 = vmax.f32 %v65_v32, 0.0 }
  0x8a   :  { %78 = vst [vmem:[%s165_s3 + $0x20] sm:$0xff] %v72_v33  ;;  %79 = vst [vmem:[%s165_s3 + $0x28] sm:$0xff] %v73_v34 }
  0x8b   :  { %76 = vst [vmem:[%s165_s3 + $0x10] sm:$0xff] %v70_v35  ;;  %77 = vst [vmem:[%s165_s3 + $0x18] sm:$0xff] %v71_v36 }

// kernel: network_forward.15
= control target key start
LH: loop header
LB: loop body
LE: loop exit
PB: predicated region body
PF: predicated region fallthrough
CT: control target
= control target key end

     0   :  { %vm523_vm0 = vcmask 1043456   ;;  %vm516_vm1 = vcmask 719872   ;;  %vm698_vm2 = vcmask 7168   ;;  %s1270_s1 = inlined_call_operand.vmem [shape: bf16[600,256], index: 1, kind: input, shape index: {}]   ;;  %s1271_s0 = inlined_call_operand.vmem [shape: bf16[24,600], index: 0, kind: input, shape index: {}]   ;;  %s1272_s2 = inlined_call_operand.vmem [shape: f32[24,256], index: 2, kind: output, shape index: {0}]   ;;  %s1273_s3 = inlined_call_operand.vmem [shape: f32[1,24,1], index: 3, kind: output, shape index: {1}]   ;;  %s1274_s4 = inlined_call_operand.vmem [shape: f32[1,24,1], index: 4, kind: output, shape index: {2}]  }
   0x1   :  { %v834_v0 = vld [vmem:[%s1270_s1 + $0x74] ss:$8 sps:$4 sm:$0xff]   ;;  %v838_v2 = vld [vmem:[%s1270_s1 + $0x70] ss:$8 sps:$4 sm:$0xff]   ;;  %v840_v4 = vld [vmem:[%s1270_s1 + $0x64] ss:$8 sps:$4 sm:$0xff]  }
   0x2   :  { %v836_v1 = vld [vmem:[%s1270_s1 + $0x174] ss:$8 sps:$4 sm:$0xff]   ;;  %530 = vmatprep.subr.bf16.mxu0 %v834_v0  ;;  %v839_v3 = vld [vmem:[%s1270_s1 + $0x170] ss:$8 sps:$4 sm:$0xff]   ;;  %v842_v5 = vld [vmem:[%s1270_s1 + $0x164] ss:$8 sps:$4 sm:$0xff]  }
   0x3   :  { %581 = vmatprep.subr.bf16.mxu1 %v836_v1  ;;  %531 = vmatpush1.bf16.msra.mxu0 %v838_v2  ;;  %v844_v6 = vld [vmem:[%s1270_s1 + $0x60] ss:$8 sps:$4 sm:$0xff]   ;;  %v846_v8 = vld [vmem:[%s1270_s1 + $0x54] ss:$8 sps:$4 sm:$0xff]   ;;  %v850_v10 = vld [vmem:[%s1270_s1 + $0x50] ss:$8 sps:$4 sm:$0xff]  }
   0x4   :  { %582 = vmatpush1.bf16.msra.mxu1 %v839_v3  ;;  %532 = vmatprep.subr.bf16.mxu0 %v840_v4  ;;  %v845_v7 = vld [vmem:[%s1270_s1 + $0x160] ss:$8 sps:$4 sm:$0xff]   ;;  %v848_v9 = vld [vmem:[%s1270_s1 + $0x154] ss:$8 sps:$4 sm:$0xff]   ;;  %v851_v11 = vld [vmem:[%s1270_s1 + $0x150] ss:$8 sps:$4 sm:$0xff]  }
   0x5   :  { %583 = vmatprep.subr.bf16.mxu1 %v842_v5  ;;  %v852_v12 = vld [vmem:[%s1270_s1 + $0x44] ss:$8 sps:$4 sm:$0xff]   ;;  %v856_v14 = vld [vmem:[%s1270_s1 + $0x40] ss:$8 sps:$4 sm:$0xff]   ;;  %v858_v16 = vld [vmem:[%s1270_s1 + $0x34] ss:$8 sps:$4 sm:$0xff]  }
   0x6   :  { %v854_v13 = vld [vmem:[%s1270_s1 + $0x144] ss:$8 sps:$4 sm:$0xff]   ;;  %v857_v15 = vld [vmem:[%s1270_s1 + $0x140] ss:$8 sps:$4 sm:$0xff]   ;;  %v860_v17 = vld [vmem:[%s1270_s1 + $0x134] ss:$8 sps:$4 sm:$0xff]  }
   0x7   :  { %533 = vmatpush1.bf16.msra.mxu0 %v844_v6  ;;  %v862_v18 = vld [vmem:[%s1270_s1 + $0x30] ss:$8 sps:$4 sm:$0xff]   ;;  %v864_v20 = vld [vmem:[%s1270_s1 + $0x24] ss:$8 sps:$4 sm:$0xff]   ;;  %v868_v22 = vld [vmem:[%s1270_s1 + $0x20] ss:$8 sps:$4 sm:$0xff]  }
   0x8   :  { %584 = vmatpush1.bf16.msra.mxu1 %v845_v7  ;;  %534 = vmatprep.subr.bf16.mxu0 %v846_v8  ;;  %v863_v19 = vld [vmem:[%s1270_s1 + $0x130] ss:$8 sps:$4 sm:$0xff]   ;;  %v866_v21 = vld [vmem:[%s1270_s1 + $0x124] ss:$8 sps:$4 sm:$0xff]   ;;  %v869_v23 = vld [vmem:[%s1270_s1 + $0x120] ss:$8 sps:$4 sm:$0xff]  }
   0x9   :  { %585 = vmatprep.subr.bf16.mxu1 %v848_v9  ;;  %v870_v24 = vld [vmem:[%s1270_s1 + $0x14] ss:$8 sps:$4 sm:$0xff]   ;;  %v874_v26 = vld [vmem:[%s1270_s1 + $0x10] ss:$8 sps:$4 sm:$0xff]   ;;  %v876_v28 = vld [vmem:[%s1270_s1 + $0x4] ss:$8 sps:$4 sm:$0xff]  }
   0xa   :  { %v872_v25 = vld [vmem:[%s1270_s1 + $0x114] ss:$8 sps:$4 sm:$0xff]   ;;  %v875_v27 = vld [vmem:[%s1270_s1 + $0x110] ss:$8 sps:$4 sm:$0xff]   ;;  %v878_v29 = vld [vmem:[%s1270_s1 + $0x104] ss:$8 sps:$4 sm:$0xff]  }
   0xb   :  { %535 = vmatpush1.bf16.msra.mxu0 %v850_v10  ;;  %v880_v30 = vld [vmem:[%s1270_s1] ss:$8 sps:$4 sm:$0xff]   ;;  %v882_v32 = vld [vmem:[%s1270_s1 + $0xf4] ss:$8 sps:$4 sm:$0xff]   ;;  %v886_v34 = vld [vmem:[%s1270_s1 + $0xf0] ss:$8 sps:$4 sm:$0xff]  }
   0xc   :  { %586 = vmatpush1.bf16.msra.mxu1 %v851_v11  ;;  %536 = vmatprep.subr.bf16.mxu0 %v852_v12  ;;  %v881_v31 = vld [vmem:[%s1270_s1 + $0x100] ss:$8 sps:$4 sm:$0xff]   ;;  %v884_v33 = vld [vmem:[%s1270_s1 + $0x1f4] ss:$8 sps:$4 sm:$0xff]   ;;  %v887_v35 = vld [vmem:[%s1270_s1 + $0x1f0] ss:$8 sps:$4 sm:$0xff]  }
   0xd   :  { %587 = vmatprep.subr.bf16.mxu1 %v854_v13  ;;  %v888_v36 = vld [vmem:[%s1270_s1 + $0xe4] ss:$8 sps:$4 sm:$0xff]   ;;  %v892_v38 = vld [vmem:[%s1270_s1 + $0xe0] ss:$8 sps:$4 sm:$0xff]   ;;  %v894_v40 = vld [vmem:[%s1270_s1 + $0xd4] ss:$8 sps:$4 sm:$0xff]  }
   0xe   :  { %v890_v37 = vld [vmem:[%s1270_s1 + $0x1e4] ss:$8 sps:$4 sm:$0xff]   ;;  %v893_v39 = vld [vmem:[%s1270_s1 + $0x1e0] ss:$8 sps:$4 sm:$0xff]   ;;  %v896_v41 = vld [vmem:[%s1270_s1 + $0x1d4] ss:$8 sps:$4 sm:$0xff]  }
   0xf   :  { %537 = vmatpush1.bf16.msra.mxu0 %v856_v14  ;;  %v898_v42 = vld [vmem:[%s1270_s1 + $0xd0] ss:$8 sps:$4 sm:$0xff]   ;;  %v900_v44 = vld [vmem:[%s1270_s1 + $0xc4] ss:$8 sps:$4 sm:$0xff]   ;;  %v904_v46 = vld [vmem:[%s1270_s1 + $0xc0] ss:$8 sps:$4 sm:$0xff]  }
  0x10   :  { %588 = vmatpush1.bf16.msra.mxu1 %v857_v15  ;;  %538 = vmatprep.subr.bf16.mxu0 %v858_v16  ;;  %v899_v43 = vld [vmem:[%s1270_s1 + $0x1d0] ss:$8 sps:$4 sm:$0xff]   ;;  %v902_v45 = vld [vmem:[%s1270_s1 + $0x1c4] ss:$8 sps:$4 sm:$0xff]   ;;  %v905_v47 = vld [vmem:[%s1270_s1 + $0x1c0] ss:$8 sps:$4 sm:$0xff]  }
  0x11   :  { %589 = vmatprep.subr.bf16.mxu1 %v860_v17  ;;  %v932_v48 = vld [vmem:[%s1271_s0 + $0x4] ss:$20 sps:$4 sm:$0xff]   ;;  %v906_v49 = vld [vmem:[%s1270_s1 + $0xb4] ss:$8 sps:$4 sm:$0xff]   ;;  %v935_v51 = vld [vmem:[%s1271_s0 + $0xc] ss:$20 sps:$4 sm:$0xff]  }
  0x12   :  { %v908_v50 = vld [vmem:[%s1270_s1 + $0x1b4] ss:$8 sps:$4 sm:$0xff]   ;;  %562 = vmatprep.mubr.bf16.mxu0 %v932_v48  ;;  %613 = vmatprep.mubr.bf16.mxu1 %v935_v51  ;;  %v910_v52 = vld [vmem:[%s1270_s1 + $0xb0] ss:$8 sps:$4 sm:$0xff]   ;;  %v912_v54 = vld [vmem:[%s1270_s1 + $0xa4] ss:$8 sps:$4 sm:$0xff]  }
  0x13   :  { %539 = vmatpush1.bf16.msra.mxu0 %v862_v18  ;;  %v911_v53 = vld [vmem:[%s1270_s1 + $0x1b0] ss:$8 sps:$4 sm:$0xff]   ;;  %v914_v55 = vld [vmem:[%s1270_s1 + $0x1a4] ss:$8 sps:$4 sm:$0xff]   ;;  %v916_v56 = vld [vmem:[%s1270_s1 + $0xa0] ss:$8 sps:$4 sm:$0xff]  }
  0x14   :  { %590 = vmatpush1.bf16.msra.mxu1 %v863_v19  ;;  %540 = vmatprep.subr.bf16.mxu0 %v864_v20  ;;  %v917_v57 = vld [vmem:[%s1270_s1 + $0x1a0] ss:$8 sps:$4 sm:$0xff]   ;;  %v918_v58 = vld [vmem:[%s1270_s1 + $0x94] ss:$8 sps:$4 sm:$0xff]   ;;  %v922_v60 = vld [vmem:[%s1270_s1 + $0x90] ss:$8 sps:$4 sm:$0xff]  }
  0x15   :  { %591 = vmatprep.subr.bf16.mxu1 %v866_v21  ;;  %v920_v59 = vld [vmem:[%s1270_s1 + $0x194] ss:$8 sps:$4 sm:$0xff]   ;;  %v923_v61 = vld [vmem:[%s1270_s1 + $0x190] ss:$8 sps:$4 sm:$0xff]   ;;  %v924_v62 = vld [vmem:[%s1270_s1 + $0x84] ss:$8 sps:$4 sm:$0xff]  }
  0x16   :  { %v926_v63 = vld [vmem:[%s1270_s1 + $0x184] ss:$8 sps:$4 sm:$0xff]   ;;  %v98_v0 = vld [vmem:[%s1270_s1 + $0x250] sm:$0xff]  ;;  %v928_v1 = vld [vmem:[%s1270_s1 + $0x80] ss:$8 sps:$4 sm:$0xff]   ;;  %v959_v21 = vmov 0  }
  0x17   :  { %541 = vmatpush1.bf16.msra.mxu0 %v868_v22  ;;  %v929_v2 = vld [vmem:[%s1270_s1 + $0x180] ss:$8 sps:$4 sm:$0xff]   ;;  %v817_v3 = vcombine.high %v98_v0, %v98_v0  ;;  %v816_v4 = vcombine.low %v98_v0, %v98_v0  ;;  %v22_v8 = vld [vmem:[%s1271_s0 + $0x30] sm:$0xff]  ;;  %v940_v10 = vld [vmem:[%s1270_s1 + $0x244] ss:$8 sps:$4 sm:$0xff]  }
  0x18   :  { %592 = vmatpush1.bf16.msra.mxu1 %v869_v23  ;;  %542 = vmatprep.subr.bf16.mxu0 %v870_v24  ;;  %v930_v5 = vld [vmem:[%s1271_s0] ss:$20 sps:$4 sm:$0xff]   ;;  %v933_v6 = vld [vmem:[%s1271_s0 + $0x8] ss:$20 sps:$4 sm:$0xff]   ;;  %v740_v12 = vcombine.high %v22_v8, %v22_v8  ;;  %v739_v16 = vcombine.low %v22_v8, %v22_v8  ;;  %v941_v17 = vld [vmem:[%s1270_s1 + $0x230] ss:$8 sps:$4 sm:$0xff]  }
  0x19   :  { %593 = vmatprep.subr.bf16.mxu1 %v872_v25  ;;  %v21_v7 = vld [vmem:[%s1271_s0 + $0x28] sm:$0xff]  ;;  %v525_v9 = vsel %vm523_vm0, %v816_v4, 0  ;;  %v943_v14 = vld [vmem:[%s1270_s1 + $0x234] ss:$8 sps:$4 sm:$0xff]   ;;  %v951_v22 = vld [vmem:[%s1270_s1 + $0x210] ss:$8 sps:$4 sm:$0xff]  }
  0x1a   :  { %v738_v11 = vcombine.high %v21_v7, %v21_v7  ;;  %v938_v13 = vld [vmem:[%s1270_s1 + $0x240] ss:$8 sps:$4 sm:$0xff]   ;;  %v737_v15 = vcombine.low %v21_v7, %v21_v7  ;;  %v950_v18 = vld [vmem:[%s1270_s1 + $0x224] ss:$8 sps:$4 sm:$0xff]   ;;  %v953_v20 = vld [vmem:[%s1270_s1 + $0x214] ss:$8 sps:$4 sm:$0xff]  }
  0x1b   :  { %543 = vmatpush1.bf16.msra.mxu0 %v874_v26  ;;  %v948_v19 = vld [vmem:[%s1270_s1 + $0x220] ss:$8 sps:$4 sm:$0xff]   ;;  %v956_v23 = vld [vmem:[%s1270_s1 + $0x204] ss:$8 sps:$4 sm:$0xff]   ;;  %v958_v26 = vld [vmem:[%s1271_s0 + $0x38] ss:$0 sps:$4 sm:$0xff]  }
  0x1c   :  { %594 = vmatpush1.bf16.msra.mxu1 %v875_v27  ;;  %544 = vmatprep.subr.bf16.mxu0 %v876_v28  ;;  %v954_v24 = vld [vmem:[%s1270_s1 + $0x200] ss:$8 sps:$4 sm:$0xff]   ;;  %v957_v25 = vld [vmem:[%s1271_s0 + $0x10] ss:$20 sps:$4 sm:$0xff]  }
  0x1d   :  { %595 = vmatprep.subr.bf16.mxu1 %v878_v29 }
  0x1f   :  { %545 = vmatpush1.bf16.msra.mxu0 %v880_v30 }
  0x20   :  { %596 = vmatpush1.bf16.msra.mxu1 %v881_v31  ;;  %546 = vmatprep.subr.bf16.mxu0 %v882_v32 }
  0x21   :  { %597 = vmatprep.subr.bf16.mxu1 %v884_v33 }
  0x23   :  { %547 = vmatpush2.bf16.msra.mxu0 %v886_v34 }
  0x24   :  { %598 = vmatpush2.bf16.msra.mxu1 %v887_v35  ;;  %548 = vmatprep.subr.bf16.mxu0 %v888_v36 }
  0x25   :  { %599 = vmatprep.subr.bf16.mxu1 %v890_v37 }
  0x27   :  { %549 = vmatpush2.bf16.msra.mxu0 %v892_v38 }
  0x28   :  { %600 = vmatpush2.bf16.msra.mxu1 %v893_v39  ;;  %550 = vmatprep.subr.bf16.mxu0 %v894_v40 }
  0x29   :  { %601 = vmatprep.subr.bf16.mxu1 %v896_v41 }
  0x2b   :  { %551 = vmatpush2.bf16.msra.mxu0 %v898_v42 }
  0x2c   :  { %602 = vmatpush2.bf16.msra.mxu1 %v899_v43  ;;  %552 = vmatprep.subr.bf16.mxu0 %v900_v44 }
  0x2d   :  { %603 = vmatprep.subr.bf16.mxu1 %v902_v45 }
  0x2f   :  { %553 = vmatpush2.bf16.msra.mxu0 %v904_v46 }
  0x30   :  { %604 = vmatpush2.bf16.msra.mxu1 %v905_v47  ;;  %554 = vmatprep.subr.bf16.mxu0 %v906_v49 }
  0x31   :  { %605 = vmatprep.subr.bf16.mxu1 %v908_v50 }
  0x33   :  { %555 = vmatpush2.bf16.msra.mxu0 %v910_v52 }
  0x34   :  { %606 = vmatpush2.bf16.msra.mxu1 %v911_v53  ;;  %556 = vmatprep.subr.bf16.mxu0 %v912_v54 }
  0x35   :  { %607 = vmatprep.subr.bf16.mxu1 %v914_v55 }
  0x37   :  { %557 = vmatpush2.bf16.msra.mxu0 %v916_v56 }
  0x38   :  { %608 = vmatpush2.bf16.msra.mxu1 %v917_v57  ;;  %558 = vmatprep.subr.bf16.mxu0 %v918_v58 }
  0x39   :  { %609 = vmatprep.subr.bf16.mxu1 %v920_v59 }
  0x3b   :  { %559 = vmatpush2.bf16.msra.mxu0 %v922_v60 }
  0x3c   :  { %610 = vmatpush2.bf16.msra.mxu1 %v923_v61  ;;  %560 = vmatprep.subr.bf16.mxu0 %v924_v62 }
  0x3d   :  { %611 = vmatprep.subr.bf16.mxu1 %v926_v63 }
  0x3f   :  { %561 = vmatpush2.bf16.msra.mxu0 %v928_v1 }
  0x40   :  { %612 = vmatpush2.bf16.msra.mxu1 %v929_v2  ;;  %818 = vmatprep.subr.msk.bf16.mxu0 %vm523_vm0, %v817_v3 }
  0x41   :  { %821 = vmatprep.subr.msk.bf16.mxu1 %vm523_vm0, %v817_v3 }
  0x42   :  { %563 = vmatmul.mubr.bf16.vlgmr.msra.gmra.mxu0 %v930_v5 }
  0x43   :  { %614 = vmatmul.mubr.bf16.vlgmr.msra.gmra.mxu1 %v933_v6  ;;  %637 = vmatpush1.bf16.msra.mxu0 %v525_v9 }
  0x44   :  { %827 = vmatpush1.bf16.msra.mxu1 %v525_v9  ;;  %638 = vmatprep.subr.bf16.mxu0 %v940_v10 }
  0x45   :  { %822 = vmatprep.subr.bf16.mxu1 %v940_v10  ;;  %572 = vmatprep.mubr.bf16.mxu0 %v738_v11 }
  0x46   :  { %623 = vmatprep.mubr.bf16.mxu1 %v740_v12 }
  0x47   :  { %639 = vmatpush1.bf16.msra.mxu0 %v938_v13 }
  0x48   :  { %828 = vmatpush1.bf16.msra.mxu1 %v938_v13  ;;  %640 = vmatprep.subr.bf16.mxu0 %v943_v14 }
  0x49   :  { %823 = vmatprep.subr.bf16.mxu1 %v943_v14 }
  0x4a   :  { %573 = vmatmul.mubr.bf16.gmra.mxu0 %v737_v15 }
  0x4b   :  { %624 = vmatmul.mubr.bf16.gmra.mxu1 %v739_v16  ;;  %641 = vmatpush1.bf16.msra.mxu0 %v941_v17 }
  0x4c   :  { %829 = vmatpush1.bf16.msra.mxu1 %v941_v17  ;;  %642 = vmatprep.subr.bf16.mxu0 %v950_v18 }
  0x4d   :  { %824 = vmatprep.subr.bf16.mxu1 %v950_v18  ;;  %664 = vmatprep.mubr.bf16.mxu0 %v959_v21 }
  0x4e   :  { %674 = vmatprep.mubr.bf16.mxu1 %v959_v21 }
  0x4f   :  { %643 = vmatpush1.bf16.msra.mxu0 %v948_v19 }
  0x50   :  { %830 = vmatpush1.bf16.msra.mxu1 %v948_v19  ;;  %644 = vmatprep.subr.bf16.mxu0 %v953_v20 }
  0x51   :  { %825 = vmatprep.subr.bf16.mxu1 %v953_v20 }
  0x53   :  { %645 = vmatpush1.bf16.msra.mxu0 %v951_v22 }
  0x54   :  { %831 = vmatpush1.bf16.msra.mxu1 %v951_v22  ;;  %646 = vmatprep.subr.bf16.mxu0 %v956_v23 }
  0x55   :  { %826 = vmatprep.subr.bf16.mxu1 %v956_v23 }
  0x57   :  { %647 = vmatpush1.bf16.msra.mxu0 %v954_v24 }
  0x58   :  { %832 = vmatpush1.bf16.msra.mxu1 %v954_v24 }
  0x5a   :  { %819 = vmatmul.mubr.msk.bf16.vlgmr.msra.gmra.mxu0 %vm516_vm1, %v957_v25 }
  0x5b   :  { %820 = vmatmul.mubr.msk.bf16.vlgmr.msra.gmra.mxu1 %vm516_vm1, %v958_v26 }
 0x102   :  { %v564_v27 = vpop.f32.mrf.mxu0 }
 0x103   :  { %v615_v28 = vpop.f32.mrf.mxu1 }
 0x104   :  { %v566_v29 = vpop.f32.mrf.mxu0  ;;  %v616_v43 = vadd.f32 %v615_v28, %v564_v27 }
 0x105   :  { %v617_v30 = vpop.f32.mrf.mxu1 }
 0x106   :  { %v568_v31 = vpop.f32.mrf.mxu0  ;;  %v618_v47 = vadd.f32 %v617_v30, %v566_v29 }
 0x107   :  { %v619_v32 = vpop.f32.mrf.mxu1 }
 0x108   :  { %v570_v33 = vpop.f32.mrf.mxu0  ;;  %v620_v53 = vadd.f32 %v619_v32, %v568_v31 }
 0x109   :  { %v621_v34 = vpop.f32.mrf.mxu1 }
 0x10a   :  { %v574_v35 = vpop.f32.mrf.mxu0  ;;  %v622_v56 = vadd.f32 %v621_v34, %v570_v33 }
 0x10b   :  { %v625_v36 = vpop.f32.mrf.mxu1 }
 0x10c   :  { %v576_v37 = vpop.f32.mrf.mxu0  ;;  %v626_v44 = vadd.f32 %v625_v36, %v574_v35 }
 0x10d   :  { %v627_v38 = vpop.f32.mrf.mxu1 }
 0x10e   :  { %v578_v39 = vpop.f32.mrf.mxu0  ;;  %v628_v48 = vadd.f32 %v627_v38, %v576_v37 }
 0x10f   :  { %v629_v40 = vpop.f32.mrf.mxu1 }
 0x110   :  { %v579_v41 = vpop.f32.mrf.mxu0 }
 0x111   :  { %v630_v42 = vpop.f32.mrf.mxu1 }
 0x11a   :  { %v666_v45 = vpop.f32.mrf.mxu0 }
 0x11b   :  { %v676_v46 = vpop.f32.mrf.mxu1  ;;  %v667_v49 = vadd.f32 %v666_v45, %v616_v43 }
 0x11c   :  { %v677_v50 = vadd.f32 %v676_v46, %v626_v44  ;;  %v668_v51 = vpop.f32.mrf.mxu0 }
 0x11d   :  { %v678_v52 = vpop.f32.mrf.mxu1  ;;  %683 = vst [vmem:[%s1272_s2] sm:$0xff] %v667_v49  ;;  %v669_v54 = vadd.f32 %v668_v51, %v618_v47  ;;  %v702_v2 = vmul.f32 %v667_v49, %v667_v49 }
 0x11e   :  { %687 = vst [vmem:[%s1272_s2 + $0x20] sm:$0xff] %v677_v50  ;;  %v679_v55 = vadd.f32 %v678_v52, %v628_v48  ;;  %v670_v57 = vpop.f32.mrf.mxu0  ;;  %v706_v7 = vmul.f32 %v677_v50, %v677_v50 }
 0x11f   :  { %v680_v58 = vpop.f32.mrf.mxu1  ;;  %684 = vst [vmem:[%s1272_s2 + $0x8] sm:$0xff] %v669_v54  ;;  %v671_v59 = vadd.f32 %v670_v57, %v620_v53  ;;  %v689_v61 = vadd.f32 %v669_v54, %v667_v49  ;;  %v703_v62 = vmul.f32 %v669_v54, %v669_v54 }
 0x120   :  { %688 = vst [vmem:[%s1272_s2 + $0x28] sm:$0xff] %v679_v55  ;;  %v695_v60 = vadd.f32 %v679_v55, %v677_v50  ;;  %v672_v63 = vpop.f32.mrf.mxu0  ;;  %v707_v5 = vmul.f32 %v679_v55, %v679_v55 }
 0x121   :  { %v681_v0 = vpop.f32.mrf.mxu1  ;;  %685 = vst [vmem:[%s1272_s2 + $0x10] sm:$0xff] %v671_v59  ;;  %v673_v1 = vadd.f32 %v672_v63, %v622_v56  ;;  %690 = vadd.xlane.f32.xlu0 %v689_v61  ;;  %v708_v3 = vadd.f32 %v703_v62, %v702_v2  ;;  %v704_v8 = vmul.f32 %v671_v59, %v671_v59 }
 0x122   :  { %696 = vadd.xlane.f32.xlu1 %v695_v60  ;;  %v714_v9 = vadd.f32 %v707_v5, %v706_v7 }
 0x123   :  { %686 = vst [vmem:[%s1272_s2 + $0x18] sm:$0xff] %v673_v1  ;;  %v692_v4 = vadd.f32 %v673_v1, %v671_v59  ;;  %v705_v6 = vmul.f32 %v673_v1, %v673_v1 }
 0x125   :  { %693 = vadd.xlane.f32.xlu0 %v692_v4  ;;  %v711_v10 = vadd.f32 %v705_v6, %v704_v8 }
 0x126   :  { %709 = vadd.xlane.f32.xlu1 %v708_v3 }
 0x129   :  { %712 = vadd.xlane.f32.xlu0 %v711_v10 }
 0x12a   :  { %715 = vadd.xlane.f32.xlu1 %v714_v9 }
 0x1aa   :  { %v691_v12 = vpop.xlane.xlu0 %690 }
 0x1ab   :  { %v697_v11 = vpop.xlane.xlu1 %696  ;;  %699 = vst.msk [vmem:[%s1273_s3] sm:$0xff] %vm698_vm2, %v691_v12 }
 0x1ac   :  { %701 = vst.msk [vmem:[%s1273_s3 + $0x10] sm:$0xff] %vm698_vm2, %v697_v11 }
 0x1ae   :  { %v694_v14 = vpop.xlane.xlu0 %693 }
 0x1af   :  { %v710_v13 = vpop.xlane.xlu1 %709  ;;  %700 = vst.msk [vmem:[%s1273_s3 + $0x8] sm:$0xff] %vm698_vm2, %v694_v14 }
 0x1b0   :  { %717 = vst.msk [vmem:[%s1274_s4] sm:$0xff] %vm698_vm2, %v710_v13 }
 0x1b2   :  { %v713_v16 = vpop.xlane.xlu0 %712 }
 0x1b3   :  { %v716_v15 = vpop.xlane.xlu1 %715  ;;  %718 = vst.msk [vmem:[%s1274_s4 + $0x8] sm:$0xff] %vm698_vm2, %v713_v16 }
 0x1b4   :  { %719 = vst.msk [vmem:[%s1274_s4 + $0x10] sm:$0xff] %vm698_vm2, %v716_v15 }

// kernel: network_forward.17
= control target key start
LH: loop header
LB: loop body
LE: loop exit
PB: predicated region body
PF: predicated region fallthrough
CT: control target
= control target key end

     0   :  { %v2335_v1 = vmov 0   ;;  %vm2337_vm0 = vmmov 0   ;;  %vm1342_vm1 = vcmask 785408   ;;  %s2877_s1 = inlined_call_operand.vmem [shape: bf16[2400,128], index: 1, kind: input, shape index: {}]   ;;  %s2878_s0 = inlined_call_operand.vmem [shape: bf16[10,2400], index: 0, kind: input, shape index: {}]   ;;  %s2879_s2 = inlined_call_operand.vmem [shape: f32[10,1], index: 2, kind: input, shape index: {}]   ;;  %s2880_s3 = inlined_call_operand.vmem [shape: f32[10,128], index: 3, kind: output, shape index: {}]  }
   0x1   :  { %v2157_v0 = vld [vmem:[%s2877_s1 + $0x78] sm:$0xff]   ;;  %2156 = vset.pattern.permute.xlu0 %v2335_v1  ;;  %v2161_v5 = vld [vmem:[%s2877_s1 + $0x70] sm:$0xff]   ;;  %v2165_v9 = vld [vmem:[%s2877_s1 + $0x68] sm:$0xff]  }
   0x2   :  { %v2158_v2 = vld [vmem:[%s2877_s1 + $0x38] sm:$0xff]   ;;  %1932 = vmatprep.subr.bf16.mxu0 %v2157_v0  ;;  %v2162_v6 = vld [vmem:[%s2877_s1 + $0x30] sm:$0xff]   ;;  %v2166_v10 = vld [vmem:[%s2877_s1 + $0x28] sm:$0xff]  }
   0x3   :  { %v2159_v3 = vld [vmem:[%s2877_s1 + $0xf8] sm:$0xff]   ;;  %1933 = vmatpush3.bf16.msra.mxu0 %v2158_v2  ;;  %v2163_v7 = vld [vmem:[%s2877_s1 + $0xf0] sm:$0xff]   ;;  %v2167_v11 = vld [vmem:[%s2877_s1 + $0xe8] sm:$0xff]  }
   0x4   :  { %v2160_v4 = vld [vmem:[%s2877_s1 + $0xb8] sm:$0xff]   ;;  %1954 = vmatprep.subr.bf16.mxu1 %v2159_v3  ;;  %1934 = vmatprep.subr.bf16.mxu0 %v2161_v5  ;;  %v2164_v8 = vld [vmem:[%s2877_s1 + $0xb0] sm:$0xff]   ;;  %v2168_v12 = vld [vmem:[%s2877_s1 + $0xa8] sm:$0xff]  }
   0x5   :  { %1955 = vmatpush3.bf16.msra.mxu1 %v2160_v4  ;;  %v2169_v13 = vld [vmem:[%s2877_s1 + $0x60] sm:$0xff]   ;;  %v2173_v17 = vld [vmem:[%s2877_s1 + $0x58] sm:$0xff]   ;;  %v2177_v21 = vld [vmem:[%s2877_s1 + $0x50] sm:$0xff]  }
   0x6   :  { %1956 = vmatprep.subr.bf16.mxu1 %v2163_v7  ;;  %v2170_v14 = vld [vmem:[%s2877_s1 + $0x20] sm:$0xff]   ;;  %v2174_v18 = vld [vmem:[%s2877_s1 + $0x18] sm:$0xff]   ;;  %v2178_v22 = vld [vmem:[%s2877_s1 + $0x10] sm:$0xff]  }
   0x7   :  { %1935 = vmatpush3.bf16.msra.mxu0 %v2162_v6  ;;  %v2171_v15 = vld [vmem:[%s2877_s1 + $0xe0] sm:$0xff]   ;;  %v2175_v19 = vld [vmem:[%s2877_s1 + $0xd8] sm:$0xff]   ;;  %v2179_v23 = vld [vmem:[%s2877_s1 + $0xd0] sm:$0xff]  }
   0x8   :  { %1936 = vmatprep.subr.bf16.mxu0 %v2165_v9  ;;  %v2172_v16 = vld [vmem:[%s2877_s1 + $0xa0] sm:$0xff]   ;;  %v2176_v20 = vld [vmem:[%s2877_s1 + $0x98] sm:$0xff]   ;;  %v2180_v24 = vld [vmem:[%s2877_s1 + $0x90] sm:$0xff]  }
   0x9   :  { %1957 = vmatpush3.bf16.msra.mxu1 %v2164_v8  ;;  %v2181_v25 = vld [vmem:[%s2877_s1 + $0x48] sm:$0xff]   ;;  %v2185_v29 = vld [vmem:[%s2877_s1 + $0x40] sm:$0xff]   ;;  %v2192_v35 = vld [vmem:[%s2877_s1 + $0x178] sm:$0xff]  }
   0xa   :  { %1958 = vmatprep.subr.bf16.mxu1 %v2167_v11  ;;  %v2182_v26 = vld [vmem:[%s2877_s1 + $0x8] sm:$0xff]   ;;  %v2186_v30 = vld [vmem:[%s2877_s1] sm:$0xff]   ;;  %v2196_v38 = vld [vmem:[%s2877_s1 + $0x138] sm:$0xff]  }
   0xb   :  { %1937 = vmatpush3.bf16.msra.mxu0 %v2166_v10  ;;  %v2183_v27 = vld [vmem:[%s2877_s1 + $0xc8] sm:$0xff]   ;;  %v2187_v31 = vld [vmem:[%s2877_s1 + $0xc0] sm:$0xff]   ;;  %v2197_v39 = vld [vmem:[%s2877_s1 + $0x1f8] sm:$0xff]  }
   0xc   :  { %1938 = vmatprep.subr.bf16.mxu0 %v2169_v13  ;;  %v2184_v28 = vld [vmem:[%s2877_s1 + $0x88] sm:$0xff]   ;;  %v2190_v33 = vld [vmem:[%s2878_s0 + $0x4] ss:$76 sps:$4 sm:$0x1f]   ;;  %v2198_v40 = vld [vmem:[%s2877_s1 + $0x1b8] sm:$0xff]  }
   0xd   :  { %1959 = vmatpush3.bf16.msra.mxu1 %v2168_v12  ;;  %v2188_v32 = vld [vmem:[%s2878_s0] ss:$76 sps:$4 sm:$0x1f]   ;;  %1378 = vmatprep.mubr.bf16.mxu0 %v2190_v33  ;;  %v2193_v36 = vld [vmem:[%s2878_s0 + $0x8] ss:$76 sps:$4 sm:$0x1f]  }
   0xe   :  { %1960 = vmatprep.subr.bf16.mxu1 %v2171_v15  ;;  %v2191_v34 = vld [vmem:[%s2877_s1 + $0x80] sm:$0xff]   ;;  %v2195_v37 = vld [vmem:[%s2878_s0 + $0xc] ss:$76 sps:$4 sm:$0x1f]   ;;  %v2199_v41 = vld [vmem:[%s2877_s1 + $0x170] sm:$0xff]  }
   0xf   :  { %1939 = vmatpush3.bf16.msra.mxu0 %v2170_v14  ;;  %1419 = vmatprep.mubr.bf16.mxu1 %v2195_v37  ;;  %v2200_v42 = vld [vmem:[%s2877_s1 + $0x130] sm:$0xff]   ;;  %v2203_v45 = vld [vmem:[%s2877_s1 + $0x168] sm:$0xff]   ;;  %v2207_v49 = vld [vmem:[%s2877_s1 + $0x160] sm:$0xff]  }
  0x10   :  { %1940 = vmatprep.subr.bf16.mxu0 %v2173_v17  ;;  %v2201_v43 = vld [vmem:[%s2877_s1 + $0x1f0] sm:$0xff]   ;;  %v2204_v46 = vld [vmem:[%s2877_s1 + $0x128] sm:$0xff]   ;;  %v2208_v50 = vld [vmem:[%s2877_s1 + $0x120] sm:$0xff]  }
  0x11   :  { %1961 = vmatpush3.bf16.msra.mxu1 %v2172_v16  ;;  %v2202_v44 = vld [vmem:[%s2877_s1 + $0x1b0] sm:$0xff]   ;;  %v2205_v47 = vld [vmem:[%s2877_s1 + $0x1e8] sm:$0xff]   ;;  %v2209_v51 = vld [vmem:[%s2877_s1 + $0x1e0] sm:$0xff]  }
  0x12   :  { %1962 = vmatprep.subr.bf16.mxu1 %v2175_v19  ;;  %v2206_v48 = vld [vmem:[%s2877_s1 + $0x1a8] sm:$0xff]   ;;  %v2210_v52 = vld [vmem:[%s2877_s1 + $0x1a0] sm:$0xff]   ;;  %v2211_v53 = vld [vmem:[%s2877_s1 + $0x158] sm:$0xff]  }
  0x13   :  { %1941 = vmatpush3.bf16.msra.mxu0 %v2174_v18  ;;  %v2212_v54 = vld [vmem:[%s2877_s1 + $0x118] sm:$0xff]   ;;  %v2215_v57 = vld [vmem:[%s2877_s1 + $0x150] sm:$0xff]   ;;  %v2219_v61 = vld [vmem:[%s2877_s1 + $0x148] sm:$0xff]  }
  0x14   :  { %1942 = vmatprep.subr.bf16.mxu0 %v2177_v21  ;;  %v2213_v55 = vld [vmem:[%s2877_s1 + $0x1d8] sm:$0xff]   ;;  %v2216_v58 = vld [vmem:[%s2877_s1 + $0x110] sm:$0xff]   ;;  %v2220_v62 = vld [vmem:[%s2877_s1 + $0x108] sm:$0xff]  }
  0x15   :  { %1963 = vmatpush3.bf16.msra.mxu1 %v2176_v20  ;;  %v2214_v56 = vld [vmem:[%s2877_s1 + $0x198] sm:$0xff]   ;;  %v2217_v59 = vld [vmem:[%s2877_s1 + $0x1d0] sm:$0xff]   ;;  %v2221_v63 = vld [vmem:[%s2877_s1 + $0x1c8] sm:$0xff]  }
  0x16   :  { %1964 = vmatprep.subr.bf16.mxu1 %v2179_v23  ;;  %v2218_v60 = vld [vmem:[%s2877_s1 + $0x190] sm:$0xff]   ;;  %v2222_v0 = vld [vmem:[%s2877_s1 + $0x188] sm:$0xff]   ;;  %v2223_v1 = vld [vmem:[%s2877_s1 + $0x140] sm:$0xff]  }
  0x17   :  { %1943 = vmatpush3.bf16.msra.mxu0 %v2178_v22  ;;  %v2224_v2 = vld [vmem:[%s2877_s1 + $0x100] sm:$0xff]   ;;  %v2226_v4 = vld [vmem:[%s2878_s0 + $0x10] ss:$76 sps:$4 sm:$0x1f]   ;;  %v2241_v17 = vld [vmem:[%s2877_s1 + $0x268] sm:$0xff]  }
  0x18   :  { %1944 = vmatprep.subr.bf16.mxu0 %v2181_v25  ;;  %v2225_v3 = vld [vmem:[%s2877_s1 + $0x1c0] sm:$0xff]   ;;  %v2230_v7 = vld [vmem:[%s2877_s1 + $0x278] sm:$0xff]   ;;  %v2237_v13 = vld [vmem:[%s2877_s1 + $0x270] sm:$0xff]  }
  0x19   :  { %1965 = vmatpush3.bf16.msra.mxu1 %v2180_v24  ;;  %v2228_v5 = vld [vmem:[%s2878_s0 + $0x14] ss:$76 sps:$4 sm:$0x1f]   ;;  %v2231_v8 = vld [vmem:[%s2878_s0 + $0x18] ss:$76 sps:$4 sm:$0x1f]  }
  0x1a   :  { %1966 = vmatprep.subr.bf16.mxu1 %v2183_v27  ;;  %v2229_v6 = vld [vmem:[%s2877_s1 + $0x180] sm:$0xff]   ;;  %v2233_v9 = vld [vmem:[%s2878_s0 + $0x1c] ss:$76 sps:$4 sm:$0x1f]   ;;  %v2238_v14 = vld [vmem:[%s2877_s1 + $0x230] sm:$0xff]  }
  0x1b   :  { %1945 = vmatpush3.bf16.msra.mxu0 %v2182_v26  ;;  %v2234_v10 = vld [vmem:[%s2877_s1 + $0x238] sm:$0xff]   ;;  %v2239_v15 = vld [vmem:[%s2877_s1 + $0x2f0] sm:$0xff]   ;;  %v2242_v18 = vld [vmem:[%s2877_s1 + $0x228] sm:$0xff]  }
  0x1c   :  { %1946 = vmatprep.subr.bf16.mxu0 %v2185_v29  ;;  %v2235_v11 = vld [vmem:[%s2877_s1 + $0x2f8] sm:$0xff]   ;;  %v2240_v16 = vld [vmem:[%s2877_s1 + $0x2b0] sm:$0xff]   ;;  %v2243_v19 = vld [vmem:[%s2877_s1 + $0x2e8] sm:$0xff]  }
  0x1d   :  { %1967 = vmatpush3.bf16.msra.mxu1 %v2184_v28  ;;  %v2236_v12 = vld [vmem:[%s2877_s1 + $0x2b8] sm:$0xff]   ;;  %v2244_v20 = vld [vmem:[%s2877_s1 + $0x2a8] sm:$0xff]   ;;  %v2245_v21 = vld [vmem:[%s2877_s1 + $0x260] sm:$0xff]  }
  0x1e   :  { %1968 = vmatprep.subr.bf16.mxu1 %v2187_v31  ;;  %v2246_v22 = vld [vmem:[%s2877_s1 + $0x220] sm:$0xff]   ;;  %v2249_v25 = vld [vmem:[%s2877_s1 + $0x258] sm:$0xff]   ;;  %v2253_v29 = vld [vmem:[%s2877_s1 + $0x250] sm:$0xff]  }
  0x1f   :  { %1947 = vmatpush3.bf16.msra.mxu0 %v2186_v30  ;;  %v2247_v23 = vld [vmem:[%s2877_s1 + $0x2e0] sm:$0xff]   ;;  %v2250_v26 = vld [vmem:[%s2877_s1 + $0x218] sm:$0xff]   ;;  %v2254_v30 = vld [vmem:[%s2877_s1 + $0x210] sm:$0xff]  }
  0x20   :  { %1976 = vmatprep.subr.bf16.mxu0 %v2192_v35  ;;  %v2248_v24 = vld [vmem:[%s2877_s1 + $0x2a0] sm:$0xff]   ;;  %v2251_v27 = vld [vmem:[%s2877_s1 + $0x2d8] sm:$0xff]   ;;  %v2255_v31 = vld [vmem:[%s2877_s1 + $0x2d0] sm:$0xff]  }
  0x21   :  { %1969 = vmatpush3.bf16.msra.mxu1 %v2191_v34  ;;  %v2252_v28 = vld [vmem:[%s2877_s1 + $0x298] sm:$0xff]   ;;  %v2257_v33 = vld [vmem:[%s2877_s1 + $0x248] sm:$0xff]   ;;  %v2261_v37 = vld [vmem:[%s2877_s1 + $0x240] sm:$0xff]  }
  0x22   :  { %1379 = vmatmul.mubr.bf16.vlgmr.msra.gmra.mxu0 %v2188_v32  ;;  %1998 = vmatprep.subr.bf16.mxu1 %v2197_v39  ;;  %v2256_v32 = vld [vmem:[%s2877_s1 + $0x290] sm:$0xff]   ;;  %v2258_v34 = vld [vmem:[%s2877_s1 + $0x208] sm:$0xff]   ;;  %v2263_v39 = vld [vmem:[%s2877_s1 + $0x2c0] sm:$0xff]  }
  0x23   :  { %1977 = vmatpush3.bf16.msra.mxu0 %v2196_v38  ;;  %1460 = vmatprep.mubr.bf16.mxu0 %v2228_v5  ;;  %v2259_v35 = vld [vmem:[%s2877_s1 + $0x2c8] sm:$0xff]   ;;  %v2262_v38 = vld [vmem:[%s2877_s1 + $0x200] sm:$0xff]   ;;  %v2293_v5 = vld [vmem:[%s2877_s1 + $0x3d0] sm:$0xff]  }
  0x24   :  { %1420 = vmatmul.mubr.bf16.vlgmr.msra.gmra.mxu1 %v2193_v36  ;;  %1978 = vmatprep.subr.bf16.mxu0 %v2199_v41  ;;  %v2260_v36 = vld [vmem:[%s2877_s1 + $0x288] sm:$0xff]   ;;  %v2266_v41 = vld [vmem:[%s2878_s0 + $0x24] ss:$76 sps:$4 sm:$0x1f]  }
  0x25   :  { %1999 = vmatpush3.bf16.msra.mxu1 %v2198_v40  ;;  %1501 = vmatprep.mubr.bf16.mxu1 %v2233_v9  ;;  %v2264_v40 = vld [vmem:[%s2878_s0 + $0x20] ss:$76 sps:$4 sm:$0x1f]  }
  0x26   :  { %2000 = vmatprep.subr.bf16.mxu1 %v2201_v43  ;;  %v2268_v43 = vld [vmem:[%s2877_s1 + $0x378] sm:$0xff]   ;;  %v2297_v9 = vld [vmem:[%s2877_s1 + $0x3c8] sm:$0xff]  }
  0x27   :  { %1979 = vmatpush3.bf16.msra.mxu0 %v2200_v42  ;;  %v2267_v42 = vld [vmem:[%s2877_s1 + $0x280] sm:$0xff]  }
  0x28   :  { %1980 = vmatprep.subr.bf16.mxu0 %v2203_v45  ;;  %v2271_v45 = vld [vmem:[%s2878_s0 + $0x2c] ss:$76 sps:$4 sm:$0x1f]  }
  0x29   :  { %2001 = vmatpush3.bf16.msra.mxu1 %v2202_v44  ;;  %v2269_v44 = vld [vmem:[%s2878_s0 + $0x28] ss:$76 sps:$4 sm:$0x1f]  }
  0x2a   :  { %2002 = vmatprep.subr.bf16.mxu1 %v2205_v47  ;;  %v2273_v47 = vld [vmem:[%s2877_s1 + $0x3f8] sm:$0xff]  }
  0x2b   :  { %1981 = vmatpush3.bf16.msra.mxu0 %v2204_v46  ;;  %v2272_v46 = vld [vmem:[%s2877_s1 + $0x338] sm:$0xff]  }
  0x2c   :  { %1982 = vmatprep.subr.bf16.mxu0 %v2207_v49  ;;  %v2275_v49 = vld [vmem:[%s2877_s1 + $0x370] sm:$0xff]  }
  0x2d   :  { %2003 = vmatpush3.bf16.msra.mxu1 %v2206_v48  ;;  %v2274_v48 = vld [vmem:[%s2877_s1 + $0x3b8] sm:$0xff]  }
  0x2e   :  { %2004 = vmatprep.subr.bf16.mxu1 %v2209_v51  ;;  %v2277_v51 = vld [vmem:[%s2877_s1 + $0x3f0] sm:$0xff]  }
  0x2f   :  { %1983 = vmatpush3.bf16.msra.mxu0 %v2208_v50  ;;  %v2276_v50 = vld [vmem:[%s2877_s1 + $0x330] sm:$0xff]  }
  0x30   :  { %1984 = vmatprep.subr.bf16.mxu0 %v2211_v53  ;;  %v2279_v53 = vld [vmem:[%s2877_s1 + $0x368] sm:$0xff]  }
  0x31   :  { %2005 = vmatpush3.bf16.msra.mxu1 %v2210_v52  ;;  %v2278_v52 = vld [vmem:[%s2877_s1 + $0x3b0] sm:$0xff]  }
  0x32   :  { %2006 = vmatprep.subr.bf16.mxu1 %v2213_v55  ;;  %v2280_v55 = vld [vmem:[%s2877_s1 + $0x328] sm:$0xff]  }
  0x33   :  { %1985 = vmatpush3.bf16.msra.mxu0 %v2212_v54  ;;  %v335_v54 = vld [vmem:[%s2879_s2] sm:$0xff] }
  0x34   :  { %1986 = vmatprep.subr.bf16.mxu0 %v2215_v57  ;;  %339 = vperm.xlu0 %2156, %v335_v54   ;;  %v2282_v57 = vld [vmem:[%s2877_s1 + $0x3a8] sm:$0xff]  }
  0x35   :  { %2007 = vmatpush3.bf16.msra.mxu1 %v2214_v56  ;;  %v2281_v56 = vld [vmem:[%s2877_s1 + $0x3e8] sm:$0xff]  }
  0x36   :  { %2008 = vmatprep.subr.bf16.mxu1 %v2217_v59  ;;  %v336_v59 = vld [vmem:[%s2879_s2 + $0x8] sm:$0x3] }
  0x37   :  { %1987 = vmatpush3.bf16.msra.mxu0 %v2216_v58  ;;  %v2283_v58 = vld [vmem:[%s2877_s1 + $0x360] sm:$0xff]  }
  0x38   :  { %1988 = vmatprep.subr.bf16.mxu0 %v2219_v61  ;;  %344 = vperm.xlu0 %2156, %v336_v59   ;;  %v2285_v61 = vld [vmem:[%s2877_s1 + $0x3e0] sm:$0xff]  }
  0x39   :  { %2009 = vmatpush3.bf16.msra.mxu1 %v2218_v60  ;;  %v2284_v60 = vld [vmem:[%s2877_s1 + $0x320] sm:$0xff]  }
  0x3a   :  { %2010 = vmatprep.subr.bf16.mxu1 %v2221_v63  ;;  %v2287_v63 = vld [vmem:[%s2877_s1 + $0x358] sm:$0xff]  }
  0x3b   :  { %1989 = vmatpush3.bf16.msra.mxu0 %v2220_v62  ;;  %v2286_v62 = vld [vmem:[%s2877_s1 + $0x3a0] sm:$0xff]  }
  0x3c   :  { %1990 = vmatprep.subr.bf16.mxu0 %v2223_v1  ;;  %v2289_v1 = vld [vmem:[%s2877_s1 + $0x3d8] sm:$0xff]  }
  0x3d   :  { %2011 = vmatpush3.bf16.msra.mxu1 %v2222_v0  ;;  %v2288_v0 = vld [vmem:[%s2877_s1 + $0x318] sm:$0xff]  }
  0x3e   :  { %2012 = vmatprep.subr.bf16.mxu1 %v2225_v3  ;;  %v2291_v3 = vld [vmem:[%s2877_s1 + $0x350] sm:$0xff]  }
  0x3f   :  { %1991 = vmatpush3.bf16.msra.mxu0 %v2224_v2  ;;  %v2290_v2 = vld [vmem:[%s2877_s1 + $0x398] sm:$0xff]  }
  0x40   :  { %2020 = vmatprep.subr.bf16.mxu0 %v2230_v7  ;;  %v2295_v7 = vld [vmem:[%s2877_s1 + $0x348] sm:$0xff]  }
  0x41   :  { %2013 = vmatpush3.bf16.msra.mxu1 %v2229_v6  ;;  %v2294_v6 = vld [vmem:[%s2877_s1 + $0x390] sm:$0xff]  }
  0x42   :  { %1461 = vmatmul.mubr.bf16.vlgmr.msra.gmra.mxu0 %v2226_v4  ;;  %2042 = vmatprep.subr.bf16.mxu1 %v2235_v11  ;;  %v2292_v4 = vld [vmem:[%s2877_s1 + $0x310] sm:$0xff]   ;;  %v2299_v11 = vld [vmem:[%s2877_s1 + $0x340] sm:$0xff]  }
  0x43   :  { %2021 = vmatpush3.bf16.msra.mxu0 %v2234_v10  ;;  %1542 = vmatprep.mubr.bf16.mxu0 %v2266_v41  ;;  %v2298_v10 = vld [vmem:[%s2877_s1 + $0x388] sm:$0xff]   ;;  %v2330_v41 = vld [vmem:[%s2877_s1 + $0x480] sm:$0xff]  }
  0x44   :  { %1502 = vmatmul.mubr.bf16.vlgmr.msra.gmra.mxu1 %v2231_v8  ;;  %2022 = vmatprep.subr.bf16.mxu0 %v2237_v13  ;;  %v2296_v8 = vld [vmem:[%s2877_s1 + $0x308] sm:$0xff]   ;;  %v2301_v13 = vld [vmem:[%s2877_s1 + $0x3c0] sm:$0xff]  }
  0x45   :  { %2043 = vmatpush3.bf16.msra.mxu1 %v2236_v12  ;;  %1583 = vmatprep.mubr.bf16.mxu1 %v2271_v45  ;;  %v2300_v12 = vld [vmem:[%s2877_s1 + $0x300] sm:$0xff]  }
  0x46   :  { %2044 = vmatprep.subr.bf16.mxu1 %v2239_v15  ;;  %v2305_v15 = vld [vmem:[%s2877_s1 + $0x380] sm:$0xff]  }
  0x47   :  { %2023 = vmatpush3.bf16.msra.mxu0 %v2238_v14  ;;  %v2302_v14 = vld [vmem:[%s2878_s0 + $0x30] ss:$76 sps:$4 sm:$0x1f]  }
  0x48   :  { %2024 = vmatprep.subr.bf16.mxu0 %v2241_v17  ;;  %v2306_v17 = vld [vmem:[%s2877_s1 + $0x478] sm:$0xff]  }
  0x49   :  { %2045 = vmatpush3.bf16.msra.mxu1 %v2240_v16  ;;  %v2304_v16 = vld [vmem:[%s2878_s0 + $0x34] ss:$76 sps:$4 sm:$0x1f]  }
  0x4a   :  { %2046 = vmatprep.subr.bf16.mxu1 %v2243_v19  ;;  %v2309_v19 = vld [vmem:[%s2878_s0 + $0x3c] ss:$76 sps:$4 sm:$0x1f]  }
  0x4b   :  { %2025 = vmatpush3.bf16.msra.mxu0 %v2242_v18  ;;  %v2307_v18 = vld [vmem:[%s2878_s0 + $0x38] ss:$76 sps:$4 sm:$0x1f]  }
  0x4c   :  { %2026 = vmatprep.subr.bf16.mxu0 %v2245_v21  ;;  %v2336_v21 = vmov 0.0  }
  0x4d   :  { %2047 = vmatpush3.bf16.msra.mxu1 %v2244_v20  ;;  %v2310_v20 = vld [vmem:[%s2877_s1 + $0x438] sm:$0xff]  }
  0x4e   :  { %2048 = vmatprep.subr.bf16.mxu1 %v2247_v23  ;;  %v2312_v23 = vld [vmem:[%s2877_s1 + $0x430] sm:$0xff]  }
  0x4f   :  { %2027 = vmatpush3.bf16.msra.mxu0 %v2246_v22  ;;  %v2311_v22 = vld [vmem:[%s2877_s1 + $0x470] sm:$0xff]  }
  0x50   :  { %2028 = vmatprep.subr.bf16.mxu0 %v2249_v25  ;;  %v2314_v25 = vld [vmem:[%s2877_s1 + $0x428] sm:$0xff]  }
  0x51   :  { %2049 = vmatpush3.bf16.msra.mxu1 %v2248_v24  ;;  %v2313_v24 = vld [vmem:[%s2877_s1 + $0x468] sm:$0xff]  }
  0x52   :  { %2050 = vmatprep.subr.bf16.mxu1 %v2251_v27  ;;  %v2316_v27 = vld [vmem:[%s2877_s1 + $0x460] sm:$0xff]  }
  0x53   :  { %2029 = vmatpush3.bf16.msra.mxu0 %v2250_v26  ;;  %v2315_v26 = vld [vmem:[%s2877_s1 + $0x4a8] sm:$0xff]  }
  0x54   :  { %2030 = vmatprep.subr.bf16.mxu0 %v2253_v29  ;;  %v2317_v29 = vld [vmem:[%s2877_s1 + $0x420] sm:$0xff]  }
  0x55   :  { %2051 = vmatpush3.bf16.msra.mxu1 %v2252_v28  ;;  %v2318_v28 = vld [vmem:[%s2877_s1 + $0x4a0] sm:$0xff]  }
  0x56   :  { %2052 = vmatprep.subr.bf16.mxu1 %v2255_v31  ;;  %v2321_v31 = vld [vmem:[%s2877_s1 + $0x498] sm:$0xff]  }
  0x57   :  { %2031 = vmatpush3.bf16.msra.mxu0 %v2254_v30  ;;  %v2319_v30 = vld [vmem:[%s2877_s1 + $0x458] sm:$0xff]  }
  0x58   :  { %2032 = vmatprep.subr.bf16.mxu0 %v2257_v33  ;;  %v2322_v33 = vld [vmem:[%s2877_s1 + $0x450] sm:$0xff]  }
  0x59   :  { %2053 = vmatpush3.bf16.msra.mxu1 %v2256_v32  ;;  %v2320_v32 = vld [vmem:[%s2877_s1 + $0x418] sm:$0xff]  }
  0x5a   :  { %2054 = vmatprep.subr.bf16.mxu1 %v2259_v35  ;;  %v2323_v35 = vld [vmem:[%s2877_s1 + $0x410] sm:$0xff]  }
  0x5b   :  { %2033 = vmatpush3.bf16.msra.mxu0 %v2258_v34  ;;  %v2324_v34 = vld [vmem:[%s2877_s1 + $0x490] sm:$0xff]  }
  0x5c   :  { %2034 = vmatprep.subr.bf16.mxu0 %v2261_v37  ;;  %v2327_v37 = vld [vmem:[%s2877_s1 + $0x488] sm:$0xff]  }
  0x5d   :  { %2055 = vmatpush3.bf16.msra.mxu1 %v2260_v36  ;;  %v2325_v36 = vld [vmem:[%s2877_s1 + $0x448] sm:$0xff]  }
  0x5e   :  { %2056 = vmatprep.subr.bf16.mxu1 %v2263_v39  ;;  %v2333_v39 = vld [vmem:[%s2878_s0 + $0x44] ss:$76 sps:$4 sm:$0x1f]  }
  0x5f   :  { %2035 = vmatpush3.bf16.msra.mxu0 %v2262_v38  ;;  %v2326_v38 = vld [vmem:[%s2877_s1 + $0x408] sm:$0xff]  }
  0x60   :  { %2064 = vmatprep.subr.bf16.mxu0 %v2268_v43  ;;  %v2334_v43 = vld [vmem:[%s2878_s0 + $0x48] ss:$76 sps:$4 sm:$0x1f]  }
  0x61   :  { %2057 = vmatpush3.bf16.msra.mxu1 %v2267_v42  ;;  %v2329_v42 = vld [vmem:[%s2877_s1 + $0x400] sm:$0xff]  }
  0x62   :  { %1543 = vmatmul.mubr.bf16.vlgmr.msra.gmra.mxu0 %v2264_v40  ;;  %2086 = vmatprep.subr.bf16.mxu1 %v2273_v47  ;;  %v2328_v40 = vld [vmem:[%s2877_s1 + $0x440] sm:$0xff]  }
  0x63   :  { %2065 = vmatpush3.bf16.msra.mxu0 %v2272_v46  ;;  %1624 = vmatprep.mubr.bf16.mxu0 %v2304_v16 }
  0x64   :  { %1584 = vmatmul.mubr.bf16.vlgmr.msra.gmra.mxu1 %v2269_v44  ;;  %2066 = vmatprep.subr.bf16.mxu0 %v2275_v49  ;;  %v2331_v44 = vld [vmem:[%s2878_s0 + $0x40] ss:$76 sps:$4 sm:$0x1f]  }
  0x65   :  { %2087 = vmatpush3.bf16.msra.mxu1 %v2274_v48  ;;  %1665 = vmatprep.mubr.bf16.mxu1 %v2309_v19 }
  0x66   :  { %2088 = vmatprep.subr.bf16.mxu1 %v2277_v51 }
  0x67   :  { %2067 = vmatpush3.bf16.msra.mxu0 %v2276_v50 }
  0x68   :  { %2068 = vmatprep.subr.bf16.mxu0 %v2279_v53 }
  0x69   :  { %2089 = vmatpush3.bf16.msra.mxu1 %v2278_v52 }
  0x6a   :  { %2090 = vmatprep.subr.bf16.mxu1 %v2281_v56 }
  0x6b   :  { %2069 = vmatpush3.bf16.msra.mxu0 %v2280_v55 }
  0x6c   :  { %2070 = vmatprep.subr.bf16.mxu0 %v2283_v58 }
  0x6d   :  { %2091 = vmatpush3.bf16.msra.mxu1 %v2282_v57 }
  0x6e   :  { %2092 = vmatprep.subr.bf16.mxu1 %v2285_v61 }
  0x6f   :  { %2071 = vmatpush3.bf16.msra.mxu0 %v2284_v60 }
  0x70   :  { %2072 = vmatprep.subr.bf16.mxu0 %v2287_v63 }
  0x71   :  { %2093 = vmatpush3.bf16.msra.mxu1 %v2286_v62 }
  0x72   :  { %2094 = vmatprep.subr.bf16.mxu1 %v2289_v1 }
  0x73   :  { %2073 = vmatpush3.bf16.msra.mxu0 %v2288_v0 }
  0x74   :  { %2074 = vmatprep.subr.bf16.mxu0 %v2291_v3 }
  0x75   :  { %2095 = vmatpush3.bf16.msra.mxu1 %v2290_v2 }
  0x76   :  { %2096 = vmatprep.subr.bf16.mxu1 %v2293_v5 }
  0x77   :  { %2075 = vmatpush3.bf16.msra.mxu0 %v2292_v4 }
  0x78   :  { %2076 = vmatprep.subr.bf16.mxu0 %v2295_v7 }
  0x79   :  { %2097 = vmatpush3.bf16.msra.mxu1 %v2294_v6 }
  0x7a   :  { %2098 = vmatprep.subr.bf16.mxu1 %v2297_v9 }
  0x7b   :  { %2077 = vmatpush3.bf16.msra.mxu0 %v2296_v8 }
  0x7c   :  { %2078 = vmatprep.subr.bf16.mxu0 %v2299_v11 }
  0x7d   :  { %2099 = vmatpush3.bf16.msra.mxu1 %v2298_v10 }
  0x7e   :  { %2100 = vmatprep.subr.bf16.mxu1 %v2301_v13 }
  0x7f   :  { %2079 = vmatpush3.bf16.msra.mxu0 %v2300_v12 }
  0x80   :  { %2108 = vmatprep.subr.bf16.mxu0 %v2306_v17 }
  0x81   :  { %2101 = vmatpush3.bf16.msra.mxu1 %v2305_v15 }
  0x82   :  { %1625 = vmatmul.mubr.bf16.vlgmr.msra.gmra.mxu0 %v2302_v14  ;;  %2137 = vmatprep.subr.bf16.mxu1 %v2336_v21 }
  0x83   :  { %2109 = vmatpush3.bf16.msra.mxu0 %v2310_v20  ;;  %1706 = vmatprep.mubr.bf16.mxu0 %v2333_v39 }
  0x84   :  { %1666 = vmatmul.mubr.bf16.vlgmr.msra.gmra.mxu1 %v2307_v18  ;;  %2110 = vmatprep.subr.bf16.mxu0 %v2311_v22 }
  0x85   :  { %2149 = vmatprep.mubr.msk.bf16.mxu1 %vm2337_vm0, %v2336_v21  ;;  %2138 = vmatpush3.bf16.msra.mxu1 %v2315_v26 }
  0x86   :  { %2139 = vmatprep.subr.bf16.mxu1 %v2336_v21 }
  0x87   :  { %2111 = vmatpush3.bf16.msra.mxu0 %v2312_v23 }
  0x88   :  { %2112 = vmatprep.subr.bf16.mxu0 %v2313_v24 }
  0x89   :  { %2140 = vmatpush3.bf16.msra.mxu1 %v2318_v28 }
  0x8a   :  { %2141 = vmatprep.subr.bf16.mxu1 %v2336_v21 }
  0x8b   :  { %2113 = vmatpush3.bf16.msra.mxu0 %v2314_v25 }
  0x8c   :  { %2114 = vmatprep.subr.bf16.mxu0 %v2316_v27 }
  0x8d   :  { %2142 = vmatpush3.bf16.msra.mxu1 %v2321_v31 }
  0x8e   :  { %2143 = vmatprep.subr.bf16.mxu1 %v2336_v21 }
  0x8f   :  { %2115 = vmatpush3.bf16.msra.mxu0 %v2317_v29 }
  0x90   :  { %2116 = vmatprep.subr.bf16.mxu0 %v2319_v30 }
  0x91   :  { %2144 = vmatpush3.bf16.msra.mxu1 %v2324_v34 }
  0x92   :  { %2145 = vmatprep.subr.bf16.mxu1 %v2336_v21 }
  0x93   :  { %2117 = vmatpush3.bf16.msra.mxu0 %v2320_v32 }
  0x94   :  { %2118 = vmatprep.subr.bf16.mxu0 %v2322_v33 }
  0x95   :  { %2146 = vmatpush3.bf16.msra.mxu1 %v2327_v37 }
  0x96   :  { %2147 = vmatprep.subr.bf16.mxu1 %v2336_v21 }
  0x97   :  { %2119 = vmatpush3.bf16.msra.mxu0 %v2323_v35 }
  0x98   :  { %2120 = vmatprep.subr.bf16.mxu0 %v2325_v36 }
  0x99   :  { %2148 = vmatpush3.bf16.msra.mxu1 %v2330_v41 }
  0x9b   :  { %2121 = vmatpush3.bf16.msra.mxu0 %v2326_v38 }
  0x9c   :  { %2122 = vmatprep.subr.bf16.mxu0 %v2328_v40  ;;  %2150 = vmatmul.mubr.msk.bf16.vlgmr.msra.gmra.mxu1 %vm1342_vm1, %v2334_v43 }
  0x9f   :  { %2123 = vmatpush3.bf16.msra.mxu0 %v2329_v42 }
  0xa2   :  { %1707 = vmatmul.mubr.bf16.vlgmr.msra.gmra.mxu0 %v2331_v44 }
  0xaf   :  { %v340_v1 = vpop.permute.xlu0 %339 }
  0xb3   :  { %v345_v8 = vpop.permute.xlu0 %344 }
  0xe2   :  { %v1948_v45 = vpop.f32.mrf.mxu0 }
  0xe4   :  { %v1970_v46 = vpop.f32.mrf.mxu1  ;;  %v1949_v47 = vpop.f32.mrf.mxu0 }
  0xe5   :  { %v1950_v2 = vadd.f32 %v1949_v47, %v1948_v45 }
  0xe6   :  { %v1971_v48 = vpop.f32.mrf.mxu1  ;;  %v1951_v49 = vpop.f32.mrf.mxu0 }
  0xe7   :  { %v1381_v5 = vadd.f32 %v1950_v2, %v340_v1  ;;  %v1972_v6 = vadd.f32 %v1971_v48, %v1970_v46 }
  0xe8   :  { %v1973_v50 = vpop.f32.mrf.mxu1  ;;  %v1952_v51 = vpop.f32.mrf.mxu0 }
  0xe9   :  { %v1953_v7 = vadd.f32 %v1952_v51, %v1951_v49  ;;  %v1422_v14 = vadd.f32 %v1972_v6, %v1381_v5 }
  0xea   :  { %v1974_v52 = vpop.f32.mrf.mxu1 }
  0xeb   :  { %v1384_v15 = vadd.f32 %v1953_v7, %v345_v8  ;;  %v1975_v16 = vadd.f32 %v1974_v52, %v1973_v50 }
  0xed   :  { %v1425_v22 = vadd.f32 %v1975_v16, %v1384_v15 }
 0x102   :  { %v1992_v53 = vpop.f32.mrf.mxu0 }
 0x104   :  { %v2014_v54 = vpop.f32.mrf.mxu1  ;;  %v1993_v55 = vpop.f32.mrf.mxu0 }
 0x105   :  { %v1994_v11 = vadd.f32 %v1993_v55, %v1992_v53 }
 0x106   :  { %v2015_v56 = vpop.f32.mrf.mxu1  ;;  %v1995_v57 = vpop.f32.mrf.mxu0 }
 0x107   :  { %v1463_v17 = vadd.f32 %v1994_v11, %v1422_v14  ;;  %v2016_v18 = vadd.f32 %v2015_v56, %v2014_v54 }
 0x108   :  { %v2017_v58 = vpop.f32.mrf.mxu1  ;;  %v1996_v59 = vpop.f32.mrf.mxu0 }
 0x109   :  { %v1997_v19 = vadd.f32 %v1996_v59, %v1995_v57  ;;  %v1504_v24 = vadd.f32 %v2016_v18, %v1463_v17 }
 0x10a   :  { %v2018_v60 = vpop.f32.mrf.mxu1 }
 0x10b   :  { %v1466_v25 = vadd.f32 %v1997_v19, %v1425_v22  ;;  %v2019_v26 = vadd.f32 %v2018_v60, %v2017_v58 }
 0x10d   :  { %v1507_v32 = vadd.f32 %v2019_v26, %v1466_v25 }
 0x122   :  { %v2036_v61 = vpop.f32.mrf.mxu0 }
 0x124   :  { %v2058_v62 = vpop.f32.mrf.mxu1  ;;  %v2037_v63 = vpop.f32.mrf.mxu0 }
 0x125   :  { %v2038_v23 = vadd.f32 %v2037_v63, %v2036_v61 }
 0x126   :  { %v2059_v0 = vpop.f32.mrf.mxu1  ;;  %v2039_v3 = vpop.f32.mrf.mxu0 }
 0x127   :  { %v1545_v29 = vadd.f32 %v2038_v23, %v1504_v24  ;;  %v2060_v30 = vadd.f32 %v2059_v0, %v2058_v62 }
 0x128   :  { %v2061_v4 = vpop.f32.mrf.mxu1  ;;  %v2040_v9 = vpop.f32.mrf.mxu0 }
 0x129   :  { %v2041_v31 = vadd.f32 %v2040_v9, %v2039_v3  ;;  %v1586_v36 = vadd.f32 %v2060_v30, %v1545_v29 }
 0x12a   :  { %v2062_v10 = vpop.f32.mrf.mxu1 }
 0x12b   :  { %v1548_v37 = vadd.f32 %v2041_v31, %v1507_v32  ;;  %v2063_v38 = vadd.f32 %v2062_v10, %v2061_v4 }
 0x12d   :  { %v1589_v45 = vadd.f32 %v2063_v38, %v1548_v37 }
 0x142   :  { %v2080_v12 = vpop.f32.mrf.mxu0 }
 0x144   :  { %v2102_v13 = vpop.f32.mrf.mxu1  ;;  %v2081_v20 = vpop.f32.mrf.mxu0 }
 0x145   :  { %v2082_v33 = vadd.f32 %v2081_v20, %v2080_v12 }
 0x146   :  { %v2103_v21 = vpop.f32.mrf.mxu1  ;;  %v2083_v27 = vpop.f32.mrf.mxu0 }
 0x147   :  { %v1627_v40 = vadd.f32 %v2082_v33, %v1586_v36  ;;  %v2104_v41 = vadd.f32 %v2103_v21, %v2102_v13 }
 0x148   :  { %v2105_v28 = vpop.f32.mrf.mxu1  ;;  %v2084_v34 = vpop.f32.mrf.mxu0 }
 0x149   :  { %v2085_v42 = vadd.f32 %v2084_v34, %v2083_v27  ;;  %v1668_v48 = vadd.f32 %v2104_v41, %v1627_v40 }
 0x14a   :  { %v2106_v35 = vpop.f32.mrf.mxu1 }
 0x14b   :  { %v1630_v49 = vadd.f32 %v2085_v42, %v1589_v45  ;;  %v2107_v50 = vadd.f32 %v2106_v35, %v2105_v28 }
 0x14d   :  { %v1671_v56 = vadd.f32 %v2107_v50, %v1630_v49 }
 0x15c   :  { %v1749_v39 = vpop.f32.mrf.mxu1 }
 0x15e   :  { %v2151_v44 = vpop.f32.mrf.mxu1 }
 0x160   :  { %v1752_v47 = vpop.f32.mrf.mxu1 }
 0x162   :  { %v2124_v43 = vpop.f32.mrf.mxu0  ;;  %v2152_v53 = vpop.f32.mrf.mxu1 }
 0x164   :  { %v2125_v46 = vpop.f32.mrf.mxu0 }
 0x165   :  { %v2126_v51 = vadd.f32 %v2125_v46, %v2124_v43 }
 0x166   :  { %v2127_v52 = vpop.f32.mrf.mxu0 }
 0x167   :  { %v1709_v54 = vadd.f32 %v2126_v51, %v1668_v48 }
 0x168   :  { %v2128_v55 = vpop.f32.mrf.mxu0 }
 0x169   :  { %v1750_v57 = vadd.f32 %v1749_v39, %v1709_v54  ;;  %v2129_v58 = vadd.f32 %v2128_v55, %v2127_v52 }
 0x16b   :  { %1756 = vst [vmem:[%s2880_s3] sm:$0xff] %v1750_v57  ;;  %v1712_v59 = vadd.f32 %v2129_v58, %v1671_v56 }
 0x16d   :  { %v1753_v60 = vadd.f32 %v1752_v47, %v1712_v59 }
 0x16f   :  { %1757 = vst [vmem:[%s2880_s3 + $0x8] sm:$0x3] %v1753_v60 }

</bundles_post_ra>
